<compile_context>
chip_gen: v7x
topology: tpu7x:2x2x1
jax: 0.10.0
libtpu: 0.0.40
codegen_flags: <defaults>
</compile_context>

<pallas_src>
import functools

import jax
import jax.numpy as jnp
from jax.experimental import pallas as pl
from jax.experimental.pallas import tpu as pltpu

LANE = 128  # TPU lane width.


def _pick_cout_tile(cout_pad):
    """256-wide Cout tiles on v6e/v7x (2x256x256 MXU), 128 on v5e and older."""
    try:
        kind = jax.devices()[0].device_kind.lower()
    except Exception:
        kind = ""
    narrow = any(t in kind for t in ("v2", "v3", "v4", "v5"))
    if (not narrow) and cout_pad % 256 == 0:
        return 256
    return LANE


def _vmem_limit_bytes(per_step_bytes):
    """Explicit scoped-VMEM limit: double-buffered blocks + headroom, clamped
    to the chip's physical VMEM (64 MiB on v7x, 128 MiB on v5e/v6e)."""
    try:
        cap = pltpu.get_tpu_info().vmem_capacity_bytes
    except Exception:
        cap = 64 << 20
    want = 2 * per_step_bytes + (8 << 20)
    return int(max(min(want, cap - (8 << 20)), 32 << 20))


def _conv_kernel(x_ref, w_ref, *out_refs, stride, oh, ow, KH, KW,
                 fuse_relu, with_stats):
    """One grid step: conv of one batch image x one Cout tile.

    x_ref:       (1, HP, WP, Cin)        spatially pre-padded bf16 input
    w_ref:       (Ct, KH*KW, Cin, TILE)  full reshaped weight, VMEM-resident
    out_refs[0]: (1, oh*ow, TILE)        conv output (bf16 if BN follows)
    out_refs[1]: (1, 2, TILE)            [sum, sum_sq] partials (bn=True only)
    """
    y_ref = out_refs[0]
    c = pl.program_id(1)
    M = oh * ow
    tile = y_ref.shape[2]

    acc = jnp.zeros((M, tile), jnp.float32)
    for kh in range(KH):
        for kw in range(KW):
            rows = pl.ds(kh, oh) if stride == 1 else pl.ds(kh, oh, stride)
            cols = pl.ds(kw, ow) if stride == 1 else pl.ds(kw, ow, stride)
            patch = x_ref[0, rows, cols, :].reshape(M, -1)      # (M, Cin) bf16
            wk = w_ref[c, kh * KW + kw, :, :]                   # (Cin, TILE) bf16
            acc = acc + jnp.dot(patch, wk,
                                preferred_element_type=jnp.float32)

    if with_stats:
        # Per-channel partials for the cross-grid BatchNorm reduction,
        # taken from the f32 accumulator (before any bf16 cast).
        sums_ref = out_refs[1]
        sums_ref[0, 0:1, :] = jnp.sum(acc, axis=0, keepdims=True)
        sums_ref[0, 1:2, :] = jnp.sum(acc * acc, axis=0, keepdims=True)

    if fuse_relu:                                               # bn=False path
        acc = jnp.maximum(acc, 0.0)
    y_ref[0] = acc.astype(y_ref.dtype)                          # lane-dense store


def _bn_relu_kernel(y_ref, scale_ref, shift_ref, o_ref):
    """o = relu(y * scale + shift); every block is lane-dense."""
    y = y_ref[0].astype(jnp.float32)
    o_ref[0] = jnp.maximum(y * scale_ref[...] + shift_ref[...],
                           0.0).astype(o_ref.dtype)


def basic_block_forward(x_nchw, w_oihw, gamma, beta, *, stride, padding,
                        bn=True, eps=1e-5, compute_dtype=jnp.bfloat16):
    """Pallas BasicBlock forward. Takes / returns NCHW to match PyTorch."""
    # TODO(synk): NCHW<->NHWC transposes and the spatial pad are extra
    # wrapper-side HBM passes; drop them if the surrounding model is NHWC.
    x = jnp.transpose(x_nchw, (0, 2, 3, 1))                 # NCHW -> NHWC
    w = jnp.transpose(w_oihw, (2, 3, 1, 0))                 # OIHW -> HWIO
    N, H, W, Cin = x.shape
    KH, KW, _, Cout = w.shape
    oh = (H + 2 * padding - KH) // stride + 1
    ow = (W + 2 * padding - KW) // stride + 1
    M = oh * ow

    Cout_pad = ((Cout + LANE - 1) // LANE) * LANE
    TILE = _pick_cout_tile(Cout_pad)
    Ct = Cout_pad // TILE

    # bf16 input: halves the HBM->VMEM DMA of the padded image.
    xp = jnp.pad(x.astype(compute_dtype),
                 ((0, 0), (padding, padding), (padding, padding), (0, 0)))
    HP, WP = H + 2 * padding, W + 2 * padding

    # Weight -> (Ct, KH*KW, Cin, TILE) bf16, zero-padded output channels.
    w2 = w.reshape(KH * KW, Cin, Cout)
    w2 = jnp.pad(w2, ((0, 0), (0, 0), (0, Cout_pad - Cout)))
    w4 = w2.reshape(KH * KW, Cin, Ct, TILE).transpose(2, 0, 1, 3)
    w4 = w4.astype(compute_dtype)

    # bf16 intermediate when BN follows (stats already taken from f32 acc).
    y_dtype = compute_dtype if bn else x_nchw.dtype

    kernel = functools.partial(
        _conv_kernel, stride=stride, oh=oh, ow=ow, KH=KH, KW=KW,
        fuse_relu=not bn, with_stats=bn)

    out_specs = [pl.BlockSpec((1, M, TILE), lambda n, c: (n, 0, c))]
    out_shape = [jax.ShapeDtypeStruct((N, M, Cout_pad), y_dtype)]
    if bn:
        out_specs.append(pl.BlockSpec((1, 2, TILE), lambda n, c: (n, 0, c)))
        out_shape.append(jax.ShapeDtypeStruct((N, 2, Cout_pad), jnp.float32))

    per_step = (HP * WP * Cin * 2                        # bf16 x block
                + Ct * KH * KW * Cin * TILE * 2          # resident weights
                + M * TILE * jnp.dtype(y_dtype).itemsize # y block
                + (2 * TILE * 4 if bn else 0)            # sums block
                + M * TILE * 4)                          # f32 accumulator
    conv_params = pltpu.CompilerParams(
        dimension_semantics=("parallel", "parallel"),
        vmem_limit_bytes=_vmem_limit_bytes(per_step))

    # TODO(synk): for very large feature maps (early ResNet layers on v7x's
    # 64 MiB VMEM) an additional spatial-row grid axis with halo'd input
    # blocks would bound the per-step footprint; not needed at these shapes.
    res = pl.pallas_call(
        kernel,
        grid=(N, Ct),
        in_specs=[
            pl.BlockSpec((1, HP, WP, Cin), lambda n, c: (n, 0, 0, 0)),
            # Constant index_map: the whole reshaped weight is DMA'd once and
            # stays resident across the grid (no per-batch re-fetch).
            pl.BlockSpec((Ct, KH * KW, Cin, TILE), lambda n, c: (0, 0, 0, 0)),
        ],
        out_specs=out_specs,
        out_shape=out_shape,
        compiler_params=conv_params,
    )(xp, w4)

    if bn:
        y, sums = res
        # Finish the BN reduction on tiny (Cout_pad,) vectors and fold
        # mean/var/gamma/beta into one per-channel scale + shift.
        cnt = float(N * M)
        tot = jnp.sum(sums[:, 0, :], axis=0)
        tot_sq = jnp.sum(sums[:, 1, :], axis=0)
        mean = tot / cnt
        # TODO(synk): E[x^2]-E[x]^2 in f32 can cancel for large activation
        # magnitudes; use a Welford-style combine if this feeds training.
        var = jnp.maximum(tot_sq / cnt - mean * mean, 0.0)   # biased variance
        inv = jax.lax.rsqrt(var + eps)
        g = jnp.pad(gamma.astype(jnp.float32), (0, Cout_pad - Cout))
        b = jnp.pad(beta.astype(jnp.float32), (0, Cout_pad - Cout))
        scale = (g * inv).reshape(1, Cout_pad)
        shift = (b - mean * g * inv).reshape(1, Cout_pad)

        out_flat = pl.pallas_call(
            _bn_relu_kernel,
            grid=(N, Ct),
            in_specs=[
                pl.BlockSpec((1, M, TILE), lambda n, c: (n, 0, c)),
                pl.BlockSpec((1, TILE), lambda n, c: (0, c)),
                pl.BlockSpec((1, TILE), lambda n, c: (0, c)),
            ],
            out_specs=pl.BlockSpec((1, M, TILE), lambda n, c: (n, 0, c)),
            out_shape=jax.ShapeDtypeStruct((N, M, Cout_pad), x_nchw.dtype),
            compiler_params=pltpu.CompilerParams(
                dimension_semantics=("parallel", "parallel")),
        )(y, scale, shift)
    else:
        out_flat = res[0] if isinstance(res, (list, tuple)) else res

    # TODO(synk): for sub-128 / 64-channel layers the 128-lane padding doubles
    # the intermediate HBM traffic; a full-dim (last dim = Cout) masked-store
    # variant would trade lane-density for half the bytes.
    out_nhwc = out_flat.reshape(N, oh, ow, Cout_pad)[..., :Cout]
    return jnp.transpose(out_nhwc, (0, 3, 1, 2))             # NHWC -> NCHW


def _reference_forward(x, w, gamma, beta, *, stride, padding, bn, eps=1e-5):
    """Pure-JAX reference (NCHW), mirrors the PyTorch module forward."""
    y = jax.lax.conv_general_dilated(
        x, w, window_strides=(stride, stride),
        padding=[(padding, padding), (padding, padding)],
        dimension_numbers=('NCHW', 'OIHW', 'NCHW'),
        precision=jax.lax.Precision.HIGHEST)
    if bn:
        mean = jnp.mean(y, axis=(0, 2, 3), keepdims=True)
        var = jnp.mean((y - mean) ** 2, axis=(0, 2, 3), keepdims=True)
        y = (y - mean) * jax.lax.rsqrt(var + eps) * gamma.reshape(1, -1, 1, 1) \
            + beta.reshape(1, -1, 1, 1)
    return jnp.maximum(y, 0.0)


if __name__ == "__main__":
    # BasicBlock(in_channels=4, out_channels=8, kernel_size=3, stride=1,
    #            padding=1, bn=True/False, bias=False)
    N, Cin, H, W = 2, 4, 16, 16
    Cout, K, stride, padding = 8, 3, 1, 1

    key = jax.random.PRNGKey(0)
    kx, kw, kg, kb = jax.random.split(key, 4)
    x = jax.random.normal(kx, (N, Cin, H, W), dtype=jnp.float32)
    w = jax.random.normal(kw, (Cout, Cin, K, K), dtype=jnp.float32) * 0.1
    gamma = 1.0 + 0.1 * jax.random.normal(kg, (Cout,), dtype=jnp.float32)
    beta = 0.1 * jax.random.normal(kb, (Cout,), dtype=jnp.float32)
    # TODO(synk): nn.Conv2d bias=False here; a bias would fold into `shift`
    # (bn=False) or be absorbed by the batch mean (bn=True) -- not modeled.

    # The MXU sees bf16 inputs (f32 accumulation), so compare against a
    # reference fed the same bf16-quantized inputs.  The bn=True path also
    # stores the conv intermediate in bf16, hence the slightly looser tol.
    x_q = x.astype(jnp.bfloat16).astype(jnp.float32)
    w_q = w.astype(jnp.bfloat16).astype(jnp.float32)

    for bn in (True, False):
        out = basic_block_forward(x, w, gamma, beta,
                                  stride=stride, padding=padding, bn=bn)
        out = jax.block_until_ready(out)
        ref = _reference_forward(x_q, w_q, gamma, beta,
                                 stride=stride, padding=padding, bn=bn)
        assert out.shape == (N, Cout, H, W)
        tol = 1e-2 if bn else 2e-3
        assert jnp.allclose(out, ref, atol=tol, rtol=tol), \
            f"mismatch vs reference (bn={bn})"

    print("KERNEL_OK")
</pallas_src>

<mosaic_0001>
module attributes {stable_mosaic.version = 11 : i64} {
  func.func @_conv_kernel(%arg0: i32, %arg1: i32, %arg2: memref<1x18x18x4xbf16, #tpu.memory_space<vmem>>, %arg3: memref<1x9x4x128xbf16, #tpu.memory_space<vmem>>, %arg4: memref<1x256x128xbf16, #tpu.memory_space<vmem>>, %arg5: memref<1x2x128xf32, #tpu.memory_space<vmem>>) attributes {dimension_semantics = [#tpu.dimension_semantics<parallel>, #tpu.dimension_semantics<parallel>], iteration_bounds = array<i64: 2, 1>, scalar_prefetch = 0 : i64, scratch_operands = 0 : i64, tpu.core_type = #tpu.core_type<tc>, window_params = [{transform_indices = @transform_0, window_bounds = array<i64: 1, 18, 18, 4>}, {pipeline_mode = #tpu.pipeline_mode<synchronous>, transform_indices = @transform_1, window_bounds = array<i64: 1, 9, 4, 128>}, {transform_indices = @transform_2, window_bounds = array<i64: 1, 256, 128>}, {transform_indices = @transform_3, window_bounds = array<i64: 1, 2, 128>}]} {
    %cst = arith.constant 0.000000e+00 : f32
    %0 = vector.broadcast %cst : f32 to vector<256x128xf32>
    %c0 = arith.constant 0 : index
    %c0_0 = arith.constant 0 : index
    %c0_1 = arith.constant 0 : index
    %c0_2 = arith.constant 0 : index
    %1 = vector.load %arg2[%c0, %c0_0, %c0_1, %c0_2] : memref<1x18x18x4xbf16, #tpu.memory_space<vmem>>, vector<1x16x16x4xbf16>
    %2 = vector.shape_cast %1 : vector<1x16x16x4xbf16> to vector<16x16x4xbf16>
    %3 = vector.shape_cast %2 : vector<16x16x4xbf16> to vector<256x4xbf16>
    %4 = arith.index_cast %arg1 : i32 to index
    %c0_3 = arith.constant 0 : index
    %c0_4 = arith.constant 0 : index
    %c0_5 = arith.constant 0 : index
    %5 = vector.load %arg3[%4, %c0_3, %c0_4, %c0_5] : memref<1x9x4x128xbf16, #tpu.memory_space<vmem>>, vector<1x1x4x128xbf16>
    %6 = vector.shape_cast %5 : vector<1x1x4x128xbf16> to vector<4x128xbf16>
    %cst_6 = arith.constant dense<0.000000e+00> : vector<256x128xf32>
    %7 = tpu.matmul %3, %6, %cst_6 {dimension_numbers = #tpu.dot_dimension_numbers<[1], [0], [0], [1], [0, 0, 1, 1], [], []>} : vector<256x4xbf16>, vector<4x128xbf16>, vector<256x128xf32> -> vector<256x128xf32>
    %8 = arith.addf %0, %7 : vector<256x128xf32>
    %c0_7 = arith.constant 0 : index
    %c0_8 = arith.constant 0 : index
    %c1 = arith.constant 1 : index
    %c0_9 = arith.constant 0 : index
    %9 = vector.load %arg2[%c0_7, %c0_8, %c1, %c0_9] : memref<1x18x18x4xbf16, #tpu.memory_space<vmem>>, vector<1x16x16x4xbf16>
    %10 = vector.shape_cast %9 : vector<1x16x16x4xbf16> to vector<16x16x4xbf16>
    %11 = vector.shape_cast %10 : vector<16x16x4xbf16> to vector<256x4xbf16>
    %12 = arith.index_cast %arg1 : i32 to index
    %c1_10 = arith.constant 1 : index
    %c0_11 = arith.constant 0 : index
    %c0_12 = arith.constant 0 : index
    %13 = vector.load %arg3[%12, %c1_10, %c0_11, %c0_12] : memref<1x9x4x128xbf16, #tpu.memory_space<vmem>>, vector<1x1x4x128xbf16>
    %14 = vector.shape_cast %13 : vector<1x1x4x128xbf16> to vector<4x128xbf16>
    %cst_13 = arith.constant dense<0.000000e+00> : vector<256x128xf32>
    %15 = tpu.matmul %11, %14, %cst_13 {dimension_numbers = #tpu.dot_dimension_numbers<[1], [0], [0], [1], [0, 0, 1, 1], [], []>} : vector<256x4xbf16>, vector<4x128xbf16>, vector<256x128xf32> -> vector<256x128xf32>
    %16 = arith.addf %8, %15 : vector<256x128xf32>
    %c0_14 = arith.constant 0 : index
    %c0_15 = arith.constant 0 : index
    %c2 = arith.constant 2 : index
    %c0_16 = arith.constant 0 : index
    %17 = vector.load %arg2[%c0_14, %c0_15, %c2, %c0_16] : memref<1x18x18x4xbf16, #tpu.memory_space<vmem>>, vector<1x16x16x4xbf16>
    %18 = vector.shape_cast %17 : vector<1x16x16x4xbf16> to vector<16x16x4xbf16>
    %19 = vector.shape_cast %18 : vector<16x16x4xbf16> to vector<256x4xbf16>
    %20 = arith.index_cast %arg1 : i32 to index
    %c2_17 = arith.constant 2 : index
    %c0_18 = arith.constant 0 : index
    %c0_19 = arith.constant 0 : index
    %21 = vector.load %arg3[%20, %c2_17, %c0_18, %c0_19] : memref<1x9x4x128xbf16, #tpu.memory_space<vmem>>, vector<1x1x4x128xbf16>
    %22 = vector.shape_cast %21 : vector<1x1x4x128xbf16> to vector<4x128xbf16>
    %cst_20 = arith.constant dense<0.000000e+00> : vector<256x128xf32>
    %23 = tpu.matmul %19, %22, %cst_20 {dimension_numbers = #tpu.dot_dimension_numbers<[1], [0], [0], [1], [0, 0, 1, 1], [], []>} : vector<256x4xbf16>, vector<4x128xbf16>, vector<256x128xf32> -> vector<256x128xf32>
    %24 = arith.addf %16, %23 : vector<256x128xf32>
    %c0_21 = arith.constant 0 : index
    %c1_22 = arith.constant 1 : index
    %c0_23 = arith.constant 0 : index
    %c0_24 = arith.constant 0 : index
    %25 = vector.load %arg2[%c0_21, %c1_22, %c0_23, %c0_24] : memref<1x18x18x4xbf16, #tpu.memory_space<vmem>>, vector<1x16x16x4xbf16>
    %26 = vector.shape_cast %25 : vector<1x16x16x4xbf16> to vector<16x16x4xbf16>
    %27 = vector.shape_cast %26 : vector<16x16x4xbf16> to vector<256x4xbf16>
    %28 = arith.index_cast %arg1 : i32 to index
    %c3 = arith.constant 3 : index
    %c0_25 = arith.constant 0 : index
    %c0_26 = arith.constant 0 : index
    %29 = vector.load %arg3[%28, %c3, %c0_25, %c0_26] : memref<1x9x4x128xbf16, #tpu.memory_space<vmem>>, vector<1x1x4x128xbf16>
    %30 = vector.shape_cast %29 : vector<1x1x4x128xbf16> to vector<4x128xbf16>
    %cst_27 = arith.constant dense<0.000000e+00> : vector<256x128xf32>
    %31 = tpu.matmul %27, %30, %cst_27 {dimension_numbers = #tpu.dot_dimension_numbers<[1], [0], [0], [1], [0, 0, 1, 1], [], []>} : vector<256x4xbf16>, vector<4x128xbf16>, vector<256x128xf32> -> vector<256x128xf32>
    %32 = arith.addf %24, %31 : vector<256x128xf32>
    %c0_28 = arith.constant 0 : index
    %c1_29 = arith.constant 1 : index
    %c1_30 = arith.constant 1 : index
    %c0_31 = arith.constant 0 : index
    %33 = vector.load %arg2[%c0_28, %c1_29, %c1_30, %c0_31] : memref<1x18x18x4xbf16, #tpu.memory_space<vmem>>, vector<1x16x16x4xbf16>
    %34 = vector.shape_cast %33 : vector<1x16x16x4xbf16> to vector<16x16x4xbf16>
    %35 = vector.shape_cast %34 : vector<16x16x4xbf16> to vector<256x4xbf16>
    %36 = arith.index_cast %arg1 : i32 to index
    %c4 = arith.constant 4 : index
    %c0_32 = arith.constant 0 : index
    %c0_33 = arith.constant 0 : index
    %37 = vector.load %arg3[%36, %c4, %c0_32, %c0_33] : memref<1x9x4x128xbf16, #tpu.memory_space<vmem>>, vector<1x1x4x128xbf16>
    %38 = vector.shape_cast %37 : vector<1x1x4x128xbf16> to vector<4x128xbf16>
    %cst_34 = arith.constant dense<0.000000e+00> : vector<256x128xf32>
    %39 = tpu.matmul %35, %38, %cst_34 {dimension_numbers = #tpu.dot_dimension_numbers<[1], [0], [0], [1], [0, 0, 1, 1], [], []>} : vector<256x4xbf16>, vector<4x128xbf16>, vector<256x128xf32> -> vector<256x128xf32>
    %40 = arith.addf %32, %39 : vector<256x128xf32>
    %c0_35 = arith.constant 0 : index
    %c1_36 = arith.constant 1 : index
    %c2_37 = arith.constant 2 : index
    %c0_38 = arith.constant 0 : index
    %41 = vector.load %arg2[%c0_35, %c1_36, %c2_37, %c0_38] : memref<1x18x18x4xbf16, #tpu.memory_space<vmem>>, vector<1x16x16x4xbf16>
    %42 = vector.shape_cast %41 : vector<1x16x16x4xbf16> to vector<16x16x4xbf16>
    %43 = vector.shape_cast %42 : vector<16x16x4xbf16> to vector<256x4xbf16>
    %44 = arith.index_cast %arg1 : i32 to index
    %c5 = arith.constant 5 : index
    %c0_39 = arith.constant 0 : index
    %c0_40 = arith.constant 0 : index
    %45 = vector.load %arg3[%44, %c5, %c0_39, %c0_40] : memref<1x9x4x128xbf16, #tpu.memory_space<vmem>>, vector<1x1x4x128xbf16>
    %46 = vector.shape_cast %45 : vector<1x1x4x128xbf16> to vector<4x128xbf16>
    %cst_41 = arith.constant dense<0.000000e+00> : vector<256x128xf32>
    %47 = tpu.matmul %43, %46, %cst_41 {dimension_numbers = #tpu.dot_dimension_numbers<[1], [0], [0], [1], [0, 0, 1, 1], [], []>} : vector<256x4xbf16>, vector<4x128xbf16>, vector<256x128xf32> -> vector<256x128xf32>
    %48 = arith.addf %40, %47 : vector<256x128xf32>
    %c0_42 = arith.constant 0 : index
    %c2_43 = arith.constant 2 : index
    %c0_44 = arith.constant 0 : index
    %c0_45 = arith.constant 0 : index
    %49 = vector.load %arg2[%c0_42, %c2_43, %c0_44, %c0_45] : memref<1x18x18x4xbf16, #tpu.memory_space<vmem>>, vector<1x16x16x4xbf16>
    %50 = vector.shape_cast %49 : vector<1x16x16x4xbf16> to vector<16x16x4xbf16>
    %51 = vector.shape_cast %50 : vector<16x16x4xbf16> to vector<256x4xbf16>
    %52 = arith.index_cast %arg1 : i32 to index
    %c6 = arith.constant 6 : index
    %c0_46 = arith.constant 0 : index
    %c0_47 = arith.constant 0 : index
    %53 = vector.load %arg3[%52, %c6, %c0_46, %c0_47] : memref<1x9x4x128xbf16, #tpu.memory_space<vmem>>, vector<1x1x4x128xbf16>
    %54 = vector.shape_cast %53 : vector<1x1x4x128xbf16> to vector<4x128xbf16>
    %cst_48 = arith.constant dense<0.000000e+00> : vector<256x128xf32>
    %55 = tpu.matmul %51, %54, %cst_48 {dimension_numbers = #tpu.dot_dimension_numbers<[1], [0], [0], [1], [0, 0, 1, 1], [], []>} : vector<256x4xbf16>, vector<4x128xbf16>, vector<256x128xf32> -> vector<256x128xf32>
    %56 = arith.addf %48, %55 : vector<256x128xf32>
    %c0_49 = arith.constant 0 : index
    %c2_50 = arith.constant 2 : index
    %c1_51 = arith.constant 1 : index
    %c0_52 = arith.constant 0 : index
    %57 = vector.load %arg2[%c0_49, %c2_50, %c1_51, %c0_52] : memref<1x18x18x4xbf16, #tpu.memory_space<vmem>>, vector<1x16x16x4xbf16>
    %58 = vector.shape_cast %57 : vector<1x16x16x4xbf16> to vector<16x16x4xbf16>
    %59 = vector.shape_cast %58 : vector<16x16x4xbf16> to vector<256x4xbf16>
    %60 = arith.index_cast %arg1 : i32 to index
    %c7 = arith.constant 7 : index
    %c0_53 = arith.constant 0 : index
    %c0_54 = arith.constant 0 : index
    %61 = vector.load %arg3[%60, %c7, %c0_53, %c0_54] : memref<1x9x4x128xbf16, #tpu.memory_space<vmem>>, vector<1x1x4x128xbf16>
    %62 = vector.shape_cast %61 : vector<1x1x4x128xbf16> to vector<4x128xbf16>
    %cst_55 = arith.constant dense<0.000000e+00> : vector<256x128xf32>
    %63 = tpu.matmul %59, %62, %cst_55 {dimension_numbers = #tpu.dot_dimension_numbers<[1], [0], [0], [1], [0, 0, 1, 1], [], []>} : vector<256x4xbf16>, vector<4x128xbf16>, vector<256x128xf32> -> vector<256x128xf32>
    %64 = arith.addf %56, %63 : vector<256x128xf32>
    %c0_56 = arith.constant 0 : index
    %c2_57 = arith.constant 2 : index
    %c2_58 = arith.constant 2 : index
    %c0_59 = arith.constant 0 : index
    %65 = vector.load %arg2[%c0_56, %c2_57, %c2_58, %c0_59] : memref<1x18x18x4xbf16, #tpu.memory_space<vmem>>, vector<1x16x16x4xbf16>
    %66 = vector.shape_cast %65 : vector<1x16x16x4xbf16> to vector<16x16x4xbf16>
    %67 = vector.shape_cast %66 : vector<16x16x4xbf16> to vector<256x4xbf16>
    %68 = arith.index_cast %arg1 : i32 to index
    %c8 = arith.constant 8 : index
    %c0_60 = arith.constant 0 : index
    %c0_61 = arith.constant 0 : index
    %69 = vector.load %arg3[%68, %c8, %c0_60, %c0_61] : memref<1x9x4x128xbf16, #tpu.memory_space<vmem>>, vector<1x1x4x128xbf16>
    %70 = vector.shape_cast %69 : vector<1x1x4x128xbf16> to vector<4x128xbf16>
    %cst_62 = arith.constant dense<0.000000e+00> : vector<256x128xf32>
    %71 = tpu.matmul %67, %70, %cst_62 {dimension_numbers = #tpu.dot_dimension_numbers<[1], [0], [0], [1], [0, 0, 1, 1], [], []>} : vector<256x4xbf16>, vector<4x128xbf16>, vector<256x128xf32> -> vector<256x128xf32>
    %72 = arith.addf %64, %71 : vector<256x128xf32>
    %cst_63 = arith.constant dense<0.000000e+00> : vector<128xf32>
    %73 = vector.multi_reduction <add>, %72, %cst_63 [0] : vector<256x128xf32> to vector<128xf32>
    %74 = vector.shape_cast %73 : vector<128xf32> to vector<1x128xf32>
    %c0_64 = arith.constant 0 : index
    %c0_65 = arith.constant 0 : index
    %c0_66 = arith.constant 0 : index
    %75 = vector.load %arg5[%c0_64, %c0_65, %c0_66] : memref<1x2x128xf32, #tpu.memory_space<vmem>>, vector<1x1x128xf32>
    %76 = vector.shape_cast %75 : vector<1x1x128xf32> to vector<1x128xf32>
    %77 = vector.shape_cast %74 : vector<1x128xf32> to vector<1x1x128xf32>
    tpu.vector_store %arg5[%c0_64, %c0_65, %c0_66], %77 {strides = array<i32>} : memref<1x2x128xf32, #tpu.memory_space<vmem>>, vector<1x1x128xf32>,
    %78 = arith.mulf %72, %72 : vector<256x128xf32>
    %cst_67 = arith.constant dense<0.000000e+00> : vector<128xf32>
    %79 = vector.multi_reduction <add>, %78, %cst_67 [0] : vector<256x128xf32> to vector<128xf32>
    %80 = vector.shape_cast %79 : vector<128xf32> to vector<1x128xf32>
    %c0_68 = arith.constant 0 : index
    %c1_69 = arith.constant 1 : index
    %c0_70 = arith.constant 0 : index
    %81 = vector.load %arg5[%c0_68, %c1_69, %c0_70] : memref<1x2x128xf32, #tpu.memory_space<vmem>>, vector<1x1x128xf32>
    %82 = vector.shape_cast %81 : vector<1x1x128xf32> to vector<1x128xf32>
    %83 = vector.shape_cast %80 : vector<1x128xf32> to vector<1x1x128xf32>
    tpu.vector_store %arg5[%c0_68, %c1_69, %c0_70], %83 {strides = array<i32>} : memref<1x2x128xf32, #tpu.memory_space<vmem>>, vector<1x1x128xf32>,
    %84 = arith.truncf %72 : vector<256x128xf32> to vector<256x128xbf16>
    %c0_71 = arith.constant 0 : index
    %c0_72 = arith.constant 0 : index
    %c0_73 = arith.constant 0 : index
    %85 = vector.load %arg4[%c0_71, %c0_72, %c0_73] : memref<1x256x128xbf16, #tpu.memory_space<vmem>>, vector<1x256x128xbf16>
    %86 = vector.shape_cast %85 : vector<1x256x128xbf16> to vector<256x128xbf16>
    %87 = vector.shape_cast %84 : vector<256x128xbf16> to vector<1x256x128xbf16>
    tpu.vector_store %arg4[%c0_71, %c0_72, %c0_73], %87 {strides = array<i32>} : memref<1x256x128xbf16, #tpu.memory_space<vmem>>, vector<1x256x128xbf16>,
    return
  }
  func.func @transform_0(%arg0: i32, %arg1: i32) -> (i32, i32, i32, i32) {
    %c0_i32 = arith.constant 0 : i32
    %c0_i32_0 = arith.constant 0 : i32
    %c0_i32_1 = arith.constant 0 : i32
    %c0_i32_2 = arith.constant 0 : i32
    return %arg0, %c0_i32, %c0_i32_0, %c0_i32_1 : i32, i32, i32, i32
  }
  func.func @transform_1(%arg0: i32, %arg1: i32) -> (i32, i32, i32, i32) {
    %c0_i32 = arith.constant 0 : i32
    %c0_i32_0 = arith.constant 0 : i32
    %c0_i32_1 = arith.constant 0 : i32
    %c0_i32_2 = arith.constant 0 : i32
    %c0_i32_3 = arith.constant 0 : i32
    return %c0_i32, %c0_i32_0, %c0_i32_1, %c0_i32_2 : i32, i32, i32, i32
  }
  func.func @transform_2(%arg0: i32, %arg1: i32) -> (i32, i32, i32) {
    %c0_i32 = arith.constant 0 : i32
    %c0_i32_0 = arith.constant 0 : i32
    return %arg0, %c0_i32, %arg1 : i32, i32, i32
  }
  func.func @transform_3(%arg0: i32, %arg1: i32) -> (i32, i32, i32) {
    %c0_i32 = arith.constant 0 : i32
    %c0_i32_0 = arith.constant 0 : i32
    return %arg0, %c0_i32, %arg1 : i32, i32, i32
  }
}

</mosaic_0001>

<bundles_post_ra>
// kernel: tpu_custom_call.1
= control target key start
LH: loop header
LB: loop body
LE: loop exit
PB: predicated region body
PF: predicated region fallthrough
CT: control target
= control target key end

     0   :  { %9 = vsyncpa [#allocation3], 0  ;;  %s8838_s0 = inlined_call_operand.vmem [shape: bf16[2,18,18,4], index: 0, kind: input, shape index: {}]   ;;  %s8839_s1 = inlined_call_operand.vmem [shape: bf16[1,9,4,128], index: 1, kind: input, shape index: {}]   ;;  %s8840_s2 = inlined_call_operand.hbm [shape: bf16[2,256,128], index: 2, kind: output, shape index: {0}]   ;;  %s8841_s3 = inlined_call_operand.hbm [shape: f32[2,2,128], index: 3, kind: output, shape index: {1}]  }
   0x1   :  { %11 = vsyncpa [#allocation3 + $0x1], 0 }
   0x2   :  { %12 = vsyncpa [#allocation5], 0 }
   0x3   :  { %14 = vsyncpa [#allocation5 + $0x1], 0  ;;  %s6958_s12 = smov 0   ;;  %s6960_s13 = smov 0  }
   0x4   :  { %s6962_s14 = smov 0   ;;  %s6964_s15 = smov 0  }
   0x5   :  { %s6966_s16 = smov 0   ;;  %s6968_s17 = smov 0  }
   0x6 LB: > { %s5216_s18 = sadd.s32 4294967295, %s6932_s17   ;;  %s5217_s19 = sadd.s32 4294967294, %s6932_s17   ;;  %s6932_s17 = sphi %s6968_s17, %s20_s17   ;;  %s6928_s16 = sphi %s6966_s16, %s8915_s16   ;;  %s6924_s15 = sphi %s6964_s15, %s8914_s15   ;;  %s6920_s14 = sphi %s6962_s14, %s8913_s14   ;;  %s6916_s13 = sphi %s6960_s13, %s8912_s13   ;;  %s6912_s12 = sphi %s6958_s12, %s8911_s12  }
   0x7   : > { %s32_s20 = sadd.s32 1, %s6928_s16  ;;  %s88_s21 = sadd.s32 1, %s6920_s14 }
   0x8   : > { %p34_p0 = scmp.ge.s32.totalorder %s32_s20, 2  ;;  %p98_p1 = scmp.ne.s32.totalorder %s6920_s14, %s6916_s13 }
   0x9   : > { %p99_p2 = scmp.eq.s32.totalorder %s5216_s18, 1  ;;  %p104_p3 = scmp.ne.s32.totalorder %s6916_s13, %s6912_s12 }
   0xa   : > { %s8917_s20 = smov (%p34_p0, %s32_s20), 0  ;;  %p105_p5 = scmp.eq.s32.totalorder %s5217_s19, 1 }
   0xb   : > { %p6998_p4 = por %p99_p2, %p98_p1  ;;  %s83_s23 = ssub.s32 %s6928_s16, %s8917_s20 }
   0xc   : > { %p5220_p6 = scmp.ge.s32.totalorder %s6932_s17, 1  ;;  %p86_p7 = scmp.eq.s32.totalorder %s83_s23, 0 }
   0xd   : > { %p7005_p8 = por %p105_p5, %p104_p3  ;;  %p162_p9 = scmp.lt.s32.totalorder %s6932_s17, 3 }
   0xe   : > { %s7011_s25 = scalar_select %p86_p7, %s6920_s14, %s88_s21  }
   0xf   : > { %p163_p10 = pnand %p5220_p6, %p162_p9 }
  0x11   : > { %166 = sbr.rel (%p163_p10) target bundleno = 639 (0x27f), region = 28 }
  0x18   : > { %v5224_v0 = vld [vmem:[%s8839_s1 + $0x2] sm:$0x3]  ;;  %vm737_vm0 = vcmask 1041408   ;;  %v5451_v1 = vld [vmem:[%s8839_s1 + $0x8] sm:$0x3]  ;;  %p191_p11 = scmp.lt.s32.totalorder %s6924_s15, 1 }
  0x19   : > { %6644 = vmatprep.subr.msk.bf16.mxu1 %vm737_vm0, %v5224_v0  ;;  %6648 = vmatprep.subr.msk.bf16.mxu0 %vm737_vm0, %v5451_v1  ;;  %v739_v2 = vsel %vm737_vm0, %v5224_v0, 0  ;;  %v7024_v3 = vsel %vm737_vm0, %v5451_v1, 0  ;;  %v232_v4 = vld [vmem:[%s8839_s1] sm:$0x3]  ;;  %v5516_v5 = vld [vmem:[%s8839_s1 + $0xa] sm:$0x3] }
  0x1a   : > { %8857 = vst [vmem:[#allocation8_spill] sm:$0xff] %v7024_v3  ;;  %6081 = vmatpush3.bf16.msra.mxu1 %v739_v2  ;;  %6217 = vmatpush3.bf16.msra.mxu0 %v7024_v3  ;;  %s192_s30 = scalar_select %p191_p11, %s6924_s15, 1  ;;  %vm249_vm1 = vsmask.f32 3328  ;;  %vm250_vm2 = vsmask.f32 7440 }
  0x1b   : > { %6645 = vmatprep.subr.msk.bf16.mxu1 %vm737_vm0, %v232_v4  ;;  %6650 = vmatprep.subr.msk.bf16.mxu0 %vm737_vm0, %v5516_v5  ;;  %vm688_vm3 = vcmask 31744   ;;  %v7052_v17 = vsel %vm737_vm0, %v232_v4, 0  ;;  %v7058_v26 = vld [vmem:[%s8839_s1 + $0xc] sm:$0x3]  ;;  %vm7065_vm4 = vmor %vm249_vm1, %vm250_vm2  ;;  %v7071_v37 = vsel %vm737_vm0, %v5516_v5, 0  ;;  %vm1242_vm5 = vcmask 1042432  }
  0x1c   : > { %s6654_s8 = smul.u32 216, %s192_s30  ;;  %v7075_v41 = vsel %vm737_vm0, %v7058_v26, 0  ;;  %vm1243_vm6 = vcmask 1046532   ;;  %s8726_s9 = sand.u32 1, %s6916_s13  }
  0x1d   : > { %vm7291_vm7 = vmor %vm1242_vm5, %vm1243_vm6  ;;  %s5221_s10 = sshll.u32 %s8726_s9, 7  ;;  %s5831_s18 = sshll.u32 %s6924_s15, 11 }
  0x1e   : > { %s7039_s11 = scalar_lea.vmem %s8838_s0, %s6654_s8  ;;  %s8755_s26 = scalar_lea.hbm %s8840_s2, %s5831_s18 }
  0x1f   : > { %v197_v6 = vld [vmem:[%s7039_s11] sm:$0xf]  ;;  %v198_v7 = vld [vmem:[%s7039_s11 + $0x4] sm:$0xf]  ;;  %v233_v8 = vld [vmem:[%s7039_s11 + $0x8] sm:$0x1] }
  0x20   : > { %v253_v9 = vshrl.u32 %v197_v6, 16  ;;  %v256_v10 = vshll.u32 %v197_v6, 16  ;;  %v262_v11 = vshll.u32 %v198_v7, 16  ;;  %v266_v12 = vshrl.u32 %v198_v7, 16  ;;  %v5403_v13 = vld [vmem:[%s7039_s11 + $0xc] sm:$0xf] }
  0x21   : > { %v272_v14 = vshll.u32 %v233_v8, 16  ;;  %v7046_v15 = vld [vmem:[%s7039_s11 + $0x10] sm:$0xf]  ;;  %v7049_v16 = vld [vmem:[%s7039_s11 + $0x14] sm:$0x1]  ;;  %v2063_v23 = vshrl.u32 %v5403_v13, 16 }
  0x22   : > { %v255_v18 = vrot.slane %v253_v9, 4  ;;  %v258_v19 = vrot.slane %v256_v10, 5  ;;  %v264_v20 = vrot.slane %v262_v11, 5  ;;  %v268_v21 = vrot.slane %v266_v12, 4  ;;  %v199_v31 = vld [vmem:[%s7039_s11 + $0xc] sm:$0xf] }
  0x23   : > { %v274_v22 = vrot.slane %v272_v14, 5  ;;  %v2066_v24 = vshll.u32 %v5403_v13, 16  ;;  %v2072_v25 = vshll.u32 %v7046_v15, 16  ;;  %v2076_v29 = vshrl.u32 %v7046_v15, 16  ;;  %v200_v36 = vld [vmem:[%s7039_s11 + $0x10] sm:$0xf] }
  0x24   : > { %v259_v27 = vor.u32 %v258_v19, %v255_v18  ;;  %v269_v28 = vor.u32 %v268_v21, %v264_v20  ;;  %v2082_v30 = vshll.u32 %v7049_v16, 16  ;;  %v2065_v33 = vrot.slane %v2063_v23, 4  ;;  %v234_v44 = vld [vmem:[%s7039_s11 + $0x14] sm:$0x1]  ;;  %v5406_v55 = vld [vmem:[%s7039_s11 + $0x18] sm:$0xf] }
  0x25   : > { %v2068_v34 = vrot.slane %v2066_v24, 5  ;;  %v2074_v35 = vrot.slane %v2072_v25, 5  ;;  %v2078_v40 = vrot.slane %v2076_v29, 4  ;;  %v277_v45 = vshrl.u32 %v199_v31, 16  ;;  %v7084_v60 = vld [vmem:[%s7039_s11 + $0x1c] sm:$0xf] }
  0x26   : > { %v260_v38 = vrot.slane %v259_v27, 4  ;;  %v270_v39 = vrot.slane %v269_v28, 4  ;;  %v2084_v43 = vrot.slane %v2082_v30, 5  ;;  %v280_v46 = vshll.u32 %v199_v31, 16  ;;  %v7092_v1 = vld [vmem:[%s7039_s11 + $0x20] sm:$0x1] }
  0x27   : > { %v2069_v42 = vor.u32 %v2068_v34, %v2065_v33  ;;  %v2079_v49 = vor.u32 %v2078_v40, %v2074_v35  ;;  %v286_v50 = vshll.u32 %v200_v36, 16  ;;  %v279_v53 = vrot.slane %v277_v45, 4  ;;  %v201_v18 = vld [vmem:[%s7039_s11 + $0x18] sm:$0xf]  ;;  %v202_v23 = vld [vmem:[%s7039_s11 + $0x1c] sm:$0xf] }
  0x28   : > { %v265_v47 = vsel %vm7065_vm4, %v260_v38, %v264_v20  ;;  %v275_v48 = vsel %vm7065_vm4, %v270_v39, %v274_v22  ;;  %v282_v54 = vrot.slane %v280_v46, 5  ;;  %v290_v58 = vshrl.u32 %v200_v36, 16  ;;  %v235_v31 = vld [vmem:[%s7039_s11 + $0x20] sm:$0x1]  ;;  %v5409_v40 = vld [vmem:[%s7039_s11 + $0x24] sm:$0xf] }
  0x29   : > { %v5225_v51 = vcombine.low %v265_v47, %v275_v48  ;;  %v2070_v52 = vrot.slane %v2069_v42, 4  ;;  %v2080_v56 = vrot.slane %v2079_v49, 4  ;;  %v288_v57 = vrot.slane %v286_v50, 5  ;;  %v7115_v46 = vld [vmem:[%s7039_s11 + $0x28] sm:$0xf]  ;;  %s5044_s27 = scalar_lea.sflag [#allocation3], %s8726_s9 }
  0x2a   : > { %v296_v59 = vshll.u32 %v234_v44, 16  ;;  %v2808_v62 = vrot.slane %v7046_v15, 5  ;;  %v2811_v63 = vrot.slane %v7049_v16, 5  ;;  %v283_v0 = vor.u32 %v282_v54, %v279_v53  ;;  %v7124_v54 = vld [vmem:[%s7039_s11 + $0x2c] sm:$0x1]  ;;  %s6934_s29 = smov [#allocation2]  }
  0x2b   : > { %6082 = vmatprep.mubr.msk.bf16.mxu1 %vm688_vm3, %v5225_v51  ;;  %v2075_v61 = vsel %vm7065_vm4, %v2070_v52, %v2074_v35  ;;  %v2085_v2 = vsel %vm7065_vm4, %v2080_v56, %v2084_v43  ;;  %v292_v4 = vrot.slane %v290_v58, 4  ;;  %v2087_v6 = vshrl.u32 %v5406_v55, 16  ;;  %v5305_v51 = vld [vmem:[%s8839_s1 + $0x4] sm:$0x3]  ;;  %v7324_v16 = vld [vmem:[%s7039_s11 + $0x7c] sm:$0xf] }
  0x2c   : > { %v298_v5 = vrot.slane %v296_v59, 5  ;;  %v5452_v7 = vcombine.low %v2075_v61, %v2085_v2  ;;  %v284_v8 = vrot.slane %v283_v0, 4  ;;  %v2090_v9 = vshll.u32 %v5406_v55, 16  ;;  %v203_v0 = vld [vmem:[%s7039_s11 + $0x24] sm:$0xf]  ;;  %s6826_s30 = sshll.u32 %s6934_s29, 4  ;;  %s6827_s30 = int_to_ptr.vmem [resolvable:$false] %s6826_s30 }
  0x2d   : > { %v2096_v10 = vshll.u32 %v7084_v60, 16  ;;  %v293_v11 = vor.u32 %v292_v4, %v288_v57  ;;  %v2089_v12 = vrot.slane %v2087_v6, 4  ;;  %v2100_v13 = vshrl.u32 %v7084_v60, 16  ;;  %s6828_s4 = scalar_lea.vmem %s6827_s30, 4096 }
  0x2e   : > { %v2106_v14 = vshll.u32 %v7092_v1, 16  ;;  %6218 = vmatprep.mubr.msk.bf16.mxu0 %vm688_vm3, %v5452_v7  ;;  %v289_v19 = vsel %vm7065_vm4, %v284_v8, %v288_v57  ;;  %v2092_v20 = vrot.slane %v2090_v9, 5  ;;  %v2815_v22 = vrot.slane %v7084_v60, 5  ;;  %v204_v7 = vld [vmem:[%s7039_s11 + $0x28] sm:$0xf] }
  0x2f   : > { %v2098_v21 = vrot.slane %v2096_v10, 5  ;;  %v294_v24 = vrot.slane %v293_v11, 4  ;;  %v2102_v25 = vrot.slane %v2100_v13, 4  ;;  %v2818_v28 = vrot.slane %v7092_v1, 5  ;;  %v236_v13 = vld [vmem:[%s7039_s11 + $0x2c] sm:$0x1] }
  0x30   : > { %v2108_v27 = vrot.slane %v2106_v14, 5  ;;  %v2093_v29 = vor.u32 %v2092_v20, %v2089_v12  ;;  %v7108_v30 = vrot.slane %v2815_v22, 4  ;;  %v301_v33 = vshrl.u32 %v201_v18, 16 }
  0x31   : > { %v304_v34 = vshll.u32 %v201_v18, 16  ;;  %v299_v35 = vsel %vm7065_vm4, %v294_v24, %v298_v5  ;;  %v2103_v36 = vor.u32 %v2102_v25, %v2098_v21  ;;  %v310_v38 = vshll.u32 %v202_v23, 16  ;;  %v5412_v24 = vld [vmem:[%s7039_s11 + $0x30] sm:$0xf] }
  0x32   : > { %v314_v39 = vshrl.u32 %v202_v23, 16  ;;  %v5226_v42 = vcombine.low %v289_v19, %v299_v35  ;;  %v2094_v43 = vrot.slane %v2093_v29, 4  ;;  %v303_v44 = vrot.slane %v301_v33, 4  ;;  %v7144_v33 = vld [vmem:[%s7039_s11 + $0x34] sm:$0xf] }
  0x33   : > { %v306_v45 = vrot.slane %v304_v34, 5  ;;  %v2104_v47 = vrot.slane %v2103_v36, 4  ;;  %v312_v48 = vrot.slane %v310_v38, 5  ;;  %v320_v50 = vshll.u32 %v235_v31, 16 }
  0x34   : > { %v316_v49 = vrot.slane %v314_v39, 4  ;;  %6083 = vmatmul.mubr.msk.bf16.vlgmr.msra.gmra.mrb[0].mxu1 %vm688_vm3, %v5226_v42  ;;  %v2099_v52 = vsel %vm7065_vm4, %v2094_v43, %v2098_v21  ;;  %v2111_v55 = vshrl.u32 %v5409_v40, 16  ;;  %v2114_v56 = vshll.u32 %v5409_v40, 16  ;;  %v7152_v40 = vld [vmem:[%s7039_s11 + $0x38] sm:$0x1] }
  0x35   : > { %v307_v53 = vor.u32 %v306_v45, %v303_v44  ;;  %6115 = vmatpush3.bf16.msra.mxu1 %v7052_v17  ;;  %v2109_v57 = vsel %vm7065_vm4, %v2104_v47, %v2108_v27  ;;  %v322_v59 = vrot.slane %v320_v50, 5  ;;  %v2120_v61 = vshll.u32 %v7115_v46, 16 }
  0x36   : > { %v317_v58 = vor.u32 %v316_v49, %v312_v48  ;;  %v5453_v2 = vcombine.low %v2099_v52, %v2109_v57  ;;  %v2113_v5 = vrot.slane %v2111_v55, 4  ;;  %v2116_v6 = vrot.slane %v2114_v56, 5  ;;  %6646 = vmatprep.subr.msk.bf16.mxu1 %vm737_vm0, %v5305_v51  ;;  %v205_v52 = vld [vmem:[%s7039_s11 + $0x30] sm:$0xf] }
  0x37   : > { %v308_v4 = vrot.slane %v307_v53, 4  ;;  %v2122_v9 = vrot.slane %v2120_v61, 5  ;;  %v2124_v17 = vshrl.u32 %v7115_v46, 16  ;;  %v2130_v10 = vshll.u32 %v7124_v54, 16 }
  0x38   : > { %v318_v8 = vrot.slane %v317_v58, 4  ;;  %6219 = vmatmul.mubr.msk.bf16.vlgmr.msra.gmra.mrb[0].mxu0 %vm688_vm3, %v5453_v2  ;;  %v2117_v12 = vor.u32 %v2116_v6, %v2113_v5  ;;  %v325_v14 = vshrl.u32 %v203_v0, 16  ;;  %v328_v18 = vshll.u32 %v203_v0, 16  ;;  %v206_v58 = vld [vmem:[%s7039_s11 + $0x34] sm:$0xf] }
  0x39   : > { %v313_v11 = vsel %vm7065_vm4, %v308_v4, %v312_v48  ;;  %6251 = vmatpush3.bf16.msra.mxu0 %v7071_v37  ;;  %v2126_v20 = vrot.slane %v2124_v17, 4  ;;  %v2132_v21 = vrot.slane %v2130_v10, 5  ;;  %v334_v23 = vshll.u32 %v204_v7, 16  ;;  %v237_v4 = vld [vmem:[%s7039_s11 + $0x38] sm:$0x1] }
  0x3a   : > { %v323_v19 = vsel %vm7065_vm4, %v318_v8, %v322_v59  ;;  %v2118_v27 = vrot.slane %v2117_v12, 4  ;;  %v327_v29 = vrot.slane %v325_v14, 4  ;;  %v330_v31 = vrot.slane %v328_v18, 5  ;;  %6651 = vmatprep.subr.msk.bf16.mxu0 %vm737_vm0, %v7058_v26  ;;  %v5415_v12 = vld [vmem:[%s7039_s11 + $0x3c] sm:$0xf] }
  0x3b   : > { %v5227_v25 = vcombine.low %v313_v11, %v323_v19  ;;  %v2127_v34 = vor.u32 %v2126_v20, %v2122_v9  ;;  %v336_v35 = vrot.slane %v334_v23, 5  ;;  %v338_v37 = vshrl.u32 %v204_v7, 16  ;;  %v7169_v20 = vld [vmem:[%s7039_s11 + $0x40] sm:$0xf] }
  0x3c   : > { %v344_v36 = vshll.u32 %v236_v13, 16  ;;  %v2123_v38 = vsel %vm7065_vm4, %v2118_v27, %v2122_v9  ;;  %v331_v39 = vor.u32 %v330_v31, %v327_v29  ;;  %v2135_v42 = vshrl.u32 %v5412_v24, 16 }
  0x3d   : > { %6086 = vmatprep.mubr.msk.bf16.mxu1 %vm688_vm3, %v5227_v25  ;;  %v2138_v43 = vshll.u32 %v5412_v24, 16  ;;  %v2128_v44 = vrot.slane %v2127_v34, 4  ;;  %v340_v45 = vrot.slane %v338_v37, 4  ;;  %v2144_v26 = vshll.u32 %v7144_v33, 16  ;;  %v7174_v34 = vld [vmem:[%s7039_s11 + $0x44] sm:$0x1] }
  0x3e   : > { %v346_v47 = vrot.slane %v344_v36, 5  ;;  %v332_v48 = vrot.slane %v331_v39, 4  ;;  %v2137_v49 = vrot.slane %v2135_v42, 4  ;;  %v2148_v51 = vshrl.u32 %v7144_v33, 16  ;;  %v207_v42 = vld [vmem:[%s7039_s11 + $0x3c] sm:$0xf] }
  0x3f   : > { %v2140_v50 = vrot.slane %v2138_v43, 5  ;;  %v2133_v53 = vsel %vm7065_vm4, %v2128_v44, %v2132_v21  ;;  %v341_v55 = vor.u32 %v340_v45, %v336_v35  ;;  %v2146_v56 = vrot.slane %v2144_v26, 5  ;;  %v208_v26 = vld [vmem:[%s7039_s11 + $0x40] sm:$0xf] }
  0x40   : > { %v2154_v57 = vshll.u32 %v7152_v40, 16  ;;  %v5454_v59 = vcombine.low %v2123_v38, %v2133_v53  ;;  %v337_v61 = vsel %vm7065_vm4, %v332_v48, %v336_v35  ;;  %v2150_v2 = vrot.slane %v2148_v51, 4 }
  0x41   : > { %v2141_v0 = vor.u32 %v2140_v50, %v2137_v49  ;;  %v342_v5 = vrot.slane %v341_v55, 4  ;;  %v349_v7 = vshrl.u32 %v205_v52, 16  ;;  %v352_v8 = vshll.u32 %v205_v52, 16 }
  0x42   : > { %v2156_v6 = vrot.slane %v2154_v57, 5  ;;  %6222 = vmatprep.mubr.msk.bf16.mxu0 %vm688_vm3, %v5454_v59  ;;  %v2151_v17 = vor.u32 %v2150_v2, %v2146_v56  ;;  %v358_v10 = vshll.u32 %v206_v58, 16  ;;  %v362_v11 = vshrl.u32 %v206_v58, 16  ;;  %v5418_v2 = vld [vmem:[%s7039_s11 + $0x48] sm:$0xf] }
  0x43   : > { %v2142_v9 = vrot.slane %v2141_v0, 4  ;;  %v347_v13 = vsel %vm7065_vm4, %v342_v5, %v346_v47  ;;  %v351_v14 = vrot.slane %v349_v7, 4  ;;  %v354_v18 = vrot.slane %v352_v8, 5  ;;  %v7192_v8 = vld [vmem:[%s7039_s11 + $0x4c] sm:$0xf] }
  0x44   : > { %v368_v19 = vshll.u32 %v237_v4, 16  ;;  %v5228_v21 = vcombine.low %v337_v61, %v347_v13  ;;  %v2152_v24 = vrot.slane %v2151_v17, 4  ;;  %v360_v25 = vrot.slane %v358_v10, 5  ;;  %v238_v61 = vld [vmem:[%s7039_s11 + $0x44] sm:$0x1] }
  0x45   : > { %v2147_v23 = vsel %vm7065_vm4, %v2142_v9, %v2146_v56  ;;  %v355_v27 = vor.u32 %v354_v18, %v351_v14  ;;  %v364_v29 = vrot.slane %v362_v11, 4  ;;  %v2159_v35 = vshrl.u32 %v5415_v12, 16 }
  0x46   : > { %v370_v31 = vrot.slane %v368_v19, 5  ;;  %6087 = vmatmul.mubr.msk.bf16.gmra.mrb[4].mxu1 %vm688_vm3, %v5228_v21  ;;  %v2157_v37 = vsel %vm7065_vm4, %v2152_v24, %v2156_v6  ;;  %v2162_v36 = vshll.u32 %v5415_v12, 16  ;;  %v2168_v38 = vshll.u32 %v7169_v20, 16 }
  0x47   : > { %v2172_v39 = vshrl.u32 %v7169_v20, 16  ;;  %v5455_v43 = vcombine.low %v2147_v23, %v2157_v37  ;;  %v356_v44 = vrot.slane %v355_v27, 4  ;;  %v365_v45 = vor.u32 %v364_v29, %v360_v25  ;;  %v7200_v23 = vld [vmem:[%s7039_s11 + $0x50] sm:$0x1]  ;;  %v7204_v27 = vld [vmem:[%s7039_s11 + $0x48] sm:$0xf] }
  0x48   : > { %v2161_v47 = vrot.slane %v2159_v35, 4  ;;  %v2164_v48 = vrot.slane %v2162_v36, 5  ;;  %v2170_v49 = vrot.slane %v2168_v38, 5  ;;  %v2178_v51 = vshll.u32 %v7174_v34, 16  ;;  %v7207_v36 = vld [vmem:[%s7039_s11 + $0x4c] sm:$0xf] }
  0x49   : > { %v2174_v50 = vrot.slane %v2172_v39, 4  ;;  %6223 = vmatmul.mubr.msk.bf16.gmra.mrb[4].mxu0 %vm688_vm3, %v5455_v43  ;;  %v361_v52 = vsel %vm7065_vm4, %v356_v44, %v360_v25  ;;  %v366_v53 = vrot.slane %v365_v45, 4  ;;  %v373_v55 = vshrl.u32 %v207_v42, 16 }
  0x4a   : > { %v376_v56 = vshll.u32 %v207_v42, 16  ;;  %v2165_v57 = vor.u32 %v2164_v48, %v2161_v47  ;;  %v2180_v59 = vrot.slane %v2178_v51, 5  ;;  %v382_v0 = vshll.u32 %v208_v26, 16 }
  0x4b   : > { %v2175_v58 = vor.u32 %v2174_v50, %v2170_v49  ;;  %v371_v4 = vsel %vm7065_vm4, %v366_v53, %v370_v31  ;;  %v375_v5 = vrot.slane %v373_v55, 4  ;;  %v386_v7 = vshrl.u32 %v208_v26, 16  ;;  %v239_v26 = vld [vmem:[%s7039_s11 + $0x50] sm:$0x1]  ;;  %v5421_v53 = vld [vmem:[%s7039_s11 + $0x54] sm:$0xf] }
  0x4c   : > { %v378_v6 = vrot.slane %v376_v56, 5  ;;  %v5229_v9 = vcombine.low %v361_v52, %v371_v4  ;;  %v2166_v17 = vrot.slane %v2165_v57, 4  ;;  %v384_v11 = vrot.slane %v382_v0, 5  ;;  %v7223_v4 = vld [vmem:[%s7039_s11 + $0x58] sm:$0xf] }
  0x4d   : > { %v2176_v10 = vrot.slane %v2175_v58, 4  ;;  %v388_v13 = vrot.slane %v386_v7, 4  ;;  %v392_v14 = vshll.u32 %v238_v61, 16  ;;  %v2183_v18 = vshrl.u32 %v5418_v2, 16 }
  0x4e   : > { %v379_v12 = vor.u32 %v378_v6, %v375_v5  ;;  %6090 = vmatprep.mubr.msk.bf16.mxu1 %vm688_vm3, %v5229_v9  ;;  %v2171_v19 = vsel %vm7065_vm4, %v2166_v17, %v2170_v49  ;;  %v2186_v24 = vshll.u32 %v5418_v2, 16  ;;  %v2192_v25 = vshll.u32 %v7192_v8, 16 }
  0x4f   : > { %v2181_v21 = vsel %vm7065_vm4, %v2176_v10, %v2180_v59  ;;  %v389_v35 = vor.u32 %v388_v13, %v384_v11  ;;  %v394_v37 = vrot.slane %v392_v14, 5  ;;  %v2185_v38 = vrot.slane %v2183_v18, 4 }
  0x50   : > { %v5456_v29 = vcombine.low %v2171_v19, %v2181_v21  ;;  %v380_v31 = vrot.slane %v379_v12, 4  ;;  %v2188_v39 = vrot.slane %v2186_v24, 5  ;;  %v2194_v42 = vrot.slane %v2192_v25, 5  ;;  %v7229_v12 = vld [vmem:[%s7039_s11 + $0x5c] sm:$0x1] }
  0x51   : > { %v2196_v43 = vshrl.u32 %v7192_v8, 16  ;;  %v390_v45 = vrot.slane %v389_v35, 4  ;;  %v2202_v47 = vshll.u32 %v7200_v23, 16  ;;  %v397_v48 = vshrl.u32 %v7204_v27, 16  ;;  %v7233_v24 = vld [vmem:[%s7039_s11 + $0x54] sm:$0xf] }
  0x52   : > { %6226 = vmatprep.mubr.msk.bf16.mxu0 %vm688_vm3, %v5456_v29  ;;  %v385_v44 = vsel %vm7065_vm4, %v380_v31, %v384_v11  ;;  %v2189_v49 = vor.u32 %v2188_v39, %v2185_v38  ;;  %v400_v51 = vshll.u32 %v7204_v27, 16  ;;  %v406_v52 = vshll.u32 %v7207_v36, 16 }
  0x53   : > { %v2198_v50 = vrot.slane %v2196_v43, 4  ;;  %v395_v55 = vsel %vm7065_vm4, %v390_v45, %v394_v37  ;;  %v2204_v56 = vrot.slane %v2202_v47, 5  ;;  %v399_v57 = vrot.slane %v397_v48, 4  ;;  %v7239_v37 = vld [vmem:[%s7039_s11 + $0x58] sm:$0xf] }
  0x54   : > { %v410_v58 = vshrl.u32 %v7207_v36, 16  ;;  %v5230_v59 = vcombine.low %v385_v44, %v395_v55  ;;  %v2190_v61 = vrot.slane %v2189_v49, 4  ;;  %v402_v2 = vrot.slane %v400_v51, 5 }
  0x55   : > { %v2199_v0 = vor.u32 %v2198_v50, %v2194_v42  ;;  %v408_v5 = vrot.slane %v406_v52, 5  ;;  %v416_v7 = vshll.u32 %v239_v26, 16  ;;  %v2207_v9 = vshrl.u32 %v5421_v53, 16  ;;  %v240_v26 = vld [vmem:[%s7039_s11 + $0x5c] sm:$0x1] }
  0x56   : > { %v412_v6 = vrot.slane %v410_v58, 4  ;;  %6091 = vmatmul.mubr.msk.bf16.gmra.mrb[8].mxu1 %vm688_vm3, %v5230_v59  ;;  %v2195_v17 = vsel %vm7065_vm4, %v2190_v61, %v2194_v42  ;;  %v403_v11 = vor.u32 %v402_v2, %v399_v57  ;;  %v2210_v13 = vshll.u32 %v5421_v53, 16  ;;  %v5424_v53 = vld [vmem:[%s7039_s11 + $0x60] sm:$0xf]  ;;  %v7253_v59 = vld [vmem:[%s7039_s11 + $0x64] sm:$0xf] }
  0x57   : > { %v2200_v10 = vrot.slane %v2199_v0, 4  ;;  %v418_v18 = vrot.slane %v416_v7, 5  ;;  %v2209_v19 = vrot.slane %v2207_v9, 4  ;;  %v2216_v21 = vshll.u32 %v7223_v4, 16  ;;  %v7260_v9 = vld [vmem:[%s7039_s11 + $0x68] sm:$0x1] }
  0x58   : > { %v413_v14 = vor.u32 %v412_v6, %v408_v5  ;;  %v404_v29 = vrot.slane %v403_v11, 4  ;;  %v2212_v31 = vrot.slane %v2210_v13, 5  ;;  %v2220_v35 = vshrl.u32 %v7223_v4, 16 }
  0x59   : > { %v2205_v25 = vsel %vm7065_vm4, %v2200_v10, %v2204_v56  ;;  %v2218_v42 = vrot.slane %v2216_v21, 5  ;;  %v2226_v43 = vshll.u32 %v7229_v12, 16  ;;  %v421_v48 = vshrl.u32 %v7233_v24, 16 }
  0x5a   : > { %v5457_v38 = vcombine.low %v2195_v17, %v2205_v25  ;;  %v414_v39 = vrot.slane %v413_v14, 4  ;;  %v409_v44 = vsel %vm7065_vm4, %v404_v29, %v408_v5  ;;  %v2213_v45 = vor.u32 %v2212_v31, %v2209_v19  ;;  %v7264_v19 = vld [vmem:[%s7039_s11 + $0x60] sm:$0xf] }
  0x5b   : > { %v2222_v47 = vrot.slane %v2220_v35, 4  ;;  %v2228_v50 = vrot.slane %v2226_v43, 5  ;;  %v424_v51 = vshll.u32 %v7233_v24, 16  ;;  %v430_v52 = vshll.u32 %v7239_v37, 16  ;;  %v7270_v35 = vld [vmem:[%s7039_s11 + $0x64] sm:$0xf] }
  0x5c   : > { %6227 = vmatmul.mubr.msk.bf16.gmra.mrb[8].mxu0 %vm688_vm3, %v5457_v38  ;;  %v419_v49 = vsel %vm7065_vm4, %v414_v39, %v418_v18  ;;  %v2214_v56 = vrot.slane %v2213_v45, 4  ;;  %v423_v58 = vrot.slane %v421_v48, 4  ;;  %v434_v2 = vshrl.u32 %v7239_v37, 16 }
  0x5d   : > { %v5231_v55 = vcombine.low %v409_v44, %v419_v49  ;;  %v2223_v57 = vor.u32 %v2222_v47, %v2218_v42  ;;  %v426_v61 = vrot.slane %v424_v51, 5  ;;  %v432_v0 = vrot.slane %v430_v52, 5 }
  0x5e   : > { %v440_v5 = vshll.u32 %v240_v26, 16  ;;  %v2219_v6 = vsel %vm7065_vm4, %v2214_v56, %v2218_v42  ;;  %v2231_v17 = vshrl.u32 %v5424_v53, 16  ;;  %v2234_v10 = vshll.u32 %v5424_v53, 16 }
  0x5f   : > { %6094 = vmatprep.mubr.msk.bf16.mxu1 %vm688_vm3, %v5231_v55  ;;  %v2224_v7 = vrot.slane %v2223_v57, 4  ;;  %v427_v11 = vor.u32 %v426_v61, %v423_v58  ;;  %v436_v13 = vrot.slane %v434_v2, 4  ;;  %v2240_v18 = vshll.u32 %v7253_v59, 16  ;;  %v5484_v58 = vld [vmem:[%s7039_s11 + $0xc] sm:$0xe] }
  0x60   : > { %v442_v14 = vrot.slane %v440_v5, 5  ;;  %v2233_v25 = vrot.slane %v2231_v17, 4  ;;  %v2236_v29 = vrot.slane %v2234_v10, 5  ;;  %v2244_v31 = vshrl.u32 %v7253_v59, 16 }
  0x61   : > { %v2229_v21 = vsel %vm7065_vm4, %v2224_v7, %v2228_v50  ;;  %v428_v39 = vrot.slane %v427_v11, 4  ;;  %v437_v42 = vor.u32 %v436_v13, %v432_v0  ;;  %v2242_v43 = vrot.slane %v2240_v18, 5  ;;  %v241_v50 = vld [vmem:[%s7039_s11 + $0x68] sm:$0x1] }
  0x62   : > { %v5458_v38 = vcombine.low %v2219_v6, %v2229_v21  ;;  %v2237_v44 = vor.u32 %v2236_v29, %v2233_v25  ;;  %v2246_v45 = vrot.slane %v2244_v31, 4  ;;  %v2250_v47 = vshll.u32 %v7260_v9, 16  ;;  %v7298_v29 = vld [vmem:[%s7039_s11 + $0x70] sm:$0xf] }
  0x63   : > { %v445_v26 = vshrl.u32 %v7264_v19, 16  ;;  %v433_v48 = vsel %vm7065_vm4, %v428_v39, %v432_v0  ;;  %v438_v49 = vrot.slane %v437_v42, 4  ;;  %v448_v51 = vshll.u32 %v7264_v19, 16  ;;  %v7285_v0 = vld [vmem:[%s7039_s11 + $0x6c] sm:$0xf] }
  0x64   : > { %6230 = vmatprep.mubr.msk.bf16.mxu0 %vm688_vm3, %v5458_v38  ;;  %v454_v52 = vshll.u32 %v7270_v35, 16  ;;  %v2238_v53 = vrot.slane %v2237_v44, 4  ;;  %v2247_v55 = vor.u32 %v2246_v45, %v2242_v43  ;;  %v2252_v56 = vrot.slane %v2250_v47, 5 }
  0x65   : > { %v447_v57 = vrot.slane %v445_v26, 4  ;;  %v443_v61 = vsel %vm7065_vm4, %v438_v49, %v442_v14  ;;  %v450_v2 = vrot.slane %v448_v51, 5  ;;  %v458_v6 = vshrl.u32 %v7270_v35, 16  ;;  %v242_v26 = vld [vmem:[%s7039_s11 + $0x74] sm:$0x1] }
  0x66   : > { %v456_v5 = vrot.slane %v454_v52, 5  ;;  %v5232_v7 = vcombine.low %v433_v48, %v443_v61  ;;  %v2243_v17 = vsel %vm7065_vm4, %v2238_v53, %v2242_v43  ;;  %v2248_v10 = vrot.slane %v2247_v55, 4  ;;  %v5485_v48 = vld [vmem:[%s7039_s11 + $0x18] sm:$0xe] }
  0x67   : > { %v464_v11 = vshll.u32 %v241_v50, 16  ;;  %v451_v14 = vor.u32 %v450_v2, %v447_v57  ;;  %v460_v18 = vrot.slane %v458_v6, 4  ;;  %v5500_v21 = vrot.slane %v5484_v58, 9  ;;  %v7317_v53 = vld [vmem:[%s7039_s11 + $0x78] sm:$0xf] }
  0x68   : > { %v2810_v25 = vrot.slane %v2808_v62, 4  ;;  %6095 = vmatmul.mubr.msk.bf16.gmra.mrb[12].mxu1 %vm688_vm3, %v5232_v7  ;;  %v2253_v31 = vsel %vm7065_vm4, %v2248_v10, %v2252_v56  ;;  %v469_v39 = vshrl.u32 %v7285_v0, 16  ;;  %v472_v42 = vshll.u32 %v7285_v0, 16  ;;  %v243_v57 = vld [vmem:[%s7039_s11 + $0x80] sm:$0x1] }
  0x69   : > { %v466_v38 = vrot.slane %v464_v11, 5  ;;  %v5459_v43 = vcombine.low %v2243_v17, %v2253_v31  ;;  %v452_v44 = vrot.slane %v451_v14, 4  ;;  %v461_v45 = vor.u32 %v460_v18, %v456_v5  ;;  %v5486_v10 = vld [vmem:[%s7039_s11 + $0x24] sm:$0xe] }
  0x6a   : > { %v2809_v47 = vsel %vm7291_vm7, %v5500_v21, %v2808_v62  ;;  %v2812_v49 = vsel %vm7291_vm7, %v2810_v25, %v2811_v63  ;;  %v471_v50 = vrot.slane %v469_v39, 4  ;;  %v474_v51 = vrot.slane %v472_v42, 5  ;;  %v7343_v39 = vld [vmem:[%s7039_s11 + $0x84] sm:$0xf] }
  0x6b   : > { %v478_v52 = vshll.u32 %v7298_v29, 16  ;;  %6231 = vmatmul.mubr.msk.bf16.gmra.mrb[12].mxu0 %vm688_vm3, %v5459_v43  ;;  %v457_v15 = vsel %vm7065_vm4, %v452_v44, %v456_v5  ;;  %v462_v62 = vrot.slane %v461_v45, 4  ;;  %v5517_v55 = vcombine.low %v2809_v47, %v2812_v49  ;;  %v7351_v43 = vld [vmem:[%s7039_s11 + $0x88] sm:$0xf] }
  0x6c   : > { %v482_v56 = vshrl.u32 %v7298_v29, 16  ;;  %v475_v63 = vor.u32 %v474_v51, %v471_v50  ;;  %v488_v61 = vshll.u32 %v242_v26, 16  ;;  %v5501_v2 = vrot.slane %v5485_v48, 9 }
  0x6d   : > { %v480_v58 = vrot.slane %v478_v52, 5  ;;  %v467_v6 = vsel %vm7065_vm4, %v462_v62, %v466_v38  ;;  %6252 = vmatprep.mubr.msk.bf16.mxu0 %vm688_vm3, %v5517_v55  ;;  %v2819_v5 = vsel %vm7291_vm7, %v7108_v30, %v2818_v28  ;;  %v493_v17 = vshrl.u32 %v7317_v53, 16  ;;  %v244_v52 = vld [vmem:[%s7039_s11 + $0x8c] sm:$0x1] }
  0x6e   : > { %v484_v7 = vrot.slane %v482_v56, 4  ;;  %v5233_v11 = vcombine.low %v457_v15, %v467_v6  ;;  %v476_v14 = vrot.slane %v475_v63, 4  ;;  %v490_v18 = vrot.slane %v488_v61, 5 }
  0x6f   : > { %v2816_v21 = vsel %vm7291_vm7, %v5501_v2, %v2815_v22  ;;  %v495_v38 = vrot.slane %v493_v17, 4  ;;  %v496_v1 = vshll.u32 %v7317_v53, 16  ;;  %v502_v30 = vshll.u32 %v7324_v16, 16  ;;  %v7356_v22 = vld [vmem:[%s8839_s1 + $0xe] sm:$0x3] }
  0x70   : > { %v485_v25 = vor.u32 %v484_v7, %v480_v58  ;;  %v5518_v31 = vcombine.low %v2816_v21, %v2819_v5  ;;  %6098 = vmatprep.mubr.msk.bf16.mxu1 %vm688_vm3, %v5233_v11  ;;  %v481_v28 = vsel %vm7065_vm4, %v476_v14, %v480_v58  ;;  %v506_v60 = vshrl.u32 %v7324_v16, 16  ;;  %v7375_v5 = vld [vmem:[%s7039_s11 + $0x90] sm:$0xf] }
  0x71   : > { %v512_v42 = vshll.u32 %v243_v57, 16  ;;  %v498_v45 = vrot.slane %v496_v1, 5  ;;  %v5502_v47 = vrot.slane %v5486_v10, 9  ;;  %v2822_v26 = vrot.slane %v7115_v46, 5  ;;  %v5487_v57 = vld [vmem:[%s7039_s11 + $0x30] sm:$0xe] }
  0x72   : > { %v486_v44 = vrot.slane %v485_v25, 4  ;;  %v504_v48 = vrot.slane %v502_v30, 5  ;;  %v508_v49 = vrot.slane %v506_v60, 4  ;;  %v2825_v51 = vrot.slane %v7124_v54, 5  ;;  %v7387_v30 = vld [vmem:[%s7039_s11 + $0x94] sm:$0xf] }
  0x73   : > { %v514_v50 = vrot.slane %v512_v42, 5  ;;  %6253 = vmatmul.mubr.msk.bf16.vlgmr.msra.gmra.mrb[0].mxu0 %vm688_vm3, %v5518_v31  ;;  %v499_v62 = vor.u32 %v498_v45, %v495_v38  ;;  %v2823_v55 = vsel %vm7291_vm7, %v5502_v47, %v2822_v26  ;;  %v2824_v56 = vrot.slane %v2822_v26, 4  ;;  %v245_v60 = vld [vmem:[%s7039_s11 + $0x98] sm:$0x1]  ;;  %v5488_v26 = vld [vmem:[%s7039_s11 + $0x3c] sm:$0xe] }
  0x74   : > { %v491_v15 = vsel %vm7065_vm4, %v486_v44, %v490_v18  ;;  %6285 = vmatpush3.bf16.msra.mxu0 %v7075_v41  ;;  %v509_v46 = vor.u32 %v508_v49, %v504_v48  ;;  %v517_v58 = vshrl.u32 %v7343_v39, 16  ;;  %v520_v54 = vshll.u32 %v7343_v39, 16 }
  0x75   : > { %v5234_v63 = vcombine.low %v481_v28, %v491_v15  ;;  %v500_v61 = vrot.slane %v499_v62, 4  ;;  %v2826_v2 = vsel %vm7291_vm7, %v2824_v56, %v2825_v51  ;;  %v526_v6 = vshll.u32 %v7351_v43, 16  ;;  %6652 = vmatprep.subr.msk.bf16.mxu0 %vm737_vm0, %v7356_v22 }
  0x76   : > { %v530_v7 = vshrl.u32 %v7351_v43, 16  ;;  %v510_v41 = vrot.slane %v509_v46, 4  ;;  %v5519_v17 = vcombine.low %v2823_v55, %v2826_v2  ;;  %v519_v10 = vrot.slane %v517_v58, 4  ;;  %v7407_v46 = vld [vmem:[%s7039_s11 + $0xa0] sm:$0xf] }
  0x77   : > { %6099 = vmatmul.mubr.msk.bf16.gmra.mrb[16].mxu1 %vm688_vm3, %v5234_v63  ;;  %v522_v11 = vrot.slane %v520_v54, 5  ;;  %v505_v14 = vsel %vm7065_vm4, %v500_v61, %v504_v48  ;;  %v528_v18 = vrot.slane %v526_v6, 5  ;;  %v536_v25 = vshll.u32 %v244_v52, 16  ;;  %v7396_v52 = vld [vmem:[%s7039_s11 + $0x9c] sm:$0xf] }
  0x78   : > { %v532_v21 = vrot.slane %v530_v7, 4  ;;  %v515_v31 = vsel %vm7065_vm4, %v510_v41, %v514_v50  ;;  %6256 = vmatprep.mubr.msk.bf16.mxu0 %vm688_vm3, %v5519_v17  ;;  %v5503_v1 = vrot.slane %v5487_v57, 9  ;;  %v2829_v28 = vrot.slane %v7144_v33, 5 }
  0x79   : > { %v523_v38 = vor.u32 %v522_v11, %v519_v10  ;;  %v5235_v42 = vcombine.low %v505_v14, %v515_v31  ;;  %v538_v45 = vrot.slane %v536_v25, 5  ;;  %v2832_v47 = vrot.slane %v7152_v40, 5  ;;  %v246_v10 = vld [vmem:[%s7039_s11 + $0xa4] sm:$0x1]  ;;  %v5489_v11 = vld [vmem:[%s7039_s11 + $0x48] sm:$0xe] }
  0x7a   : > { %v533_v44 = vor.u32 %v532_v21, %v528_v18  ;;  %v2830_v49 = vsel %vm7291_vm7, %v5503_v1, %v2829_v28  ;;  %v2831_v50 = vrot.slane %v2829_v28, 4  ;;  %v541_v51 = vshrl.u32 %v7375_v5, 16 }
  0x7b   : > { %v524_v48 = vrot.slane %v523_v38, 4  ;;  %6102 = vmatprep.mubr.msk.bf16.mxu1 %vm688_vm3, %v5235_v42  ;;  %v544_v15 = vshll.u32 %v7375_v5, 16  ;;  %v550_v62 = vshll.u32 %v7387_v30, 16  ;;  %v554_v40 = vshrl.u32 %v7387_v30, 16 }
  0x7c   : > { %v534_v33 = vrot.slane %v533_v44, 4  ;;  %v2833_v56 = vsel %vm7291_vm7, %v2831_v50, %v2832_v47  ;;  %v543_v57 = vrot.slane %v541_v51, 4  ;;  %v560_v63 = vshll.u32 %v245_v60, 16 }
  0x7d   : > { %v529_v55 = vsel %vm7065_vm4, %v524_v48, %v528_v18  ;;  %v5520_v54 = vcombine.low %v2830_v49, %v2833_v56  ;;  %v546_v61 = vrot.slane %v544_v15, 5  ;;  %v552_v2 = vrot.slane %v550_v62, 5  ;;  %v7433_v56 = vld [vmem:[%s7039_s11 + $0xac] sm:$0xf] }
  0x7e   : > { %v539_v58 = vsel %vm7065_vm4, %v534_v33, %v538_v45  ;;  %v556_v7 = vrot.slane %v554_v40, 4  ;;  %v562_v41 = vrot.slane %v560_v63, 5  ;;  %v5504_v17 = vrot.slane %v5488_v26, 9  ;;  %v7428_v33 = vld [vmem:[%s7039_s11 + $0xa8] sm:$0xf] }
  0x7f   : > { %v5236_v6 = vcombine.low %v529_v55, %v539_v58  ;;  %6257 = vmatmul.mubr.msk.bf16.gmra.mrb[4].mxu0 %vm688_vm3, %v5520_v54  ;;  %v547_v14 = vor.u32 %v546_v61, %v543_v57  ;;  %v2836_v18 = vrot.slane %v7169_v20, 5  ;;  %v2839_v21 = vrot.slane %v7174_v34, 5  ;;  %v247_v61 = vld [vmem:[%s7039_s11 + $0xb0] sm:$0x1] }
  0x80   : > { %v565_v25 = vshrl.u32 %v7396_v52, 16  ;;  %v557_v31 = vor.u32 %v556_v7, %v552_v2  ;;  %v568_v38 = vshll.u32 %v7396_v52, 16  ;;  %v574_v1 = vshll.u32 %v7407_v46, 16 }
  0x81   : > { %6103 = vmatmul.mubr.msk.bf16.gmra.mrb[20].mxu1 %vm688_vm3, %v5236_v6  ;;  %v578_v28 = vshrl.u32 %v7407_v46, 16  ;;  %v548_v60 = vrot.slane %v547_v14, 4  ;;  %v2837_v42 = vsel %vm7291_vm7, %v5504_v17, %v2836_v18  ;;  %v2838_v20 = vrot.slane %v2836_v18, 4  ;;  %v7448_v14 = vld [vmem:[%s7039_s11 + $0xb4] sm:$0xf] }
  0x82   : > { %v567_v44 = vrot.slane %v565_v25, 4  ;;  %v558_v34 = vrot.slane %v557_v31, 4  ;;  %v570_v45 = vrot.slane %v568_v38, 5  ;;  %v576_v47 = vrot.slane %v574_v1, 5 }
  0x83   : > { %v580_v26 = vrot.slane %v578_v28, 4  ;;  %v553_v48 = vsel %vm7065_vm4, %v548_v60, %v552_v2  ;;  %v2840_v49 = vsel %vm7291_vm7, %v2838_v20, %v2839_v21  ;;  %v584_v50 = vshll.u32 %v246_v10, 16  ;;  %v5490_v2 = vld [vmem:[%s7039_s11 + $0x54] sm:$0xe] }
  0x84   : > { %v5505_v51 = vrot.slane %v5489_v11, 9  ;;  %v563_v15 = vsel %vm7065_vm4, %v558_v34, %v562_v41  ;;  %v5521_v62 = vcombine.low %v2837_v42, %v2840_v49  ;;  %v571_v40 = vor.u32 %v570_v45, %v567_v44  ;;  %v7457_v42 = vld [vmem:[%s7039_s11 + $0xb8] sm:$0xf]  ;;  %v248_v49 = vld [vmem:[%s7039_s11 + $0xbc] sm:$0x1] }
  0x85   : > { %v581_v55 = vor.u32 %v580_v26, %v576_v47  ;;  %v5237_v57 = vcombine.low %v553_v48, %v563_v15  ;;  %v586_v63 = vrot.slane %v584_v50, 5  ;;  %v2843_v58 = vrot.slane %v7192_v8, 5 }
  0x86   : > { %v2846_v54 = vrot.slane %v7200_v23, 5  ;;  %6260 = vmatprep.mubr.msk.bf16.mxu0 %vm688_vm3, %v5521_v62  ;;  %v572_v6 = vrot.slane %v571_v40, 4  ;;  %v589_v41 = vshrl.u32 %v7428_v33, 16  ;;  %v592_v17 = vshll.u32 %v7428_v33, 16 }
  0x87   : > { %v582_v7 = vrot.slane %v581_v55, 4  ;;  %6106 = vmatprep.mubr.msk.bf16.mxu1 %vm688_vm3, %v5237_v57  ;;  %v2844_v10 = vsel %vm7291_vm7, %v5505_v51, %v2843_v58  ;;  %v2845_v11 = vrot.slane %v2843_v58, 4  ;;  %v598_v8 = vshll.u32 %v7433_v56, 16  ;;  %v5491_v55 = vld [vmem:[%s7039_s11 + $0x60] sm:$0xe] }
  0x88   : > { %v602_v23 = vshrl.u32 %v7433_v56, 16  ;;  %v577_v18 = vsel %vm7065_vm4, %v572_v6, %v576_v47  ;;  %v591_v25 = vrot.slane %v589_v41, 4  ;;  %v594_v31 = vrot.slane %v592_v17, 5  ;;  %v5492_v6 = vld [vmem:[%s7039_s11 + $0x6c] sm:$0xe] }
  0x89   : > { %v587_v21 = vsel %vm7065_vm4, %v582_v7, %v586_v63  ;;  %v2847_v1 = vsel %vm7291_vm7, %v2845_v11, %v2846_v54  ;;  %v600_v28 = vrot.slane %v598_v8, 5  ;;  %v608_v34 = vshll.u32 %v247_v61, 16  ;;  %v5428_v11 = vld [vmem:[%s7039_s11 + $0x70] sm:$0xf]  ;;  %v5429_v8 = vld [vmem:[%s7039_s11 + $0x74] sm:$0x1] }
  0x8a   : > { %v5238_v38 = vcombine.low %v577_v18, %v587_v21  ;;  %v604_v60 = vrot.slane %v602_v23, 4  ;;  %v5522_v20 = vcombine.low %v2844_v10, %v2847_v1  ;;  %v595_v44 = vor.u32 %v594_v31, %v591_v25 }
  0x8b   : > { %v5506_v45 = vrot.slane %v5490_v2, 9  ;;  %v2850_v26 = vrot.slane %v7223_v4, 5  ;;  %v2853_v48 = vrot.slane %v7229_v12, 5  ;;  %v613_v50 = vshrl.u32 %v7448_v14, 16 }
  0x8c   : > { %6107 = vmatmul.mubr.msk.bf16.gmra.mrb[24].mxu1 %vm688_vm3, %v5238_v38  ;;  %v605_v47 = vor.u32 %v604_v60, %v600_v28  ;;  %6261 = vmatmul.mubr.msk.bf16.gmra.mrb[8].mxu0 %vm688_vm3, %v5522_v20  ;;  %v596_v51 = vrot.slane %v595_v44, 4  ;;  %v610_v15 = vrot.slane %v608_v34, 5  ;;  %v616_v62 = vshll.u32 %v7448_v14, 16 }
  0x8d   : > { %v622_v40 = vshll.u32 %v7457_v42, 16  ;;  %v2851_v4 = vsel %vm7291_vm7, %v5506_v45, %v2850_v26  ;;  %v2852_v12 = vrot.slane %v2850_v26, 4  ;;  %v615_v63 = vrot.slane %v613_v50, 4 }
  0x8e   : > { %v606_v57 = vrot.slane %v605_v47, 4  ;;  %v601_v58 = vsel %vm7065_vm4, %v596_v51, %v600_v28  ;;  %v618_v54 = vrot.slane %v616_v62, 5  ;;  %v626_v2 = vshrl.u32 %v7457_v42, 16  ;;  %v5493_v47 = vld [vmem:[%s7039_s11 + $0x78] sm:$0xe] }
  0x8f   : > { %v624_v61 = vrot.slane %v622_v40, 5  ;;  %v2854_v41 = vsel %vm7291_vm7, %v2852_v12, %v2853_v48  ;;  %v632_v17 = vshll.u32 %v248_v49, 16  ;;  %v5507_v10 = vrot.slane %v5491_v55, 9  ;;  %v6765_v51 = vld [vmem:[%s7039_s11] sm:$0xf] }
  0x90   : > { %v611_v7 = vsel %vm7065_vm4, %v606_v57, %v610_v15  ;;  %v5523_v18 = vcombine.low %v2851_v4, %v2854_v41  ;;  %v619_v21 = vor.u32 %v618_v54, %v615_v63  ;;  %v628_v25 = vrot.slane %v626_v2, 4  ;;  %v7495_v15 = vld [vmem:[%s7039_s11 + $0x4] sm:$0xf]  ;;  %v7499_v40 = vld [vmem:[%s7039_s11 + $0x7c] sm:$0xf] }
  0x91   : > { %v5239_v23 = vcombine.low %v601_v58, %v611_v7  ;;  %v634_v31 = vrot.slane %v632_v17, 5  ;;  %v2857_v38 = vrot.slane %v7253_v59, 5  ;;  %v2860_v1 = vrot.slane %v7260_v9, 5  ;;  %v7502_v55 = vld [vmem:[%s7039_s11 + $0x80] sm:$0x1] }
  0x92   : > { %v5508_v28 = vrot.slane %v5492_v6, 9  ;;  %6264 = vmatprep.mubr.msk.bf16.mxu0 %vm688_vm3, %v5523_v18  ;;  %v620_v60 = vrot.slane %v619_v21, 4  ;;  %v629_v20 = vor.u32 %v628_v25, %v624_v61  ;;  %v2864_v44 = vrot.slane %v5428_v11, 5  ;;  %v5434_v57 = vld [vmem:[%s7039_s11 + $0x88] sm:$0xf] }
  0x93   : > { %6110 = vmatprep.mubr.msk.bf16.mxu1 %vm688_vm3, %v5239_v23  ;;  %v2867_v34 = vrot.slane %v5429_v8, 5  ;;  %v2858_v45 = vsel %vm7291_vm7, %v5507_v10, %v2857_v38  ;;  %v2859_v59 = vrot.slane %v2857_v38, 4  ;;  %v5257_v62 = vcombine.low %v6765_v51, %v7495_v15  ;;  %v5435_v54 = vld [vmem:[%s7039_s11 + $0x8c] sm:$0x1]  ;;  %v5437_v17 = vld [vmem:[%s7039_s11 + $0x94] sm:$0xf] }
  0x94   : > { %v625_v9 = vsel %vm7065_vm4, %v620_v60, %v624_v61  ;;  %v630_v26 = vrot.slane %v629_v20, 4  ;;  %v2865_v48 = vsel %vm7291_vm7, %v5508_v28, %v2864_v44  ;;  %v2866_v49 = vrot.slane %v2864_v44, 4  ;;  %v5494_v61 = vld [vmem:[%s7039_s11 + $0x84] sm:$0xe]  ;;  %v5495_v23 = vld [vmem:[%s7039_s11 + $0x90] sm:$0xe] }
  0x95   : > { %v2861_v50 = vsel %vm7291_vm7, %v2859_v59, %v2860_v1  ;;  %v5509_v58 = vrot.slane %v5493_v47, 9  ;;  %v2871_v7 = vrot.slane %v7499_v40, 5  ;;  %v2874_v41 = vrot.slane %v7502_v55, 5  ;;  %v5438_v25 = vld [vmem:[%s7039_s11 + $0x98] sm:$0x1] }
  0x96   : > { %v635_v4 = vsel %vm7065_vm4, %v630_v26, %v634_v31  ;;  %v5524_v12 = vcombine.low %v2858_v45, %v2861_v50  ;;  %v2868_v63 = vsel %vm7291_vm7, %v2866_v49, %v2867_v34  ;;  %v5510_v10 = vrot.slane %v5494_v61, 9  ;;  %v5440_v31 = vld [vmem:[%s7039_s11 + $0xa0] sm:$0xf]  ;;  %v5441_v60 = vld [vmem:[%s7039_s11 + $0xa4] sm:$0x1] }
  0x97   : > { %v5240_v2 = vcombine.low %v625_v9, %v635_v4  ;;  %v5525_v6 = vcombine.low %v2865_v48, %v2868_v63  ;;  %v2878_v11 = vrot.slane %v5434_v57, 5  ;;  %v2881_v8 = vrot.slane %v5435_v54, 5  ;;  %v5496_v20 = vld [vmem:[%s7039_s11 + $0x9c] sm:$0xe]  ;;  %v6767_v44 = vld [vmem:[%s7039_s11 + $0xc] sm:$0xf] }
  0x98   : > { %6265 = vmatmul.mubr.msk.bf16.gmra.mrb[12].mxu0 %vm688_vm3, %v5524_v12  ;;  %v2872_v18 = vsel %vm7291_vm7, %v5509_v58, %v2871_v7  ;;  %v2873_v21 = vrot.slane %v2871_v7, 4  ;;  %v2885_v28 = vrot.slane %v5437_v17, 5  ;;  %v7529_v34 = vld [vmem:[%s7039_s11 + $0x10] sm:$0xf]  ;;  %v6769_v47 = vld [vmem:[%s7039_s11 + $0x18] sm:$0xf] }
  0x99   : > { %6111 = vmatmul.mubr.msk.bf16.gmra.mrb[28].mxu1 %vm688_vm3, %v5240_v2  ;;  %6268 = vmatprep.mubr.msk.bf16.mxu0 %vm688_vm3, %v5525_v6  ;;  %v2879_v38 = vsel %vm7291_vm7, %v5510_v10, %v2878_v11  ;;  %v2880_v1 = vrot.slane %v2878_v11, 4  ;;  %v5258_v45 = vcombine.low %v6767_v44, %v7529_v34  ;;  %v7536_v9 = vld [vmem:[%s7039_s11 + $0x1c] sm:$0xf]  ;;  %v5511_v48 = vrot.slane %v5495_v23, 9  ;;  %v5443_v57 = vld [vmem:[%s7039_s11 + $0xac] sm:$0xf] }
  0x9a   : > { %6116 = vmatprep.mubr.msk.bf16.mxu1 %vm688_vm3, %v5257_v62  ;;  %v2875_v59 = vsel %vm7291_vm7, %v2873_v21, %v2874_v41  ;;  %v5259_v26 = vcombine.low %v6769_v47, %v7536_v9  ;;  %v2887_v51 = vrot.slane %v2885_v28, 4  ;;  %v2888_v62 = vrot.slane %v5438_v25, 5  ;;  %v6771_v54 = vld [vmem:[%s8839_s1 + $0x4] sm:$0x3]  ;;  %v5446_v2 = vld [vmem:[%s7039_s11 + $0xb8] sm:$0xf] }
  0x9b   : > { %v5526_v49 = vcombine.low %v2872_v18, %v2875_v59  ;;  %v2882_v50 = vsel %vm7291_vm7, %v2880_v1, %v2881_v8  ;;  %v5512_v12 = vrot.slane %v5496_v20, 9  ;;  %v2892_v63 = vrot.slane %v5440_v31, 5  ;;  %v7551_v7 = vld [vmem:[%s8839_s1 + $0x6] sm:$0x3]  ;;  %v5444_v10 = vld [vmem:[%s7039_s11 + $0xb0] sm:$0x1] }
  0x9c   : > { %v5527_v4 = vcombine.low %v2879_v38, %v2882_v50  ;;  %v2895_v58 = vrot.slane %v5441_v60, 5  ;;  %v1458_v61 = vsel %vm737_vm0, %v6771_v54, 0  ;;  %v2886_v41 = vsel %vm7291_vm7, %v5511_v48, %v2885_v28  ;;  %v5497_v11 = vld [vmem:[%s7039_s11 + $0xa8] sm:$0xe]  ;;  %v5447_v25 = vld [vmem:[%s7039_s11 + $0xbc] sm:$0x1] }
  0x9d   : > { %v2894_v6 = vrot.slane %v2892_v63, 4  ;;  %v2889_v17 = vsel %vm7291_vm7, %v2887_v51, %v2888_v62  ;;  %v2899_v8 = vrot.slane %v5443_v57, 5  ;;  %v2893_v23 = vsel %vm7291_vm7, %v5512_v12, %v2892_v63  ;;  %v5498_v31 = vld [vmem:[%s7039_s11 + $0xb4] sm:$0xe]  ;;  %v6772_v38 = vld [vmem:[%s7039_s11 + $0x24] sm:$0xf] }
  0x9e   : > { %v2906_v21 = vrot.slane %v5446_v2, 5  ;;  %v7572_v1 = vld [vmem:[%s7039_s11 + $0x28] sm:$0xf]  ;;  %v5528_v60 = vcombine.low %v2886_v41, %v2889_v17  ;;  %v5513_v44 = vrot.slane %v5497_v11, 9  ;;  %v2902_v59 = vrot.slane %v5444_v10, 5 }
  0x9f   : > { %v2896_v18 = vsel %vm7291_vm7, %v2894_v6, %v2895_v58  ;;  %v5260_v28 = vcombine.low %v6772_v38, %v7572_v1  ;;  %v6774_v47 = vld [vmem:[%s7039_s11 + $0x30] sm:$0xf]  ;;  %v2909_v51 = vrot.slane %v5447_v25, 5  ;;  %v5449_v62 = vld [vmem:[%s7039_s11 + $0xc4] sm:$0xf]  ;;  %v2292_v25 = vshrl.u32 %v7499_v40, 16 }
  0xa0   : > { %6269 = vmatmul.mubr.msk.bf16.gmra.mrb[16].mxu0 %vm688_vm3, %v5526_v49  ;;  %v5529_v20 = vcombine.low %v2893_v23, %v2896_v18  ;;  %v5514_v49 = vrot.slane %v5498_v31, 9  ;;  %v2908_v50 = vrot.slane %v2906_v21, 4  ;;  %v2900_v57 = vsel %vm7291_vm7, %v5513_v44, %v2899_v8  ;;  %v5499_v12 = vld [vmem:[%s7039_s11 + $0xc0] sm:$0xe]  ;;  %v6776_v41 = vld [vmem:[%s7039_s11 + $0x3c] sm:$0xf] }
  0xa1   : > { %6117 = vmatmul.mubr.msk.bf16.vlgmr.msra.gmra.mrb[0].mxu1 %vm688_vm3, %v5258_v45  ;;  %6272 = vmatprep.mubr.msk.bf16.mxu0 %vm688_vm3, %v5527_v4  ;;  %v2901_v45 = vrot.slane %v2899_v8, 4  ;;  %v2913_v63 = vrot.slane %v5449_v62, 5  ;;  %v5515_v6 = vrot.slane %v5499_v12, 9  ;;  %v7597_v17 = vld [vmem:[%s7039_s11 + $0x40] sm:$0xf]  ;;  %v5263_v18 = vcombine.low %v7204_v27, %v7207_v36  ;;  %v6728_v62 = vld [vmem:[%s7039_s11 + $0x24] sm:$0xff]  }
  0xa2   : > { %6149 = vmatpush3.bf16.msra.mxu1 %v1458_v61  ;;  %6120 = vmatprep.mubr.msk.bf16.mxu1 %vm688_vm3, %v5259_v26  ;;  %v7577_v26 = vld [vmem:[%s7039_s11 + $0x34] sm:$0xf]  ;;  %v2907_v58 = vsel %vm7291_vm7, %v5514_v49, %v2906_v21  ;;  %v2910_v54 = vsel %vm7291_vm7, %v2908_v50, %v2909_v51  ;;  %v5450_v61 = vld [vmem:[%s7039_s11 + $0xc8] sm:$0x1]  ;;  %v5262_v10 = vcombine.low %v6776_v41, %v7597_v17  ;;  %v2288_v21 = vshll.u32 %v7499_v40, 16 }
  0xa3   : > { %6647 = vmatprep.subr.msk.bf16.mxu1 %vm737_vm0, %v7551_v7  ;;  %v5261_v48 = vcombine.low %v6774_v47, %v7577_v26  ;;  %v2903_v4 = vsel %vm7291_vm7, %v2901_v45, %v2902_v59  ;;  %v5531_v11 = vcombine.low %v2907_v58, %v2910_v54  ;;  %v2915_v8 = vrot.slane %v2913_v63, 4  ;;  %v1194_v45 = vld [vmem:[%s7039_s11] sm:$0xe]  ;;  %v1195_v59 = vld [vmem:[%s7039_s11 + $0xc] sm:$0xe] }
  0xa4   : > { %v5530_v2 = vcombine.low %v2900_v57, %v2903_v4  ;;  %v2916_v23 = vrot.slane %v5450_v61, 5  ;;  %v2914_v31 = vsel %vm7291_vm7, %v5515_v6, %v2913_v63  ;;  %v7612_v27 = vrot.slane %v2288_v21, 5  ;;  %v1198_v41 = vld [vmem:[%s7039_s11 + $0x30] sm:$0xe] }
  0xa5   : > { %v2294_v36 = vrot.slane %v2292_v25, 4  ;;  %v5265_v44 = vcombine.low %v7264_v19, %v7270_v35  ;;  %v2298_v47 = vshll.u32 %v7502_v55, 16  ;;  %v5289_v19 = vrot.slane %v1194_v45, 9 }
  0xa6   : > { %v2917_v38 = vsel %vm7291_vm7, %v2915_v8, %v2916_v23  ;;  %8862 = vst [vmem:[#allocation9_spill] sm:$0xff] %v7612_v27  ;;  %v5290_v35 = vrot.slane %v1195_v59, 9  ;;  %v1261_v4 = vrot.slane %v7536_v9, 5  ;;  %v1268_v12 = vrot.slane %v7572_v1, 5  ;;  %v1199_v8 = vld [vmem:[%s7039_s11 + $0x3c] sm:$0xe] }
  0xa7   : > { %v5532_v40 = vcombine.low %v2914_v31, %v2917_v38  ;;  %v2295_v49 = vor.u32 %v2294_v36, %v7612_v27  ;;  %v7632_v51 = vrot.slane %v2298_v47, 5  ;;  %v5266_v58 = vcombine.low %v7285_v0, %v7298_v29  ;;  %v1200_v31 = vld [vmem:[%s7039_s11 + $0x48] sm:$0xe]  ;;  %v6782_v59 = vld [vmem:[%s7039_s11 + $0x38] sm:$0x1] }
  0xa8   : > { %6273 = vmatmul.mubr.msk.bf16.gmra.mrb[20].mxu0 %vm688_vm3, %v5528_v60  ;;  %v5264_v60 = vcombine.low %v7233_v24, %v7239_v37  ;;  %v6779_v24 = vld [vmem:[%s7039_s11 + $0x14] sm:$0x1]  ;;  %v4108_v54 = vsel %vm737_vm0, %v7356_v22, 0  ;;  %v5267_v61 = vcombine.low %v7317_v53, %v7324_v16  ;;  %v5268_v6 = vcombine.low %v7343_v39, %v7351_v43  ;;  %v6780_v16 = vld [vmem:[%s7039_s11 + $0x20] sm:$0x1] }
  0xa9   : > { %6121 = vmatmul.mubr.msk.bf16.gmra.mrb[4].mxu1 %vm688_vm3, %v5260_v28  ;;  %6276 = vmatprep.mubr.msk.bf16.mxu0 %vm688_vm3, %v5529_v20  ;;  %v1254_v28 = vrot.slane %v7529_v34, 5  ;;  %v6726_v20 = vld [vmem:[%s7039_s11 + $0x18] sm:$0xff]   ;;  %v6778_v34 = vld [vmem:[%s7039_s11 + $0x8] sm:$0x1]  ;;  %v1257_v37 = vrot.slane %v6779_v24, 5  ;;  %8863 = vst [vmem:[#allocation10_spill] sm:$0xff] %v7632_v51  ;;  %v5269_v9 = vcombine.low %v7375_v5, %v7387_v30 }
  0xaa   : > { %6124 = vmatprep.mubr.msk.bf16.mxu1 %vm688_vm3, %v5261_v48  ;;  %v1247_v48 = vrot.slane %v7495_v15, 5  ;;  %v1250_v50 = vrot.slane %v6778_v34, 5  ;;  %v1196_v15 = vld [vmem:[%s7039_s11 + $0x18] sm:$0xe]  ;;  %v7637_v63 = vrot.slane %v2295_v49, 4  ;;  %v1264_v22 = vrot.slane %v6780_v16, 5 }
  0xab   : > { %v1256_v55 = vrot.slane %v1254_v28, 4  ;;  %v5291_v1 = vrot.slane %v1196_v15, 9  ;;  %v7659_v29 = vsel %vm7291_vm7, %v5290_v35, %v1254_v28  ;;  %v1270_v25 = vrot.slane %v1268_v12, 4  ;;  %v5614_v24 = vld [vmem:[%s7039_s11 + $0x18] sm:$0xf] }
  0xac   : > { %v1249_v57 = vrot.slane %v1247_v48, 4  ;;  %8864 = vst [vmem:[#allocation11_spill] sm:$0xff] %v7637_v63  ;;  %v7655_v0 = vsel %vm7291_vm7, %v5289_v19, %v1247_v48  ;;  %v1278_v47 = vrot.slane %v6782_v59, 5  ;;  %v7696_v49 = vsel %vm737_vm0, %v7551_v7, 0  ;;  %v5615_v7 = vld [vmem:[%s7039_s11 + $0x1c] sm:$0xf] }
  0xad   : > { %v7663_v53 = vsel %vm7291_vm7, %v1256_v55, %v1257_v37  ;;  %v7700_v34 = vsel %vm7291_vm7, %v5291_v1, %v1261_v4  ;;  %v6732_v37 = vld [vmem:[%s7039_s11 + $0x3c] sm:$0xff]   ;;  %v5294_v35 = vrot.slane %v1199_v8, 9  ;;  %v6783_v55 = vld [vmem:[%s7039_s11 + $0x44] sm:$0x1]  ;;  %v3627_v8 = vshll.u32 %v5614_v24, 16 }
  0xae   : > { %v7674_v23 = vsel %vm7291_vm7, %v1249_v57, %v1250_v50  ;;  %v1201_v50 = vld [vmem:[%s7039_s11 + $0x54] sm:$0xe]  ;;  %v1285_v15 = vrot.slane %v6783_v55, 5  ;;  %v5618_v39 = vld [vmem:[%s7039_s11 + $0x28] sm:$0xf] }
  0xaf   : > { %v6790_v5 = vld [vmem:[%s7039_s11 + $0x70] sm:$0xf] }
  0xb0   : > { %6277 = vmatmul.mubr.msk.bf16.gmra.mrb[24].mxu0 %vm688_vm3, %v5530_v2  ;;  %v1197_v2 = vld [vmem:[%s7039_s11 + $0x24] sm:$0xe]  ;;  %v1310_v30 = vrot.slane %v6790_v5, 5 }
  0xb1   : > { %6125 = vmatmul.mubr.msk.bf16.gmra.mrb[8].mxu1 %vm688_vm3, %v5262_v10  ;;  %6280 = vmatprep.mubr.msk.bf16.mxu0 %vm688_vm3, %v5531_v11  ;;  %v1275_v10 = vrot.slane %v7577_v26, 5  ;;  %v6730_v11 = vld [vmem:[%s7039_s11 + $0x30] sm:$0xff]   ;;  %v5292_v21 = vrot.slane %v1197_v2, 9 }
  0xb2   : > { %6128 = vmatprep.mubr.msk.bf16.mxu1 %vm688_vm3, %v5263_v18  ;;  %v7670_v26 = vld [vmem:[%s8839_s1 + $0x10] sm:$0x3]  ;;  %v1263_v18 = vrot.slane %v1261_v4, 4  ;;  %v1312_v48 = vrot.slane %v1310_v30, 4 }
  0xb3   : > { %v1277_v45 = vrot.slane %v1275_v10, 4  ;;  %v7707_v19 = vsel %vm7291_vm7, %v5292_v21, %v1268_v12  ;;  %v3637_v21 = vshrl.u32 %v5615_v7, 16 }
  0xb4   : > { %v7716_v4 = vsel %vm7291_vm7, %v1263_v18, %v1264_v22  ;;  %v3624_v22 = vshrl.u32 %v5614_v24, 16  ;;  %v3633_v18 = vshll.u32 %v5615_v7, 16  ;;  %v5617_v24 = vld [vmem:[%s7039_s11 + $0x24] sm:$0xf] }
  0xb5   : > { %v7729_v1 = vsel %vm7291_vm7, %v1277_v45, %v1278_v47 }
  0xb6   : > { %v3626_v43 = vrot.slane %v3624_v22, 4  ;;  %v7771_v7 = vrot.slane %v3633_v18, 5  ;;  %v3651_v22 = vshll.u32 %v5617_v24, 16  ;;  %v3661_v18 = vshrl.u32 %v5618_v39, 16 }
  0xb8   : > { %6281 = vmatmul.mubr.msk.bf16.gmra.mrb[28].mxu0 %vm688_vm3, %v5532_v40  ;;  %v6781_v40 = vld [vmem:[%s7039_s11 + $0x2c] sm:$0x1]  ;;  %v3653_v27 = vrot.slane %v3651_v22, 5 }
  0xb9   : > { %6129 = vmatmul.mubr.msk.bf16.gmra.mrb[12].mxu1 %vm688_vm3, %v5264_v60  ;;  %6286 = vmatprep.mubr.msk.bf16.mxu0 %vm688_vm3, %v6726_v20  ;;  %v1271_v28 = vrot.slane %v6781_v40, 5  ;;  %v1282_v60 = vrot.slane %v7597_v17, 5  ;;  %v6786_v40 = vld [vmem:[%s7039_s11 + $0x50] sm:$0x1]  ;;  %v6791_v17 = vld [vmem:[%s7039_s11 + $0x74] sm:$0x1] }
  0xba   : > { %6132 = vmatprep.mubr.msk.bf16.mxu1 %vm688_vm3, %v5265_v44  ;;  %v5293_v44 = vrot.slane %v1198_v41, 9  ;;  %v5296_v41 = vrot.slane %v1201_v50, 9  ;;  %v1202_v50 = vld [vmem:[%s7039_s11 + $0x60] sm:$0xe]  ;;  %v5619_v20 = vld [vmem:[%s7039_s11 + $0x2c] sm:$0x1] }
  0xbb   : > { %v1284_v12 = vrot.slane %v1282_v60, 4  ;;  %v7742_v45 = vsel %vm7291_vm7, %v5294_v35, %v1282_v60  ;;  %v6787_v35 = vld [vmem:[%s7039_s11 + $0x5c] sm:$0x1] }
  0xbc   : > { %v7725_v2 = vsel %vm7291_vm7, %v5293_v44, %v1275_v10  ;;  %v1299_v55 = vrot.slane %v6787_v35, 5  ;;  %v1203_v35 = vld [vmem:[%s7039_s11 + $0x6c] sm:$0xe] }
  0xbd   : > { %v7746_v59 = vsel %vm7291_vm7, %v1284_v12, %v1285_v15  ;;  %v6788_v15 = vld [vmem:[%s7039_s11 + $0x64] sm:$0xf]  ;;  %v3639_v12 = vrot.slane %v3637_v21, 4  ;;  %v5298_v5 = vrot.slane %v1203_v35, 9 }
  0xbe   : > { %v6738_v21 = vld [vmem:[%s7039_s11 + $0x60] sm:$0xff]  }
  0xc0   : > { %6287 = vmatmul.mubr.msk.bf16.vlgmr.msra.gmra.mrb[0].mxu0 %vm688_vm3, %v6728_v62  ;;  %v6784_v62 = vld [vmem:[%s7039_s11 + $0x4c] sm:$0xf] }
  0xc1   : > { %6133 = vmatmul.mubr.msk.bf16.gmra.mrb[16].mxu1 %vm688_vm3, %v5266_v58  ;;  %6319 = vmatpush3.bf16.msra.mxu0 %v4108_v54  ;;  %v1289_v57 = vrot.slane %v6784_v62, 5  ;;  %v7720_v58 = vsel %vm7291_vm7, %v1270_v25, %v1271_v28  ;;  %v5295_v54 = vrot.slane %v1200_v31, 9  ;;  %v1292_v28 = vrot.slane %v6786_v40, 5 }
  0xc2   : > { %6136 = vmatprep.mubr.msk.bf16.mxu1 %vm688_vm3, %v5267_v61  ;;  %6290 = vmatprep.mubr.msk.bf16.mxu0 %vm688_vm3, %v6730_v11  ;;  %v6734_v61 = vld [vmem:[%s7039_s11 + $0x48] sm:$0xff]   ;;  %v6785_v11 = vld [vmem:[%s7039_s11 + $0x58] sm:$0xf]  ;;  %v1303_v62 = vrot.slane %v6788_v15, 5  ;;  %v5621_v15 = vld [vmem:[%s7039_s11 + $0x34] sm:$0xf] }
  0xc3   : > { %6653 = vmatprep.subr.msk.bf16.mxu0 %vm737_vm0, %v7670_v26  ;;  %v1296_v16 = vrot.slane %v6785_v11, 5  ;;  %v1291_v31 = vrot.slane %v1289_v57, 4  ;;  %v7750_v47 = vsel %vm7291_vm7, %v5295_v54, %v1289_v57  ;;  %v5616_v57 = vld [vmem:[%s7039_s11 + $0x20] sm:$0x1]  ;;  %v5620_v54 = vld [vmem:[%s7039_s11 + $0x30] sm:$0xf] }
  0xc4   : > { %v5297_v11 = vrot.slane %v1202_v50, 9  ;;  %v3675_v50 = vshll.u32 %v5620_v54, 16  ;;  %v3643_v25 = vshll.u32 %v5616_v57, 16  ;;  %v3681_v36 = vshll.u32 %v5621_v15, 16 }
  0xc5   : > { %v7761_v60 = vsel %vm7291_vm7, %v5296_v41, %v1296_v16  ;;  %v7777_v41 = vsel %vm7291_vm7, %v1291_v31, %v1292_v28  ;;  %v1305_v31 = vrot.slane %v1303_v62, 4  ;;  %v3672_v28 = vshrl.u32 %v5620_v54, 16 }
  0xc6   : > { %v7819_v35 = vrot.slane %v3681_v36, 5 }
  0xc8   : > { %6291 = vmatmul.mubr.msk.bf16.gmra.mrb[4].mxu0 %vm688_vm3, %v6732_v37  ;;  %v1298_v37 = vrot.slane %v1296_v16, 4  ;;  %v6789_v16 = vld [vmem:[%s7039_s11 + $0x68] sm:$0x1] }
  0xc9   : > { %6137 = vmatmul.mubr.msk.bf16.gmra.mrb[20].mxu1 %vm688_vm3, %v5268_v6  ;;  %6294 = vmatprep.mubr.msk.bf16.mxu0 %vm688_vm3, %v6734_v61  ;;  %v3629_v6 = vrot.slane %v3627_v8, 5  ;;  %v6736_v61 = vld [vmem:[%s7039_s11 + $0x54] sm:$0xff]   ;;  %v1306_v40 = vrot.slane %v6789_v16, 5  ;;  %v3657_v8 = vshll.u32 %v5618_v39, 16  ;;  %v3640_v16 = vor.u32 %v3639_v12, %v7771_v7 }
  0xca   : > { %6140 = vmatprep.mubr.msk.bf16.mxu1 %vm688_vm3, %v5269_v9  ;;  %v3648_v9 = vshrl.u32 %v5617_v24, 16  ;;  %v7786_v44 = vsel %vm7291_vm7, %v1298_v37, %v1299_v55  ;;  %v1313_v24 = vrot.slane %v6791_v17, 5  ;;  %v3685_v39 = vshrl.u32 %v5621_v15, 16 }
  0xcb   : > { %v3630_v10 = vor.u32 %v3629_v6, %v3626_v43  ;;  %v7792_v37 = vrot.slane %v3657_v8, 5  ;;  %v3663_v55 = vrot.slane %v3661_v18, 4  ;;  %v8865_v43 = vcombine.low %v7396_v52, %v7407_v46  ;;  %v6792_v8 = vld [vmem:[%s7039_s11 + $0x7c] sm:$0xf]  ;;  %v7828_v18 = vld [vmem:[%s7039_s11 + $0x38] sm:$0x1] }
  0xcc   : > { %v3650_v38 = vrot.slane %v3648_v9, 4  ;;  %v7801_v17 = vsel %vm7291_vm7, %v5297_v11, %v1303_v62  ;;  %v7805_v57 = vsel %vm7291_vm7, %v1305_v31, %v1306_v40  ;;  %v3674_v6 = vrot.slane %v3672_v28, 4  ;;  %8867 = vst [vmem:[#allocation12_spill] sm:$0xff] %v7828_v18 }
  0xcd   : > { %v3677_v12 = vrot.slane %v3675_v50, 5  ;;  %v8866_v52 = vcombine.low %v7428_v33, %v7433_v56  ;;  %v3631_v46 = vrot.slane %v3630_v10, 4  ;;  %v3641_v54 = vrot.slane %v3640_v16, 4  ;;  %v6740_v33 = vld [vmem:[%s7039_s11 + $0x6c] sm:$0xff]   ;;  %v1205_v16 = vld [vmem:[%s7039_s11 + $0x84] sm:$0xe] }
  0xce   : > { %v3667_v62 = vshll.u32 %v5619_v20, 16  ;;  %v7813_v11 = vsel %vm7291_vm7, %v5298_v5, %v1310_v30  ;;  %v7817_v40 = vsel %vm7291_vm7, %v1312_v48, %v1313_v24  ;;  %v3687_v9 = vrot.slane %v3685_v39, 4  ;;  %v6741_v48 = vld [vmem:[%s7039_s11 + $0x78] sm:$0xff]  }
  0xcf   : > { %v3654_v10 = vor.u32 %v3653_v27, %v3650_v38  ;;  %v3664_v20 = vor.u32 %v3663_v55, %v7792_v37  ;;  %v1317_v30 = vrot.slane %v6792_v8, 5  ;;  %v3678_v38 = vor.u32 %v3677_v12, %v3674_v6  ;;  %v5623_v5 = vld [vmem:[%s7039_s11 + $0x3c] sm:$0xf] }
  0xd0   : > { %6295 = vmatmul.mubr.msk.bf16.gmra.mrb[8].mxu0 %vm688_vm3, %v6736_v61  ;;  %v3645_v61 = vrot.slane %v3643_v25, 5  ;;  %v1204_v25 = vld [vmem:[%s7039_s11 + $0x78] sm:$0xe]  ;;  %v7844_v50 = vrot.slane %v3667_v62, 5  ;;  %v3688_v39 = vor.u32 %v3687_v9, %v7819_v35  ;;  %v3691_v55 = vshll.u32 %v7828_v18, 16 }
  0xd1   : > { %6141 = vmatmul.mubr.msk.bf16.gmra.mrb[24].mxu1 %vm688_vm3, %v8865_v43  ;;  %6298 = vmatprep.mubr.msk.bf16.mxu0 %vm688_vm3, %v6738_v21  ;;  %v3636_v21 = vsel %vm7065_vm4, %v3631_v46, %v7771_v7  ;;  %v5299_v24 = vrot.slane %v1204_v25, 9  ;;  %v6793_v43 = vld [vmem:[%s7039_s11 + $0x88] sm:$0xf]  ;;  %v7852_v7 = vld [vmem:[%s7039_s11 + $0x40] sm:$0xf]  ;;  %v3655_v12 = vrot.slane %v3654_v10, 4  ;;  %v8869_v62 = vcombine.low %v7448_v14, %v7457_v42 }
  0xd2   : > { %6144 = vmatprep.mubr.msk.bf16.mxu1 %vm688_vm3, %v8866_v52  ;;  %v3646_v31 = vsel %vm7065_vm4, %v3641_v54, %v3645_v61  ;;  %v1324_v6 = vrot.slane %v6793_v43, 5  ;;  %8868 = vst [vmem:[#allocation13_spill] sm:$0xff] %v7852_v7  ;;  %v3665_v52 = vrot.slane %v3664_v20, 4  ;;  %v1319_v46 = vrot.slane %v1317_v30, 4  ;;  %v6794_v54 = vld [vmem:[%s7039_s11 + $0x80] sm:$0x1] }
  0xd3   : > { %v1320_v61 = vrot.slane %v6794_v54, 5  ;;  %v3679_v9 = vrot.slane %v3678_v38, 4  ;;  %v5300_v25 = vrot.slane %v1205_v16, 9  ;;  %v3696_v8 = vshrl.u32 %v5623_v5, 16  ;;  %v6742_v10 = vld [vmem:[%s7039_s11 + $0x84] sm:$0xff]  }
  0xd4   : > { %v3699_v43 = vshll.u32 %v5623_v5, 16  ;;  %v7866_v20 = vcombine.low %v3636_v21, %v3646_v31  ;;  %v7870_v14 = vsel %vm737_vm0, %v7670_v26, 0  ;;  %v3709_v38 = vshrl.u32 %v7852_v7, 16  ;;  %v6743_v21 = vld [vmem:[%s7039_s11 + $0x90] sm:$0xff]   ;;  %v6799_v18 = vld [vmem:[%s7039_s11 + $0xa0] sm:$0xf] }
  0xd5   : > { %v3689_v16 = vrot.slane %v3688_v39, 4  ;;  %v3693_v5 = vrot.slane %v3691_v55, 5  ;;  %v1326_v54 = vrot.slane %v1324_v6, 4  ;;  %v3660_v31 = vsel %vm7065_vm4, %v3655_v12, %v7792_v37 }
  0xd6   : > { %v3670_v26 = vsel %vm7065_vm4, %v3665_v52, %v7844_v50  ;;  %v7885_v39 = vsel %vm7291_vm7, %v5299_v24, %v1317_v30  ;;  %v7889_v55 = vsel %vm7291_vm7, %v1319_v46, %v1320_v61  ;;  %v3684_v37 = vsel %vm7065_vm4, %v3679_v9, %v7819_v35  ;;  %v5629_v30 = vld [vmem:[%s7039_s11 + $0x54] sm:$0xf]  ;;  %v7906_v24 = vld [vmem:[%s7039_s11 + $0x58] sm:$0xf]  ;;  %v7911_v61 = vld [vmem:[%s7039_s11 + $0x90] sm:$0xe] }
  0xd7   : > { %v7902_v12 = vsel %vm7291_vm7, %v5300_v25, %v1324_v6  ;;  %v3698_v50 = vrot.slane %v3696_v8, 4  ;;  %v3701_v52 = vrot.slane %v3699_v43, 5  ;;  %v3711_v46 = vrot.slane %v3709_v38, 4 }
  0xd8   : > { %6299 = vmatmul.mubr.msk.bf16.gmra.mrb[12].mxu0 %vm688_vm3, %v6740_v33  ;;  %v8870_v33 = vcombine.low %v7655_v0, %v7674_v23  ;;  %v6795_v0 = vld [vmem:[%s7039_s11 + $0x8c] sm:$0x1]  ;;  %v3694_v36 = vsel %vm7065_vm4, %v3689_v16, %v3693_v5  ;;  %v3744_v25 = vshrl.u32 %v5629_v30, 16  ;;  %v3747_v8 = vshll.u32 %v5629_v30, 16 }
  0xd9   : > { %6145 = vmatmul.mubr.msk.bf16.gmra.mrb[28].mxu1 %vm688_vm3, %v8869_v62  ;;  %6302 = vmatprep.mubr.msk.bf16.mxu0 %vm688_vm3, %v6741_v48  ;;  %v3705_v48 = vshll.u32 %v7852_v7, 16  ;;  %v1327_v23 = vrot.slane %v6795_v0, 5  ;;  %v5626_v62 = vld [vmem:[%s7039_s11 + $0x48] sm:$0xf]  ;;  %v7895_v0 = vld [vmem:[%s7039_s11 + $0x4c] sm:$0xf]  ;;  %v8872_v38 = vcombine.low %v7659_v29, %v7663_v53  ;;  %v7929_v16 = vcombine.low %v3660_v31, %v3670_v26 }
  0xda   : > { %6150 = vmatprep.mubr.msk.bf16.mxu1 %vm688_vm3, %v8870_v33  ;;  %v7892_v33 = vld [vmem:[%s7039_s11 + $0x44] sm:$0x1]  ;;  %v3720_v27 = vshrl.u32 %v5626_v62, 16  ;;  %v3723_v15 = vshll.u32 %v5626_v62, 16  ;;  %v3729_v6 = vshll.u32 %v7895_v0, 16  ;;  %v3733_v9 = vshrl.u32 %v7895_v0, 16 }
  0xdb   : > { %8871 = vst [vmem:[#allocation14_spill] sm:$0xff] %v7892_v33  ;;  %v7908_v28 = vrot.slane %v3705_v48, 5  ;;  %v7917_v35 = vsel %vm7291_vm7, %v1326_v54, %v1327_v23  ;;  %v3753_v43 = vshll.u32 %v7906_v24, 16  ;;  %v3757_v48 = vshrl.u32 %v7906_v24, 16  ;;  %v5632_v31 = vld [vmem:[%s7039_s11 + $0x60] sm:$0xf] }
  0xdc   : > { %v3715_v5 = vshll.u32 %v7892_v33, 16  ;;  %v5301_v54 = vrot.slane %v7911_v61, 9  ;;  %v8873_v23 = vcombine.low %v7700_v34, %v7716_v4  ;;  %v7940_v29 = vcombine.low %v3684_v37, %v3694_v36  ;;  %v6744_v26 = vld [vmem:[%s7039_s11 + $0x9c] sm:$0xff]   ;;  %v6745_v30 = vld [vmem:[%s7039_s11 + $0xa8] sm:$0xff]  }
  0xdd   : > { %v3702_v53 = vor.u32 %v3701_v52, %v3698_v50  ;;  %v3722_v62 = vrot.slane %v3720_v27, 4  ;;  %v7951_v34 = vrot.slane %v3729_v6, 5  ;;  %v3735_v4 = vrot.slane %v3733_v9, 4  ;;  %v6796_v36 = vld [vmem:[%s8839_s1 + $0x8] sm:$0x3] }
  0xde   : > { %v3746_v27 = vrot.slane %v3744_v25, 4  ;;  %v3749_v37 = vrot.slane %v3747_v8, 5  ;;  %v7960_v50 = vrot.slane %v3753_v43, 5  ;;  %v3759_v52 = vrot.slane %v3757_v48, 4  ;;  %v6797_v6 = vld [vmem:[%s7039_s11 + $0x94] sm:$0xf] }
  0xdf   : > { %v7966_v9 = vld [vmem:[%s7039_s11 + $0x64] sm:$0xf]  ;;  %v3768_v61 = vshrl.u32 %v5632_v31, 16  ;;  %v7968_v22 = vrot.slane %v3702_v53, 4  ;;  %v1338_v25 = vrot.slane %v6799_v18, 5  ;;  %v3736_v43 = vor.u32 %v3735_v4, %v7951_v34 }
  0xe0   : > { %6303 = vmatmul.mubr.msk.bf16.gmra.mrb[16].mxu0 %vm688_vm3, %v6742_v10  ;;  %8874 = vst [vmem:[#allocation15_spill] sm:$0xff] %v7966_v9  ;;  %v3771_v10 = vshll.u32 %v5632_v31, 16  ;;  %v3750_v31 = vor.u32 %v3749_v37, %v3746_v27  ;;  %v3760_v53 = vor.u32 %v3759_v52, %v7960_v50  ;;  %v8875_v18 = vcombine.low %v7707_v19, %v7720_v58  ;;  %v6746_v37 = vld [vmem:[%s7039_s11 + $0xb4] sm:$0xff]  }
  0xe1   : > { %6151 = vmatmul.mubr.msk.bf16.vlgmr.msra.gmra.mrb[0].mxu1 %vm688_vm3, %v8872_v38  ;;  %6306 = vmatprep.mubr.msk.bf16.mxu0 %vm688_vm3, %v6743_v21  ;;  %v3725_v21 = vrot.slane %v3723_v15, 5  ;;  %v7949_v38 = vld [vmem:[%s7039_s11 + $0x50] sm:$0x1]  ;;  %v7958_v15 = vld [vmem:[%s7039_s11 + $0x5c] sm:$0x1]  ;;  %v8876_v27 = vcombine.low %v7725_v2, %v7729_v1  ;;  %v1340_v52 = vrot.slane %v1338_v25, 4 }
  0xe2   : > { %6183 = vmatpush3.bf16.msra.mxu1 %v7696_v49  ;;  %6154 = vmatprep.mubr.msk.bf16.mxu1 %vm688_vm3, %v8873_v23  ;;  %v3712_v49 = vor.u32 %v3711_v46, %v7908_v28  ;;  %v7962_v46 = vrot.slane %v3715_v5, 5  ;;  %v1331_v23 = vrot.slane %v6797_v6, 5  ;;  %v3739_v48 = vshll.u32 %v7949_v38, 16  ;;  %v1207_v5 = vld [vmem:[%s7039_s11 + $0x9c] sm:$0xe] }
  0xe3   : > { %6649 = vmatprep.subr.msk.bf16.mxu1 %vm737_vm0, %v6796_v36  ;;  %v6798_v36 = vld [vmem:[%s7039_s11 + $0x98] sm:$0x1]  ;;  %v3726_v7 = vor.u32 %v3725_v21, %v3722_v62  ;;  %v3763_v6 = vshll.u32 %v7958_v15, 16  ;;  %v3781_v62 = vshrl.u32 %v7966_v9, 16  ;;  %v3773_v4 = vrot.slane %v3771_v10, 5 }
  0xe4   : > { %v1334_v33 = vrot.slane %v6798_v36, 5  ;;  %v3713_v8 = vrot.slane %v3712_v49, 4  ;;  %v3777_v36 = vshll.u32 %v7966_v9, 16  ;;  %v7987_v21 = vsel %vm7291_vm7, %v5301_v54, %v1331_v23  ;;  %v7998_v2 = vld [vmem:[%s7039_s11 + $0x68] sm:$0x1] }
  0xe5   : > { %v3770_v49 = vrot.slane %v3768_v61, 4  ;;  %v3727_v19 = vrot.slane %v3726_v7, 4  ;;  %v5302_v58 = vrot.slane %v1207_v5, 9  ;;  %v3737_v3 = vrot.slane %v3736_v43, 4  ;;  %8877 = vst [vmem:[#allocation16_spill] sm:$0xff] %v7998_v2  ;;  %v6747_v5 = vld [vmem:[%s7039_s11 + $0xc0] sm:$0xff]  }
  0xe6   : > { %v3741_v54 = vrot.slane %v3739_v48, 5  ;;  %v3765_v63 = vrot.slane %v3763_v6, 5  ;;  %v1345_v61 = vrot.slane %v7433_v56, 5  ;;  %v3751_v10 = vrot.slane %v3750_v31, 4  ;;  %v1209_v31 = vld [vmem:[%s7039_s11 + $0xb4] sm:$0xe] }
  0xe7   : > { %v3761_v51 = vrot.slane %v3760_v53, 4  ;;  %v8000_v1 = vrot.slane %v3777_v36, 5  ;;  %v3783_v7 = vrot.slane %v3781_v62, 4  ;;  %v3708_v43 = vsel %vm7065_vm4, %v7968_v22, %v7908_v28  ;;  %v6801_v62 = vld [vmem:[%s7039_s11 + $0xb0] sm:$0x1] }
  0xe8   : > { %6307 = vmatmul.mubr.msk.bf16.gmra.mrb[20].mxu0 %vm688_vm3, %v6744_v26  ;;  %v1333_v26 = vrot.slane %v1331_v23, 4  ;;  %v1208_v23 = vld [vmem:[%s7039_s11 + $0xa8] sm:$0xe]  ;;  %v3718_v48 = vsel %vm7065_vm4, %v3713_v8, %v7962_v46  ;;  %v3774_v6 = vor.u32 %v3773_v4, %v3770_v49  ;;  %v3732_v53 = vsel %vm7065_vm4, %v3727_v19, %v7951_v34  ;;  %v5635_v46 = vld [vmem:[%s7039_s11 + $0x6c] sm:$0xf] }
  0xe9   : > { %6155 = vmatmul.mubr.msk.bf16.gmra.mrb[4].mxu1 %vm688_vm3, %v8875_v18  ;;  %6310 = vmatprep.mubr.msk.bf16.mxu0 %vm688_vm3, %v6745_v30  ;;  %v6800_v18 = vld [vmem:[%s7039_s11 + $0xa4] sm:$0x1]  ;;  %v8020_v36 = vsel %vm7291_vm7, %v5302_v58, %v1338_v25  ;;  %v5303_v28 = vrot.slane %v1208_v23, 9  ;;  %v1347_v8 = vrot.slane %v1345_v61, 4  ;;  %v3787_v49 = vshll.u32 %v7998_v2, 16 }
  0xea   : > { %6158 = vmatprep.mubr.msk.bf16.mxu1 %vm688_vm3, %v8876_v27  ;;  %v1341_v30 = vrot.slane %v6800_v18, 5  ;;  %v8012_v56 = vsel %vm7291_vm7, %v1333_v26, %v1334_v33  ;;  %v3742_v33 = vsel %vm7065_vm4, %v3737_v3, %v3741_v54  ;;  %v1348_v26 = vrot.slane %v6801_v62, 5  ;;  %v5638_v18 = vld [vmem:[%s7039_s11 + $0x78] sm:$0xf]  ;;  %v8075_v54 = vld [vmem:[%s7039_s11 + $0xbc] sm:$0x1] }
  0xeb   : > { %v3756_v34 = vsel %vm7065_vm4, %v3751_v10, %v7960_v50  ;;  %v3766_v25 = vsel %vm7065_vm4, %v3761_v51, %v3765_v63  ;;  %v3784_v4 = vor.u32 %v3783_v7, %v8000_v1  ;;  %v5304_v27 = vrot.slane %v1209_v31, 9  ;;  %v8049_v51 = vld [vmem:[%s7039_s11 + $0x70] sm:$0xf]  ;;  %v8079_v10 = vld [vmem:[%s7039_s11 + $0x7c] sm:$0xf] }
  0xec   : > { %v8024_v22 = vsel %vm7291_vm7, %v1340_v52, %v1341_v30  ;;  %v8879_v3 = vcombine.low %v7742_v45, %v7746_v59  ;;  %v8045_v19 = vrot.slane %v3774_v6, 4  ;;  %v1352_v50 = vrot.slane %v7457_v42, 5  ;;  %8880 = vst [vmem:[#allocation18_spill] sm:$0xff] %v8049_v51  ;;  %8882 = vst [vmem:[#allocation19_spill] sm:$0xff] %v8079_v10  ;;  %v5641_v7 = vld [vmem:[%s7039_s11 + $0x84] sm:$0xf] }
  0xed   : > { %8878 = vst [vmem:[#allocation17_spill] sm:$0xff] %v8024_v22  ;;  %v3792_v63 = vshrl.u32 %v5635_v46, 16  ;;  %v8881_v45 = vcombine.low %v7750_v47, %v7777_v41  ;;  %v8057_v58 = vcombine.low %v3732_v53, %v3742_v33  ;;  %v8063_v42 = vsel %vm7291_vm7, %v5303_v28, %v1345_v61  ;;  %v6748_v61 = vld [vmem:[%s7039_s11 + $0xcc] sm:$0xff]   ;;  %v8091_v31 = vld [vmem:[%s7039_s11 + $0x88] sm:$0xf] }
  0xee   : > { %v8066_v30 = vcombine.low %v3756_v34, %v3766_v25  ;;  %v8070_v47 = vsel %vm7291_vm7, %v1347_v8, %v1348_v26  ;;  %v8072_v41 = vrot.slane %v3787_v49, 5  ;;  %v3801_v6 = vshll.u32 %v8049_v51, 16  ;;  %8883 = vst [vmem:[#allocation20_spill] sm:$0xff] %v8091_v31  ;;  %v5644_v62 = vld [vmem:[%s7039_s11 + $0x90] sm:$0xf] }
  0xef   : > { %v8097_v28 = vrot.slane %v1352_v50, 4  ;;  %v8099_v33 = vrot.slane %v3792_v63, 4  ;;  %v3805_v8 = vshrl.u32 %v8049_v51, 16  ;;  %v3816_v26 = vshrl.u32 %v5638_v18, 16  ;;  %v8106_v25 = vld [vmem:[%s7039_s11 + $0x94] sm:$0xf] }
  0xf0   : > { %6311 = vmatmul.mubr.msk.bf16.gmra.mrb[24].mxu0 %vm688_vm3, %v6746_v37  ;;  %v8043_v37 = vcombine.low %v3708_v43, %v3718_v48  ;;  %v8087_v43 = vsel %vm7291_vm7, %v5304_v27, %v1352_v50  ;;  %v3795_v48 = vshll.u32 %v5635_v46, 16  ;;  %v3819_v49 = vshll.u32 %v5638_v18, 16  ;;  %8884 = vst [vmem:[#allocation21_spill] sm:$0xff] %v8106_v25  ;;  %v8144_v2 = vld [vmem:[%s7039_s11 + $0x8c] sm:$0x1] }
  0xf1   : > { %6159 = vmatmul.mubr.msk.bf16.gmra.mrb[8].mxu1 %vm688_vm3, %v8879_v3  ;;  %6314 = vmatprep.mubr.msk.bf16.mxu0 %vm688_vm3, %v6747_v5  ;;  %v8083_v5 = vrot.slane %v3784_v4, 4  ;;  %v3825_v46 = vshll.u32 %v8079_v10, 16  ;;  %v3829_v34 = vshrl.u32 %v8079_v10, 16  ;;  %v3840_v4 = vshrl.u32 %v5641_v7, 16 }
  0xf2   : > { %6162 = vmatprep.mubr.msk.bf16.mxu1 %vm688_vm3, %v8881_v45  ;;  %v3843_v27 = vshll.u32 %v5641_v7, 16  ;;  %v3849_v3 = vshll.u32 %v8091_v31, 16  ;;  %v3853_v50 = vshrl.u32 %v8091_v31, 16  ;;  %v8116_v45 = vld [vmem:[%s7039_s11 + $0x74] sm:$0x1]  ;;  %v3797_v18 = vrot.slane %v3795_v48, 5 }
  0xf3   : > { %v3864_v52 = vshrl.u32 %v5644_v62, 16  ;;  %v3867_v53 = vshll.u32 %v5644_v62, 16  ;;  %v8885_v7 = vcombine.low %v7761_v60, %v7786_v44  ;;  %v3807_v59 = vrot.slane %v3805_v8, 4  ;;  %v5647_v48 = vld [vmem:[%s7039_s11 + $0x9c] sm:$0xf] }
  0xf4   : > { %v3873_v63 = vshll.u32 %v8106_v25, 16  ;;  %v3877_v23 = vshrl.u32 %v8106_v25, 16  ;;  %v8886_v62 = vcombine.low %v7801_v17, %v7805_v57  ;;  %v8134_v44 = vld [vmem:[%s7039_s11 + $0x80] sm:$0x1]  ;;  %v3818_v60 = vrot.slane %v3816_v26, 4 }
  0xf5   : > { %8887 = vst [vmem:[#allocation22_spill] sm:$0xff] %v8134_v44  ;;  %v3842_v31 = vrot.slane %v3840_v4, 4  ;;  %v3845_v8 = vrot.slane %v3843_v27, 5  ;;  %v8138_v10 = vrot.slane %v3849_v3, 5  ;;  %v3855_v51 = vrot.slane %v3853_v50, 4 }
  0xf6   : > { %v8141_v25 = vld [vmem:[%s7039_s11 + $0xa0] sm:$0xf]  ;;  %v3866_v17 = vrot.slane %v3864_v52, 4  ;;  %v3869_v57 = vrot.slane %v3867_v53, 5  ;;  %v3891_v9 = vshll.u32 %v5647_v48, 16  ;;  %v3798_v26 = vor.u32 %v3797_v18, %v8099_v33 }
  0xf7   : > { %v3835_v27 = vshll.u32 %v8134_v44, 16  ;;  %v8153_v3 = vld [vmem:[%s7039_s11 + $0x98] sm:$0x1]  ;;  %v3897_v50 = vshll.u32 %v8141_v25, 16  ;;  %v3901_v52 = vshrl.u32 %v8141_v25, 16  ;;  %v3846_v22 = vor.u32 %v3845_v8, %v3842_v31 }
  0xf8   : > { %6315 = vmatmul.mubr.msk.bf16.gmra.mrb[28].mxu0 %vm688_vm3, %v6748_v61  ;;  %v8124_v61 = vrot.slane %v3801_v6, 5  ;;  %v3831_v6 = vrot.slane %v3829_v34, 4  ;;  %v3879_v34 = vrot.slane %v3877_v23, 4  ;;  %v3859_v33 = vshll.u32 %v8144_v2, 16 }
  0xf9   : > { %6163 = vmatmul.mubr.msk.bf16.gmra.mrb[12].mxu1 %vm688_vm3, %v8885_v7  ;;  %6320 = vmatprep.mubr.msk.bf16.mxu0 %vm688_vm3, %v7866_v20  ;;  %v3821_v7 = vrot.slane %v3819_v49, 5  ;;  %v8136_v20 = vrot.slane %v3825_v46, 5  ;;  %v3811_v49 = vshll.u32 %v8116_v45, 16  ;;  %v8148_v46 = vrot.slane %v3873_v63, 5 }
  0xfa   : > { %6166 = vmatprep.mubr.msk.bf16.mxu1 %vm688_vm3, %v8886_v62  ;;  %v3888_v62 = vshrl.u32 %v5647_v48, 16  ;;  %v3808_v4 = vor.u32 %v3807_v59, %v8124_v61  ;;  %v3856_v23 = vor.u32 %v3855_v51, %v8138_v10  ;;  %v3870_v59 = vor.u32 %v3869_v57, %v3866_v17  ;;  %v8186_v57 = vld [vmem:[%s7039_s11 + $0xa4] sm:$0x1] }
  0xfb   : > { %v3822_v53 = vor.u32 %v3821_v7, %v3818_v60  ;;  %v3832_v48 = vor.u32 %v3831_v6, %v8136_v20  ;;  %v3893_v18 = vrot.slane %v3891_v9, 5  ;;  %v8888_v44 = vcombine.low %v7813_v11, %v7817_v40 }
  0xfc   : > { %v3890_v63 = vrot.slane %v3888_v62, 4  ;;  %v8889_v31 = vrot.slane %v8075_v54, 5  ;;  %v3813_v51 = vrot.slane %v3811_v49, 5  ;;  %v3880_v60 = vor.u32 %v3879_v34, %v8148_v46  ;;  %v8189_v34 = vld [vmem:[%s7039_s11 + $0xac] sm:$0xf] }
  0xfd   : > { %v3883_v9 = vshll.u32 %v8153_v3, 16  ;;  %v8890_v11 = vcombine.low %v7885_v39, %v7889_v55  ;;  %v3799_v40 = vrot.slane %v3798_v26, 4  ;;  %v8182_v54 = vrot.slane %v3897_v50, 5 }
  0xfe   : > { %v3823_v7 = vrot.slane %v3822_v53, 4  ;;  %v3833_v6 = vrot.slane %v3832_v48, 4  ;;  %v3837_v8 = vrot.slane %v3835_v27, 5  ;;  %v3861_v17 = vrot.slane %v3859_v33, 5  ;;  %v8199_v48 = vld [vmem:[%s7039_s11 + $0xb0] sm:$0x1] }
  0xff   : > { %v3847_v39 = vrot.slane %v3846_v22, 4  ;;  %v3857_v55 = vrot.slane %v3856_v23, 4  ;;  %v3871_v62 = vrot.slane %v3870_v59, 4  ;;  %v3894_v49 = vor.u32 %v3893_v18, %v3890_v63 }
 0x100   : > { %6321 = vmatmul.mubr.msk.bf16.vlgmr.msra.gmra.mrb[0].mxu0 %vm688_vm3, %v7929_v16  ;;  %v8172_v16 = vsel %vm7291_vm7, %v8097_v28, %v8889_v31  ;;  %v3903_v28 = vrot.slane %v3901_v52, 4  ;;  %v3885_v26 = vrot.slane %v3883_v9, 5  ;;  %v3804_v52 = vsel %vm7065_vm4, %v3799_v40, %v8124_v61 }
 0x101   : > { %6167 = vmatmul.mubr.msk.bf16.gmra.mrb[16].mxu1 %vm688_vm3, %v8888_v44  ;;  %6353 = vmatpush3.bf16.msra.mxu0 %v7870_v14  ;;  %v3809_v14 = vrot.slane %v3808_v4, 4  ;;  %v5650_v44 = vld [vmem:[%s7039_s11 + $0xa8] sm:$0xf]  ;;  %v3907_v22 = vshll.u32 %v8186_v57, 16  ;;  %v3828_v33 = vsel %vm7065_vm4, %v3823_v7, %v8136_v20  ;;  %v3838_v23 = vsel %vm7065_vm4, %v3833_v6, %v3837_v8 }
 0x102   : > { %6170 = vmatprep.mubr.msk.bf16.mxu1 %vm688_vm3, %v8890_v11  ;;  %6324 = vmatprep.mubr.msk.bf16.mxu0 %vm688_vm3, %v7940_v29  ;;  %v3881_v29 = vrot.slane %v3880_v60, 4  ;;  %v3912_v4 = vshrl.u32 %v5650_v44, 16  ;;  %v3915_v50 = vshll.u32 %v5650_v44, 16  ;;  %v3904_v53 = vor.u32 %v3903_v28, %v8182_v54  ;;  %v5699_v11 = vld [vmem:[%s7039_s11 + $0x48] sm:$0xe] }
 0x103   : > { %v3814_v27 = vsel %vm7065_vm4, %v3809_v14, %v3813_v51  ;;  %v3921_v59 = vshll.u32 %v8189_v34, 16  ;;  %v3925_v61 = vshrl.u32 %v8189_v34, 16  ;;  %v3852_v63 = vsel %vm7065_vm4, %v3847_v39, %v8138_v10  ;;  %v8264_v39 = vld [vmem:[%s7039_s11 + $0xb8] sm:$0xf] }
 0x104   : > { %v3862_v18 = vsel %vm7065_vm4, %v3857_v55, %v3861_v17  ;;  %v3876_v20 = vsel %vm7065_vm4, %v3871_v62, %v8148_v46  ;;  %v3895_v31 = vrot.slane %v3894_v49, 4  ;;  %v8891_v51 = vcombine.low %v7902_v12, %v7917_v35 }
 0x105   : > { %v3914_v10 = vrot.slane %v3912_v4, 4  ;;  %v3917_v60 = vrot.slane %v3915_v50, 5  ;;  %v3931_v9 = vshll.u32 %v8199_v48, 16  ;;  %v8892_v46 = vcombine.low %v7987_v21, %v8012_v56  ;;  %v5653_v21 = vld [vmem:[%s7039_s11 + $0xb4] sm:$0xf] }
 0x106   : > { %v5320_v12 = vcombine.low %v8063_v42, %v8070_v47  ;;  %v8893_v35 = vsel %vm7065_vm4, %v8083_v5, %v8072_v41  ;;  %v3905_v14 = vrot.slane %v3904_v53, 4  ;;  %v3909_v28 = vrot.slane %v3907_v22, 5  ;;  %v5701_v4 = vld [vmem:[%s7039_s11 + $0x60] sm:$0xe]  ;;  %v5702_v53 = vld [vmem:[%s7039_s11 + $0x6c] sm:$0xe] }
 0x107   : > { %v5321_v56 = vcombine.low %v8087_v43, %v8172_v16  ;;  %v8247_v44 = vcombine.low %v3804_v52, %v3814_v27  ;;  %v8249_v42 = vrot.slane %v3921_v59, 5  ;;  %v3927_v47 = vrot.slane %v3925_v61, 4  ;;  %v8902_v16 = vld [vmem:[#allocation10_spill] sm:$0xff] }
 0x108   : > { %6325 = vmatmul.mubr.msk.bf16.gmra.mrb[4].mxu0 %vm688_vm3, %v8043_v37  ;;  %v3886_v37 = vsel %vm7065_vm4, %v3881_v29, %v3885_v26  ;;  %v8251_v41 = vcombine.low %v3828_v33, %v3838_v23  ;;  %v8253_v5 = vcombine.low %v3852_v63, %v3862_v18  ;;  %v3900_v6 = vsel %vm7065_vm4, %v3895_v31, %v8182_v54  ;;  %v8895_v23 = vld [vmem:[#allocation17_spill] sm:$0xff]  ;;  %v5656_v63 = vld [vmem:[%s7039_s11 + $0xc0] sm:$0xf]  ;;  %v8898_v31 = vld [vmem:[#allocation16_spill] sm:$0xff] }
 0x109   : > { %6171 = vmatmul.mubr.msk.bf16.gmra.mrb[20].mxu1 %vm688_vm3, %v8891_v51  ;;  %6328 = vmatprep.mubr.msk.bf16.mxu0 %vm688_vm3, %v8057_v58  ;;  %v8894_v58 = vsel %vm7065_vm4, %v8045_v19, %v8000_v1  ;;  %v8255_v7 = vcombine.low %v3876_v20, %v3886_v37  ;;  %v5715_v1 = vrot.slane %v5699_v11, 9  ;;  %v5700_v19 = vld [vmem:[%s7039_s11 + $0x54] sm:$0xe]  ;;  %v3918_v8 = vor.u32 %v3917_v60, %v3914_v10  ;;  %v8897_v18 = vld [vmem:[#allocation15_spill] sm:$0xff] }
 0x10a   : > { %6174 = vmatprep.mubr.msk.bf16.mxu1 %vm688_vm3, %v8892_v46  ;;  %v5669_v40 = vcombine.low %v8894_v58, %v8893_v35  ;;  %v8261_v17 = vrot.slane %v3931_v9, 5  ;;  %v3936_v55 = vshrl.u32 %v5653_v21, 16  ;;  %v3910_v62 = vsel %vm7065_vm4, %v3905_v14, %v3909_v28  ;;  %v8899_v9 = vld [vmem:[#allocation18_spill] sm:$0xff]  ;;  %v8313_v35 = vld [vmem:[%s7039_s11 + $0xbc] sm:$0x1] }
 0x10b   : > { %v3939_v49 = vshll.u32 %v5653_v21, 16  ;;  %v4397_v29 = vrot.slane %v7895_v0, 5  ;;  %v4400_v26 = vrot.slane %v7949_v38, 5  ;;  %v3928_v50 = vor.u32 %v3927_v47, %v8249_v42  ;;  %v8316_v58 = vld [vmem:[%s7039_s11 + $0xc4] sm:$0xf] }
 0x10c   : > { %v5716_v52 = vrot.slane %v5700_v19, 9  ;;  %v4404_v54 = vrot.slane %v7906_v24, 5  ;;  %v4407_v27 = vrot.slane %v7958_v15, 5  ;;  %v3945_v22 = vshll.u32 %v8264_v39, 16  ;;  %v5703_v19 = vld [vmem:[%s7039_s11 + $0x78] sm:$0xe] }
 0x10d   : > { %v3949_v33 = vshrl.u32 %v8264_v39, 16  ;;  %v8281_v0 = vsel %vm7291_vm7, %v5715_v1, %v4397_v29  ;;  %v4399_v38 = vrot.slane %v4397_v29, 4  ;;  %v8896_v59 = vcombine.low %v8020_v36, %v8895_v23  ;;  %v8900_v23 = vld [vmem:[#allocation19_spill] sm:$0xff] }
 0x10e   : > { %v8288_v24 = vcombine.low %v3900_v6, %v3910_v62  ;;  %v8292_v15 = vsel %vm7291_vm7, %v5716_v52, %v4404_v54  ;;  %v5717_v61 = vrot.slane %v5701_v4, 9  ;;  %v4411_v20 = vrot.slane %v8897_v18, 5  ;;  %v6749_v6 = vld [vmem:[%s7039_s11 + $0xc] sm:$0xff]  }
 0x10f   : > { %v8298_v36 = vsel %vm7291_vm7, %v4399_v38, %v4400_v26  ;;  %v4414_v51 = vrot.slane %v8898_v31, 5  ;;  %v5718_v37 = vrot.slane %v5702_v53, 9  ;;  %v4418_v11 = vrot.slane %v8899_v9, 5 }
 0x110   : > { %6329 = vmatmul.mubr.msk.bf16.gmra.mrb[8].mxu0 %vm688_vm3, %v8066_v30  ;;  %v4406_v30 = vrot.slane %v4404_v54, 4  ;;  %v5732_v10 = vcombine.low %v8281_v0, %v8298_v36  ;;  %v4421_v46 = vrot.slane %v8116_v45, 5  ;;  %v8322_v14 = vsel %vm7291_vm7, %v5717_v61, %v4411_v20 }
 0x111   : > { %6175 = vmatmul.mubr.msk.bf16.gmra.mrb[24].mxu1 %vm688_vm3, %v8896_v59  ;;  %6332 = vmatprep.mubr.msk.bf16.mxu0 %vm688_vm3, %v5669_v40  ;;  %v4413_v28 = vrot.slane %v4411_v20, 4  ;;  %v8324_v21 = vrot.slane %v3936_v55, 4  ;;  %v3960_v47 = vshrl.u32 %v5656_v63, 16  ;;  %v8328_v45 = vsel %vm7291_vm7, %v5718_v37, %v4418_v11  ;;  %v5430_v55 = vld [vmem:[%s7039_s11 + $0x78] sm:$0xf] }
 0x112   : > { %6178 = vmatprep.mubr.msk.bf16.mxu1 %vm688_vm3, %v5320_v12  ;;  %v8306_v60 = vsel %vm7291_vm7, %v4406_v30, %v4407_v27  ;;  %v8310_v12 = vrot.slane %v3918_v8, 4  ;;  %v4420_v1 = vrot.slane %v4418_v11, 4  ;;  %v8332_v8 = vrot.slane %v3928_v50, 4  ;;  %v8901_v59 = vld [vmem:[#allocation22_spill] sm:$0xff] }
 0x113   : > { %v5733_v40 = vcombine.low %v8292_v15, %v8306_v60  ;;  %v8334_v62 = vrot.slane %v3939_v49, 5  ;;  %v3963_v29 = vshll.u32 %v5656_v63, 16  ;;  %v8338_v26 = vsel %vm7291_vm7, %v4413_v28, %v4414_v51  ;;  %v8904_v28 = vld [vmem:[#allocation20_spill] sm:$0xff]  ;;  %v6812_v60 = vld [vmem:[%s7039_s11 + $0xa0] sm:$0xf] }
 0x114   : > { %v8341_v4 = vrot.slane %v3945_v22, 5  ;;  %v8343_v52 = vrot.slane %v3949_v33, 4  ;;  %v5734_v54 = vcombine.low %v8322_v14, %v8338_v26  ;;  %v8349_v27 = vsel %vm7291_vm7, %v4420_v1, %v4421_v46  ;;  %v5704_v33 = vld [vmem:[%s7039_s11 + $0x84] sm:$0xe]  ;;  %v6750_v1 = vld [vmem:[%s7039_s11 + $0x18] sm:$0xff]  }
 0x115   : > { %v3955_v49 = vshll.u32 %v8313_v35, 16  ;;  %v3969_v50 = vshll.u32 %v8316_v58, 16  ;;  %v5735_v53 = vcombine.low %v8328_v45, %v8349_v27  ;;  %v5719_v22 = vrot.slane %v5703_v19, 9  ;;  %v6816_v27 = vld [vmem:[%s7039_s11 + $0xac] sm:$0xf] }
 0x116   : > { %v3962_v38 = vrot.slane %v3960_v47, 4  ;;  %v4428_v30 = vrot.slane %v8901_v59, 5  ;;  %v2279_v61 = vshrl.u32 %v5430_v55, 16  ;;  %v3965_v63 = vrot.slane %v3963_v29, 5  ;;  %v5659_v29 = vld [vmem:[%s7039_s11 + $0xcc] sm:$0xf] }
 0x117   : > { %v3973_v18 = vshrl.u32 %v8316_v58, 16  ;;  %v2282_v43 = vshll.u32 %v5430_v55, 16  ;;  %v5720_v37 = vrot.slane %v5704_v33, 9  ;;  %v3924_v9 = vsel %vm7065_vm4, %v8310_v12, %v8249_v42  ;;  %v8392_v55 = vld [vmem:[%s7039_s11 + $0xd0] sm:$0xf] }
 0x118   : > { %6333 = vmatmul.mubr.msk.bf16.gmra.mrb[12].mxu0 %vm688_vm3, %v8247_v44  ;;  %v4425_v44 = vrot.slane %v8900_v23, 5  ;;  %v2281_v51 = vrot.slane %v2279_v61, 4  ;;  %v3942_v11 = vor.u32 %v8334_v62, %v8324_v21  ;;  %v4432_v47 = vrot.slane %v8904_v28, 5  ;;  %v6751_v21 = vld [vmem:[%s7039_s11 + $0x24] sm:$0xff]  }
 0x119   : > { %6179 = vmatmul.mubr.msk.bf16.gmra.mrb[28].mxu1 %vm688_vm3, %v5321_v56  ;;  %6336 = vmatprep.mubr.msk.bf16.mxu0 %vm688_vm3, %v8251_v41  ;;  %v8903_v56 = vld [vmem:[#allocation11_spill] sm:$0xff]  ;;  %v2284_v46 = vrot.slane %v2282_v43, 5  ;;  %v3934_v19 = vsel %vm7065_vm4, %v8332_v8, %v8261_v17  ;;  %v4435_v12 = vrot.slane %v8144_v2, 5  ;;  %v8400_v62 = vrot.slane %v3969_v50, 5  ;;  %v5705_v8 = vld [vmem:[%s7039_s11 + $0x90] sm:$0xe] }
 0x11a   : > { %6184 = vmatprep.mubr.msk.bf16.mxu1 %vm688_vm3, %v6749_v6  ;;  %v2301_v41 = vsel %vm7065_vm4, %v8903_v56, %v8902_v16  ;;  %v8374_v20 = vsel %vm7291_vm7, %v5719_v22, %v4425_v44  ;;  %v4427_v31 = vrot.slane %v4425_v44, 4  ;;  %v3952_v6 = vor.u32 %v8343_v52, %v8341_v4  ;;  %v8406_v52 = vld [vmem:[%s7039_s11 + $0xc8] sm:$0x1] }
 0x11b   : > { %v3975_v22 = vrot.slane %v3973_v18, 4  ;;  %v2285_v17 = vor.u32 %v2284_v46, %v2281_v51  ;;  %v3957_v23 = vrot.slane %v3955_v49, 5  ;;  %v3966_v44 = vor.u32 %v3965_v63, %v3962_v38  ;;  %v8906_v16 = vld [vmem:[#allocation8_spill] sm:$0xff]  ;;  %v8907_v51 = vld [vmem:[#allocation9_spill] sm:$0xff] }
 0x11c   : > { %v8396_v42 = vsel %vm7291_vm7, %v4427_v31, %v4428_v30  ;;  %v8410_v59 = vsel %vm7291_vm7, %v5720_v37, %v4432_v47  ;;  %v4434_v30 = vrot.slane %v4432_v47, 4  ;;  %v3984_v2 = vshrl.u32 %v5659_v29, 16 }
 0x11d   : > { %v5736_v33 = vcombine.low %v8374_v20, %v8396_v42  ;;  %v3987_v50 = vshll.u32 %v5659_v29, 16  ;;  %v3993_v61 = vshll.u32 %v8392_v55, 16  ;;  %v2286_v18 = vrot.slane %v2285_v17, 4  ;;  %v6752_v29 = vld [vmem:[%s7039_s11 + $0x30] sm:$0xff]  }
 0x11e   : > { %v3997_v49 = vshrl.u32 %v8392_v55, 16  ;;  %v8421_v38 = vsel %vm7291_vm7, %v4434_v30, %v4435_v12  ;;  %v5721_v63 = vrot.slane %v5705_v8, 9  ;;  %v3976_v56 = vor.u32 %v3975_v22, %v8400_v62 }
 0x11f   : > { %v3979_v31 = vshll.u32 %v8406_v52, 16  ;;  %v5737_v37 = vcombine.low %v8410_v59, %v8421_v38  ;;  %v5675_v46 = vcombine.low %v3924_v9, %v3934_v19  ;;  %v3943_v28 = vrot.slane %v3942_v11, 4  ;;  %v5706_v11 = vld [vmem:[%s7039_s11 + $0x9c] sm:$0xe] }
 0x120   : > { %6337 = vmatmul.mubr.msk.bf16.gmra.mrb[16].mxu0 %vm688_vm3, %v8253_v5  ;;  %v8905_v5 = vld [vmem:[#allocation21_spill] sm:$0xff]  ;;  %v3953_v47 = vrot.slane %v3952_v6, 4  ;;  %v3967_v12 = vrot.slane %v3966_v44, 4  ;;  %v4442_v8 = vrot.slane %v8153_v3, 5  ;;  %v3986_v30 = vrot.slane %v3984_v2, 4  ;;  %v6753_v19 = vld [vmem:[%s7039_s11 + $0x3c] sm:$0xff]  }
 0x121   : > { %6185 = vmatmul.mubr.msk.bf16.vlgmr.msra.gmra.mrb[0].mxu1 %vm688_vm3, %v6750_v1  ;;  %6340 = vmatprep.mubr.msk.bf16.mxu0 %vm688_vm3, %v8255_v7  ;;  %v4439_v43 = vrot.slane %v8905_v5, 5  ;;  %v2291_v7 = vsel %vm7065_vm4, %v2286_v18, %v8907_v51  ;;  %v3989_v18 = vrot.slane %v3987_v50, 5  ;;  %v8444_v5 = vrot.slane %v3993_v61, 5 }
 0x122   : > { %6387 = vmatpush3.bf16.msra.mxu1 %v8906_v16  ;;  %6188 = vmatprep.mubr.msk.bf16.mxu1 %vm688_vm3, %v6751_v21  ;;  %v8433_v1 = vcombine.low %v2291_v7, %v2301_v41  ;;  %v8437_v21 = vld [vmem:[%s7039_s11 + $0xd4] sm:$0x1]  ;;  %v3999_v9 = vrot.slane %v3997_v49, 4  ;;  %v3977_v41 = vrot.slane %v3976_v56, 4  ;;  %v3981_v6 = vrot.slane %v3979_v31, 5 }
 0x123   : > { %v8441_v22 = vsel %vm7291_vm7, %v5721_v63, %v4439_v43  ;;  %v4441_v17 = vrot.slane %v4439_v43, 4  ;;  %v3948_v63 = vsel %vm7065_vm4, %v3943_v28, %v8341_v4  ;;  %v3958_v2 = vsel %vm7065_vm4, %v3953_v47, %v3957_v23  ;;  %v6803_v16 = vld [vmem:[%s7039_s11 + $0x1c] sm:$0xf]  ;;  %v5707_v28 = vld [vmem:[%s7039_s11 + $0xa8] sm:$0xe] }
 0x124   : > { %v4003_v50 = vshll.u32 %v8437_v21, 16  ;;  %v5722_v61 = vrot.slane %v5706_v11, 9  ;;  %v4446_v49 = vrot.slane %v8141_v25, 5  ;;  %v3972_v4 = vsel %vm7065_vm4, %v3967_v12, %v8400_v62  ;;  %v5695_v62 = vld [vmem:[%s7039_s11 + $0x18] sm:$0xe]  ;;  %v6754_v47 = vld [vmem:[%s7039_s11 + $0x48] sm:$0xff]  }
 0x125   : > { %v8450_v44 = vsel %vm7291_vm7, %v4441_v17, %v4442_v8  ;;  %v4000_v43 = vor.u32 %v3999_v9, %v8444_v5  ;;  %v4449_v23 = vrot.slane %v8186_v57, 5  ;;  %v3982_v25 = vsel %vm7065_vm4, %v3977_v41, %v3981_v6  ;;  %v6804_v11 = vld [vmem:[%s7039_s11 + $0x20] sm:$0x1] }
 0x126   : > { %v5738_v3 = vcombine.low %v8441_v22, %v8450_v44  ;;  %v4369_v56 = vrot.slane %v6803_v16, 5  ;;  %v8476_v31 = vsel %vm7291_vm7, %v5722_v61, %v4446_v49  ;;  %v4448_v51 = vrot.slane %v4446_v49, 4  ;;  %v5708_v49 = vld [vmem:[%s7039_s11 + $0xb4] sm:$0xe] }
 0x127   : > { %v5676_v7 = vcombine.low %v3948_v63, %v3958_v2  ;;  %v4001_v17 = vrot.slane %v4000_v43, 4  ;;  %v5723_v41 = vrot.slane %v5707_v28, 9  ;;  %v4453_v6 = vrot.slane %v8189_v34, 5  ;;  %v5696_v2 = vld [vmem:[%s7039_s11 + $0x24] sm:$0xe] }
 0x128   : > { %6341 = vmatmul.mubr.msk.bf16.gmra.mrb[20].mxu0 %vm688_vm3, %v8288_v24  ;;  %v3990_v24 = vor.u32 %v3989_v18, %v3986_v30  ;;  %v8481_v57 = vsel %vm7291_vm7, %v4448_v51, %v4449_v23  ;;  %v6755_v30 = vld [vmem:[%s7039_s11 + $0x54] sm:$0xff]   ;;  %v5711_v18 = vrot.slane %v5695_v62, 9  ;;  %v4371_v9 = vrot.slane %v4369_v56, 4  ;;  %v6807_v28 = vld [vmem:[%s7039_s11 + $0x2c] sm:$0x1] }
 0x129   : > { %6189 = vmatmul.mubr.msk.bf16.gmra.mrb[4].mxu1 %vm688_vm3, %v6752_v29  ;;  %6344 = vmatprep.mubr.msk.bf16.mxu0 %vm688_vm3, %v5675_v46  ;;  %v4005_v46 = vrot.slane %v4003_v50, 5  ;;  %v5677_v29 = vcombine.low %v3972_v4, %v3982_v25  ;;  %v5739_v8 = vcombine.low %v8476_v31, %v8481_v57  ;;  %v4456_v63 = vrot.slane %v8199_v48, 5  ;;  %v6805_v50 = vld [vmem:[%s7039_s11 + $0x28] sm:$0xf]  ;;  %v5697_v25 = vld [vmem:[%s7039_s11 + $0x30] sm:$0xe] }
 0x12a   : > { %6192 = vmatprep.mubr.msk.bf16.mxu1 %vm688_vm3, %v6753_v19  ;;  %v3991_v12 = vrot.slane %v3990_v24, 4  ;;  %v4372_v19 = vrot.slane %v6804_v11, 5  ;;  %v4376_v61 = vrot.slane %v6805_v50, 5  ;;  %v8504_v48 = vsel %vm7291_vm7, %v5723_v41, %v4453_v6  ;;  %v6757_v11 = vld [vmem:[%s7039_s11 + $0x6c] sm:$0xff]   ;;  %v8908_v41 = vld [vmem:[#allocation12_spill] sm:$0xff] }
 0x12b   : > { %v4006_v34 = vsel %vm7065_vm4, %v4001_v17, %v4005_v46  ;;  %v4455_v24 = vrot.slane %v4453_v6, 4  ;;  %v4370_v43 = vsel %vm7291_vm7, %v5711_v18, %v4369_v56  ;;  %v5712_v51 = vrot.slane %v5696_v2, 9  ;;  %v5709_v50 = vld [vmem:[%s7039_s11 + $0xc0] sm:$0xe]  ;;  %v6821_v31 = vld [vmem:[%s7039_s11 + $0xc8] sm:$0x1] }
 0x12c   : > { %v3996_v4 = vsel %vm7065_vm4, %v3991_v12, %v8444_v5  ;;  %v4373_v23 = vsel %vm7291_vm7, %v4371_v9, %v4372_v19  ;;  %v6806_v5 = vld [vmem:[%s7039_s11 + $0x34] sm:$0xf]  ;;  %v6756_v12 = vld [vmem:[%s7039_s11 + $0x60] sm:$0xff]   ;;  %v5713_v18 = vrot.slane %v5697_v25, 9  ;;  %v4463_v9 = vrot.slane %v8313_v35, 5 }
 0x12d   : > { %v4383_v16 = vrot.slane %v6806_v5, 5  ;;  %v8515_v62 = vsel %vm7291_vm7, %v4455_v24, %v4456_v63  ;;  %v5678_v46 = vcombine.low %v3996_v4, %v4006_v34  ;;  %v5728_v17 = vcombine.low %v4370_v43, %v4373_v23  ;;  %v5698_v24 = vld [vmem:[%s7039_s11 + $0x3c] sm:$0xe] }
 0x12e   : > { %v5740_v56 = vcombine.low %v8504_v48, %v8515_v62  ;;  %v4386_v6 = vrot.slane %v8908_v41, 5  ;;  %v4377_v35 = vsel %vm7291_vm7, %v5712_v51, %v4376_v61  ;;  %v5725_v5 = vrot.slane %v5709_v50, 9 }
 0x12f   : > { %v4385_v19 = vrot.slane %v4383_v16, 4  ;;  %v4384_v23 = vsel %vm7291_vm7, %v5713_v18, %v4383_v16  ;;  %v4470_v51 = vrot.slane %v8406_v52, 5  ;;  %v2442_v57 = vshll.u32 %v6821_v31, 16 }
 0x130   : > { %6345 = vmatmul.mubr.msk.bf16.gmra.mrb[24].mxu0 %vm688_vm3, %v5676_v7  ;;  %v5724_v7 = vrot.slane %v5708_v49, 9 }
 0x131   : > { %6193 = vmatmul.mubr.msk.bf16.gmra.mrb[8].mxu1 %vm688_vm3, %v6754_v47  ;;  %6348 = vmatprep.mubr.msk.bf16.mxu0 %vm688_vm3, %v5677_v29  ;;  %v4379_v47 = vrot.slane %v6807_v28, 5  ;;  %v4460_v29 = vrot.slane %v8264_v39, 5  ;;  %v8909_v39 = vld [vmem:[#allocation13_spill] sm:$0xff]  ;;  %v4387_v25 = vsel %vm7291_vm7, %v4385_v19, %v4386_v6  ;;  %v5714_v28 = vrot.slane %v5698_v24, 9 }
 0x132   : > { %6196 = vmatprep.mubr.msk.bf16.mxu1 %vm688_vm3, %v6755_v30  ;;  %v4378_v30 = vrot.slane %v4376_v61, 4  ;;  %v4390_v49 = vrot.slane %v8909_v39, 5  ;;  %v4467_v61 = vrot.slane %v8316_v58, 5  ;;  %v6808_v39 = vld [vmem:[%s7039_s11 + $0x70] sm:$0xf]  ;;  %v4474_v24 = vrot.slane %v8392_v55, 5 }
 0x133   : > { %v8527_v63 = vsel %vm7291_vm7, %v5724_v7, %v4460_v29  ;;  %v4462_v2 = vrot.slane %v4460_v29, 4  ;;  %v5427_v7 = vld [vmem:[%s7039_s11 + $0x6c] sm:$0xf]  ;;  %v8910_v29 = vld [vmem:[#allocation14_spill] sm:$0xff] }
 0x134   : > { %v4380_v34 = vsel %vm7291_vm7, %v4378_v30, %v4379_v47  ;;  %v4392_v47 = vrot.slane %v4390_v49, 4  ;;  %v6758_v30 = vld [vmem:[%s7039_s11 + $0x78] sm:$0xff]   ;;  %v8558_v16 = vsel %vm7291_vm7, %v5725_v5, %v4467_v61  ;;  %v4469_v18 = vrot.slane %v4467_v61, 4 }
 0x135   : > { %v8534_v4 = vsel %vm7291_vm7, %v4462_v2, %v4463_v9  ;;  %v5730_v9 = vcombine.low %v4384_v23, %v4387_v25  ;;  %v2255_v19 = vshrl.u32 %v5427_v7, 16  ;;  %v2258_v41 = vshll.u32 %v5427_v7, 16 }
 0x136   : > { %v5741_v43 = vcombine.low %v8527_v63, %v8534_v4  ;;  %v8563_v58 = vsel %vm7291_vm7, %v4469_v18, %v4470_v51  ;;  %v4391_v6 = vsel %vm7291_vm7, %v5714_v28, %v4390_v49  ;;  %v4477_v49 = vrot.slane %v8437_v21, 5  ;;  %v6760_v51 = vld [vmem:[%s7039_s11 + $0x90] sm:$0xff]   ;;  %v6761_v21 = vld [vmem:[%s7039_s11 + $0x9c] sm:$0xff]  }
 0x137   : > { %v5742_v50 = vcombine.low %v8558_v16, %v8563_v58  ;;  %v2257_v23 = vrot.slane %v2255_v19, 4  ;;  %v2260_v25 = vrot.slane %v2258_v41, 5  ;;  %v4476_v7 = vrot.slane %v4474_v24, 4 }
 0x138   : > { %6349 = vmatmul.mubr.msk.bf16.gmra.mrb[28].mxu0 %vm688_vm3, %v5678_v46  ;;  %v5729_v46 = vcombine.low %v4377_v35, %v4380_v34  ;;  %v2264_v35 = vshll.u32 %v6808_v39, 16  ;;  %v2268_v34 = vshrl.u32 %v6808_v39, 16 }
 0x139   : > { %6197 = vmatmul.mubr.msk.bf16.gmra.mrb[12].mxu1 %vm688_vm3, %v6756_v12  ;;  %6354 = vmatprep.mubr.msk.bf16.mxu0 %vm688_vm3, %v5728_v17  ;;  %v4393_v12 = vrot.slane %v8910_v29, 5  ;;  %v5710_v17 = vld [vmem:[%s7039_s11 + $0xcc] sm:$0xe]  ;;  %v8585_v55 = vsel %vm7291_vm7, %v4476_v7, %v4477_v49 }
 0x13a   : > { %6200 = vmatprep.mubr.msk.bf16.mxu1 %vm688_vm3, %v6757_v11  ;;  %v6759_v11 = vld [vmem:[%s7039_s11 + $0x84] sm:$0xff]   ;;  %v5726_v52 = vrot.slane %v5710_v17, 9  ;;  %v2270_v28 = vrot.slane %v2268_v34, 4  ;;  %v6809_v17 = vld [vmem:[%s7039_s11 + $0x74] sm:$0x1] }
 0x13b   : > { %v4394_v2 = vsel %vm7291_vm7, %v4392_v47, %v4393_v12  ;;  %v5433_v47 = vld [vmem:[%s7039_s11 + $0x84] sm:$0xf]  ;;  %v2261_v12 = vor.u32 %v2260_v25, %v2257_v23  ;;  %v6763_v34 = vld [vmem:[%s7039_s11 + $0xb4] sm:$0xff]  }
 0x13c   : > { %v8580_v5 = vsel %vm7291_vm7, %v5726_v52, %v4474_v24  ;;  %v5731_v61 = vcombine.low %v4391_v6, %v4394_v2  ;;  %v2306_v18 = vshll.u32 %v5433_v47, 16  ;;  %v5436_v6 = vld [vmem:[%s7039_s11 + $0x90] sm:$0xf]  ;;  %v6762_v2 = vld [vmem:[%s7039_s11 + $0xa8] sm:$0xff]  }
 0x13d   : > { %v5743_v29 = vcombine.low %v8580_v5, %v8585_v55  ;;  %v2262_v52 = vrot.slane %v2261_v12, 4  ;;  %v2327_v23 = vshrl.u32 %v5436_v6, 16  ;;  %v2330_v25 = vshll.u32 %v5436_v6, 16 }
 0x13e   : > { %v2360_v12 = vshll.u32 %v6812_v60, 16 }
 0x13f   : > { %v2332_v14 = vrot.slane %v2330_v25, 5  ;;  %v6815_v25 = vld [vmem:[%s7039_s11 + $0xa4] sm:$0x1] }
 0x140   : > { %6355 = vmatmul.mubr.msk.bf16.vlgmr.msra.gmra.mrb[0].mxu0 %vm688_vm3, %v5729_v46  ;;  %v2266_v46 = vrot.slane %v2264_v35, 5  ;;  %v5439_v35 = vld [vmem:[%s7039_s11 + $0x9c] sm:$0xf]  ;;  %v8627_v6 = vrot.slane %v2360_v12, 5 }
 0x141   : > { %6201 = vmatmul.mubr.msk.bf16.gmra.mrb[16].mxu1 %vm688_vm3, %v6758_v30  ;;  %6358 = vmatprep.mubr.msk.bf16.mxu0 %vm688_vm3, %v5730_v9  ;;  %v2274_v30 = vshll.u32 %v6809_v17, 16  ;;  %v2303_v9 = vshrl.u32 %v5433_v47, 16  ;;  %v2354_v47 = vshll.u32 %v5439_v35, 16  ;;  %v6813_v17 = vld [vmem:[%s7039_s11 + $0x8c] sm:$0x1] }
 0x142   : > { %6204 = vmatprep.mubr.msk.bf16.mxu1 %vm688_vm3, %v6759_v11  ;;  %v2271_v13 = vor.u32 %v2270_v28, %v2266_v46  ;;  %v6810_v11 = vld [vmem:[%s7039_s11 + $0x88] sm:$0xf]  ;;  %v2267_v7 = vsel %vm7065_vm4, %v2262_v52, %v2266_v46 }
 0x143   : > { %v2312_v19 = vshll.u32 %v6810_v11, 16  ;;  %v2316_v41 = vshrl.u32 %v6810_v11, 16  ;;  %v2276_v0 = vrot.slane %v2274_v30, 5  ;;  %v2305_v36 = vrot.slane %v2303_v9, 4 }
 0x144   : > { %v2272_v39 = vrot.slane %v2271_v13, 4  ;;  %v2322_v30 = vshll.u32 %v6813_v17, 16  ;;  %v2329_v9 = vrot.slane %v2327_v23, 4  ;;  %v2356_v11 = vrot.slane %v2354_v47, 5 }
 0x145   : > { %v8604_v24 = vrot.slane %v2312_v19, 5  ;;  %v2318_v49 = vrot.slane %v2316_v41, 4  ;;  %v6764_v19 = vld [vmem:[%s7039_s11 + $0xc0] sm:$0xff]  }
 0x146   : > { %v2277_v46 = vsel %vm7065_vm4, %v2272_v39, %v2276_v0  ;;  %v5442_v39 = vld [vmem:[%s7039_s11 + $0xa8] sm:$0xf] }
 0x147   : > { %v2319_v13 = vor.u32 %v2318_v49, %v8604_v24  ;;  %v5460_v41 = vcombine.low %v2267_v7, %v2277_v46  ;;  %v2370_v7 = vshll.u32 %v6815_v25, 16  ;;  %v2378_v45 = vshll.u32 %v5442_v39, 16 }
 0x148   : > { %6359 = vmatmul.mubr.msk.bf16.gmra.mrb[4].mxu0 %vm688_vm3, %v5731_v61  ;;  %v6811_v61 = vld [vmem:[%s7039_s11 + $0x94] sm:$0xf] }
 0x149   : > { %6205 = vmatmul.mubr.msk.bf16.gmra.mrb[20].mxu1 %vm688_vm3, %v6760_v51  ;;  %6362 = vmatprep.mubr.msk.bf16.mxu0 %vm688_vm3, %v5732_v10  ;;  %v2308_v10 = vrot.slane %v2306_v18, 5  ;;  %v2336_v51 = vshll.u32 %v6811_v61, 16  ;;  %v2340_v28 = vshrl.u32 %v6811_v61, 16  ;;  %v2320_v0 = vrot.slane %v2319_v13, 4 }
 0x14a   : > { %6208 = vmatprep.mubr.msk.bf16.mxu1 %vm688_vm3, %v6761_v21  ;;  %v2351_v21 = vshrl.u32 %v5439_v35, 16  ;;  %v6814_v35 = vld [vmem:[%s7039_s11 + $0x98] sm:$0x1]  ;;  %v2375_v61 = vshrl.u32 %v5442_v39, 16  ;;  %v5448_v39 = vld [vmem:[%s7039_s11 + $0xc0] sm:$0xf] }
 0x14b   : > { %v2309_v15 = vor.u32 %v2308_v10, %v2305_v36  ;;  %v8624_v26 = vrot.slane %v2336_v51, 5  ;;  %v2324_v36 = vrot.slane %v2322_v30, 5  ;;  %v2333_v10 = vor.u32 %v2332_v14, %v2329_v9  ;;  %v5445_v51 = vld [vmem:[%s7039_s11 + $0xb4] sm:$0xf] }
 0x14c   : > { %v2353_v18 = vrot.slane %v2351_v21, 4  ;;  %v2388_v21 = vshrl.u32 %v6816_v27, 16  ;;  %v2399_v20 = vshrl.u32 %v5445_v51, 16  ;;  %v2402_v42 = vshll.u32 %v5445_v51, 16 }
 0x14d   : > { %v2310_v52 = vrot.slane %v2309_v15, 4  ;;  %v2325_v46 = vsel %vm7065_vm4, %v2320_v0, %v2324_v36  ;;  %v2334_v15 = vrot.slane %v2333_v10, 4  ;;  %v2372_v30 = vrot.slane %v2370_v7, 5 }
 0x14e   : > { %v2357_v23 = vor.u32 %v2356_v11, %v2353_v18  ;;  %v2377_v9 = vrot.slane %v2375_v61, 4  ;;  %v2390_v11 = vrot.slane %v2388_v21, 4  ;;  %v6820_v61 = vld [vmem:[%s7039_s11 + $0xbc] sm:$0x1] }
 0x14f   : > { %v2315_v47 = vsel %vm7065_vm4, %v2310_v52, %v8604_v24  ;;  %v2339_v0 = vsel %vm7065_vm4, %v2334_v15, %v8624_v26  ;;  %v2418_v22 = vshll.u32 %v6820_v61, 16 }
 0x150   : > { %6363 = vmatmul.mubr.msk.bf16.gmra.mrb[8].mxu0 %vm688_vm3, %v5733_v40  ;;  %v2364_v40 = vshrl.u32 %v6812_v60, 16  ;;  %v2358_v17 = vrot.slane %v2357_v23, 4  ;;  %v5462_v24 = vcombine.low %v2315_v47, %v2325_v46 }
 0x151   : > { %6209 = vmatmul.mubr.msk.bf16.gmra.mrb[24].mxu1 %vm688_vm3, %v6762_v2  ;;  %6366 = vmatprep.mubr.msk.bf16.mxu0 %vm688_vm3, %v5734_v54  ;;  %v2342_v54 = vrot.slane %v2340_v28, 4 }
 0x152   : > { %6212 = vmatprep.mubr.msk.bf16.mxu1 %vm688_vm3, %v6763_v34  ;;  %v2366_v2 = vrot.slane %v2364_v40, 4  ;;  %v2346_v34 = vshll.u32 %v6814_v35, 16  ;;  %v2363_v10 = vsel %vm7065_vm4, %v2358_v17, %v8627_v6  ;;  %v2444_v17 = vrot.slane %v2442_v57, 5 }
 0x153   : > { %v2343_v49 = vor.u32 %v2342_v54, %v8624_v26  ;;  %v2380_v54 = vrot.slane %v2378_v45, 5  ;;  %v6818_v26 = vld [vmem:[%s7039_s11 + $0xb0] sm:$0x1] }
 0x154   : > { %v2367_v28 = vor.u32 %v2366_v2, %v8627_v6  ;;  %v2348_v60 = vrot.slane %v2346_v34, 5  ;;  %v2394_v35 = vshll.u32 %v6818_v26, 16  ;;  %v2423_v34 = vshrl.u32 %v5448_v39, 16 }
 0x155   : > { %v2344_v13 = vrot.slane %v2343_v49, 4  ;;  %v2381_v38 = vor.u32 %v2380_v54, %v2377_v9  ;;  %v2426_v6 = vshll.u32 %v5448_v39, 16  ;;  %v6819_v49 = vld [vmem:[%s7039_s11 + $0xc4] sm:$0xf] }
 0x156   : > { %v2368_v14 = vrot.slane %v2367_v28, 4  ;;  %v2432_v23 = vshll.u32 %v6819_v49, 16  ;;  %v2436_v25 = vshrl.u32 %v6819_v49, 16  ;;  %v2396_v45 = vrot.slane %v2394_v35, 5 }
 0x157   : > { %v2349_v36 = vsel %vm7065_vm4, %v2344_v13, %v2348_v60  ;;  %v2382_v51 = vrot.slane %v2381_v38, 4  ;;  %v2420_v60 = vrot.slane %v2418_v22, 5 }
 0x158   : > { %6367 = vmatmul.mubr.msk.bf16.gmra.mrb[12].mxu0 %vm688_vm3, %v5735_v53  ;;  %v2384_v53 = vshll.u32 %v6816_v27, 16  ;;  %v2373_v59 = vsel %vm7065_vm4, %v2368_v14, %v2372_v30  ;;  %v5463_v44 = vcombine.low %v2339_v0, %v2349_v36  ;;  %v2425_v27 = vrot.slane %v2423_v34, 4 }
 0x159   : > { %6213 = vmatmul.mubr.msk.bf16.gmra.mrb[28].mxu1 %vm688_vm3, %v6764_v19  ;;  %6370 = vmatprep.mubr.msk.bf16.mxu0 %vm688_vm3, %v5736_v33  ;;  %v6817_v33 = vld [vmem:[%s7039_s11 + $0xb8] sm:$0xf]  ;;  %v2401_v19 = vrot.slane %v2399_v20, 4  ;;  %v2434_v21 = vrot.slane %v2432_v23, 5  ;;  %v2438_v47 = vrot.slane %v2436_v25, 4  ;;  %s8729_s11 = scalar_lea.vmem [#allocation2], %s5221_s10 }
 0x15a   : > { %6234 = vmatprep.mubr.msk.bf16.mxu1 %vm688_vm3, %v5460_v41  ;;  %v2408_v12 = vshll.u32 %v6817_v33, 16  ;;  %v2412_v40 = vshrl.u32 %v6817_v33, 16  ;;  %v2386_v18 = vrot.slane %v2384_v53, 5  ;;  %v2404_v41 = vrot.slane %v2402_v42, 5  ;;  %s5063_s19 = sshll.u32 %s8729_s11, 4  ;;  %s8757_s19 = int_to_ptr.vmem [resolvable:$true] %s5063_s19 }
 0x15b   : > { %v2428_v53 = vrot.slane %v2426_v6, 5  ;;  %s6822_s28 = scalar_lea.vmem %s8757_s19, 2048  ;;  %p6829_p1 = scmp.lt.s32.totalorder %s8757_s19, %s6827_s30 }
 0x15c   : > { %v2410_v52 = vrot.slane %v2408_v12, 5  ;;  %v2414_v2 = vrot.slane %v2412_v40, 4  ;;  %v2387_v20 = vsel %vm7065_vm4, %v2382_v51, %v2386_v18  ;;  %v2439_v12 = vor.u32 %v2438_v47, %v2434_v21  ;;  %p6823_p12 = scmp.ne.s32.totalorder %s8757_s19, %s6822_s28  ;;  %p6830_p2 = scmp.lt.s32.totalorder %s6828_s4, %s6822_s28 }
 0x15d   : > { %v2429_v33 = vor.u32 %v2428_v53, %v2425_v27 }
 0x15e   : > { %v2415_v7 = vor.u32 %v2414_v2, %v2410_v52  ;;  %v2440_v13 = vrot.slane %v2439_v12, 4  ;;  %p6824_p13 = pnand %p6823_p12, %p6998_p4  ;;  %p6831_p3 = por %p6830_p2, %p6829_p1 }
 0x15f   : > { %v2430_v40 = vrot.slane %v2429_v33, 4 }
 0x160   : > { %6371 = vmatmul.mubr.msk.bf16.gmra.mrb[16].mxu0 %vm688_vm3, %v5737_v37  ;;  %v2391_v37 = vor.u32 %v2390_v11, %v2386_v18  ;;  %v2416_v15 = vrot.slane %v2415_v7, 4  ;;  %v2445_v9 = vsel %vm7065_vm4, %v2440_v13, %v2444_v17  ;;  %p6825_p0 = pneg %p6824_p13 }
 0x161   : > { %6235 = vmatmul.mubr.msk.bf16.vlgmr.msra.gmra.mrb[16].mxu1 %vm688_vm3, %v8433_v1  ;;  %6374 = vmatprep.mubr.msk.bf16.mxu0 %vm688_vm3, %v5738_v3  ;;  %v2405_v1 = vor.u32 %v2404_v41, %v2401_v19  ;;  %v5464_v3 = vcombine.low %v2363_v10, %v2373_v59  ;;  %v2435_v30 = vsel %vm7065_vm4, %v2430_v40, %v2434_v21 }
 0x162   : > { %6238 = vmatprep.mubr.msk.bf16.mxu1 %vm688_vm3, %v5462_v24  ;;  %v2392_v28 = vrot.slane %v2391_v37, 4  ;;  %v2421_v48 = vsel %vm7065_vm4, %v2416_v15, %v2420_v60  ;;  %v5467_v14 = vcombine.low %v2435_v30, %v2445_v9  ;;  %p6832_p5 = pnand %p6831_p3, %p6825_p0 }
 0x163   : > { %v2406_v46 = vrot.slane %v2405_v1, 4 }
 0x164   : > { %v2397_v42 = vsel %vm7065_vm4, %v2392_v28, %v2396_v45 }
 0x165   : > { %v5465_v62 = vcombine.low %v2387_v20, %v2397_v42 }
 0x168   : > { %6375 = vmatmul.mubr.msk.bf16.gmra.mrb[20].mxu0 %vm688_vm3, %v5739_v8  ;;  %v2411_v8 = vsel %vm7065_vm4, %v2406_v46, %v2410_v52 }
 0x169   : > { %6239 = vmatmul.mubr.msk.bf16.gmra.mrb[20].mxu1 %vm688_vm3, %v5463_v44  ;;  %6378 = vmatprep.mubr.msk.bf16.mxu0 %vm688_vm3, %v5740_v56  ;;  %v5466_v56 = vcombine.low %v2411_v8, %v2421_v48 }
 0x16a   : > { %6242 = vmatprep.mubr.msk.bf16.mxu1 %vm688_vm3, %v5464_v3 }
 0x170   : > { %6379 = vmatmul.mubr.msk.bf16.gmra.mrb[24].mxu0 %vm688_vm3, %v5741_v43 }
 0x171   : > { %6243 = vmatmul.mubr.msk.bf16.gmra.mrb[24].mxu1 %vm688_vm3, %v5465_v62  ;;  %6382 = vmatprep.mubr.msk.bf16.mxu0 %vm688_vm3, %v5742_v50 }
 0x172   : > { %6246 = vmatprep.mubr.msk.bf16.mxu1 %vm688_vm3, %v5466_v56 }
 0x178   : > { %6383 = vmatmul.mubr.msk.bf16.gmra.mrb[28].mxu0 %vm688_vm3, %v5743_v29 }
 0x179   : > { %6247 = vmatmul.mubr.msk.bf16.gmra.mrb[28].mxu1 %vm688_vm3, %v5467_v14 }
 0x1f4   : > { %v6186_v63 = vpop.f32.mrb[0].mxu1 }
 0x1f5   : > { %v1855_v4 = vpop.f32.mrb[1].mxu1 }
 0x1f6   : > { %v6187_v43 = vpop.f32.mrb[2].mxu1 }
 0x1f7   : > { %v1858_v16 = vpop.f32.mrb[3].mxu1 }
 0x1fc   : > { %v6190_v58 = vpop.f32.mrb[4].mxu1 }
 0x1fd   : > { %v1871_v50 = vpop.f32.mrb[5].mxu1 }
 0x1fe   : > { %v6191_v54 = vpop.f32.mrb[6].mxu1 }
 0x1ff   : > { %v1874_v18 = vpop.f32.mrb[7].mxu1 }
 0x204   : > { %v6194_v11 = vpop.f32.mrb[8].mxu1 }
 0x205   : > { %v1887_v32 = vpop.f32.mrb[9].mxu1 }
 0x206   : > { %v6195_v24 = vpop.f32.mrb[10].mxu1 }
 0x207   : > { %v8715_v19 = vpop.f32.mrb[11].mxu1 }
 0x20c   : > { %v8717_v41 = vpop.f32.mrb[12].mxu1 }
 0x20d   : > { %v8719_v5 = vpop.f32.mrb[13].mxu1 }
 0x20e   : > { %v8721_v55 = vpop.f32.mrb[14].mxu1 }
 0x20f   : > { %v8723_v29 = vpop.f32.mrb[15].mxu1 }
 0x213   : > { %v6356_v52 = vpop.f32.mrb[0].mxu0 }
 0x214   : > { %v6388_v2 = vadd.f32 %v6356_v52, %v6186_v63  ;;  %v4616_v39 = vpop.f32.mrb[1].mxu0 }
 0x215   : > { %v6389_v0 = vadd.f32 %v4616_v39, %v1855_v4  ;;  %v6357_v36 = vpop.f32.mrb[2].mxu0 }
 0x216   : > { %v6390_v10 = vadd.f32 %v6357_v36, %v6187_v43  ;;  %v4619_v59 = vpop.f32.mrb[3].mxu0  ;;  %v4815_v49 = vmul.f32 %v6388_v2, %v6388_v2 }
 0x217   : > { %v6391_v38 = vadd.f32 %v4619_v59, %v1858_v16  ;;  %v4813_v26 = vmul.f32 %v6389_v0, %v6389_v0 }
 0x218   : > { %v5840_v37 = vpack.c.bf16 %v6390_v10, %v6388_v2  ;;  %v4816_v22 = vmul.f32 %v6390_v10, %v6390_v10 }
 0x219   : > { %v4775_v35 = vadd.f32 %v6391_v38, %v6389_v0  ;;  %v4814_v34 = vmul.f32 %v6391_v38, %v6391_v38  ;;  %v5835_v6 = vpack.c.bf16 %v6391_v38, %v6389_v0 }
 0x21a   : > { %5912 = vst [vmem:[%s8729_s11 + $0x8] sm:$0xff] %v5840_v37  }
 0x21b   : > { %v4776_v23 = vadd.f32 %v6388_v2, %v4775_v35  ;;  %v4845_v25 = vadd.f32 %v4814_v34, %v4813_v26  ;;  %5836 = vst [vmem:[%s8729_s11] sm:$0xff] %v5835_v6   ;;  %v6360_v1 = vpop.f32.mrb[4].mxu0 }
 0x21c   : > { %v6392_v7 = vadd.f32 %v6360_v1, %v6190_v58  ;;  %v4632_v61 = vpop.f32.mrb[5].mxu0 }
 0x21d   : > { %v4846_v44 = vadd.f32 %v4845_v25, %v4815_v49  ;;  %v6393_v3 = vadd.f32 %v4632_v61, %v1871_v50  ;;  %v4777_v51 = vadd.f32 %v6390_v10, %v4776_v23  ;;  %v6361_v28 = vpop.f32.mrb[6].mxu0 }
 0x21e   : > { %v6394_v45 = vadd.f32 %v6361_v28, %v6191_v54  ;;  %v4635_v27 = vpop.f32.mrb[7].mxu0  ;;  %v4819_v12 = vmul.f32 %v6392_v7, %v6392_v7 }
 0x21f   : > { %v4778_v53 = vadd.f32 %v6393_v3, %v4777_v51  ;;  %v4817_v21 = vmul.f32 %v6393_v3, %v6393_v3  ;;  %v4847_v47 = vadd.f32 %v4846_v44, %v4816_v22  ;;  %v6395_v46 = vadd.f32 %v4635_v27, %v1874_v18 }
 0x220   : > { %v5850_v15 = vpack.c.bf16 %v6394_v45, %v6392_v7  ;;  %v4820_v56 = vmul.f32 %v6394_v45, %v6394_v45 }
 0x221   : > { %v4848_v60 = vadd.f32 %v4847_v47, %v4817_v21  ;;  %v4779_v20 = vadd.f32 %v6395_v46, %v4778_v53  ;;  %v4818_v42 = vmul.f32 %v6395_v46, %v6395_v46  ;;  %v5845_v33 = vpack.c.bf16 %v6395_v46, %v6393_v3 }
 0x222   : > { %5914 = vst [vmem:[%s8729_s11 + $0x18] sm:$0xff] %v5850_v15  }
 0x223   : > { %v4780_v31 = vadd.f32 %v6392_v7, %v4779_v20  ;;  %v4849_v57 = vadd.f32 %v4848_v60, %v4818_v42  ;;  %5913 = vst [vmem:[%s8729_s11 + $0x10] sm:$0xff] %v5845_v33   ;;  %v6364_v8 = vpop.f32.mrb[8].mxu0 }
 0x224   : > { %v6396_v48 = vadd.f32 %v6364_v8, %v6194_v11  ;;  %v4648_v62 = vpop.f32.mrb[9].mxu0 }
 0x225   : > { %v4850_v40 = vadd.f32 %v4849_v57, %v4819_v12  ;;  %v6397_v13 = vadd.f32 %v4648_v62, %v1887_v32  ;;  %v4781_v17 = vadd.f32 %v6394_v45, %v4780_v31  ;;  %v6365_v30 = vpop.f32.mrb[10].mxu0 }
 0x226   : > { %v6398_v9 = vadd.f32 %v6365_v30, %v6195_v24  ;;  %v4651_v14 = vpop.f32.mrb[11].mxu0  ;;  %v4823_v52 = vmul.f32 %v6396_v48, %v6396_v48 }
 0x227   : > { %v4782_v63 = vadd.f32 %v6397_v13, %v4781_v17  ;;  %v4821_v4 = vmul.f32 %v6397_v13, %v6397_v13  ;;  %v4851_v43 = vadd.f32 %v4850_v40, %v4820_v56  ;;  %v6399_v16 = vadd.f32 %v4651_v14, %v8715_v19 }
 0x228   : > { %v5860_v58 = vpack.c.bf16 %v6398_v9, %v6396_v48  ;;  %v4824_v36 = vmul.f32 %v6398_v9, %v6398_v9 }
 0x229   : > { %v4852_v50 = vadd.f32 %v4851_v43, %v4821_v4  ;;  %v4783_v54 = vadd.f32 %v6399_v16, %v4782_v63  ;;  %v4822_v18 = vmul.f32 %v6399_v16, %v6399_v16  ;;  %v5855_v11 = vpack.c.bf16 %v6399_v16, %v6397_v13 }
 0x22a   : > { %5916 = vst [vmem:[%s8729_s11 + $0x28] sm:$0xff] %v5860_v58  }
 0x22b   : > { %v4784_v2 = vadd.f32 %v6396_v48, %v4783_v54  ;;  %v4853_v39 = vadd.f32 %v4852_v50, %v4822_v18  ;;  %5915 = vst [vmem:[%s8729_s11 + $0x20] sm:$0xff] %v5855_v11   ;;  %v6368_v32 = vpop.f32.mrb[12].mxu0 }
 0x22c   : > { %v6400_v0 = vadd.f32 %v6368_v32, %v8717_v41  ;;  %v4664_v24 = vpop.f32.mrb[13].mxu0 }
 0x22d   : > { %v4854_v10 = vadd.f32 %v4853_v39, %v4823_v52  ;;  %v6401_v59 = vadd.f32 %v4664_v24, %v8719_v5  ;;  %v4785_v19 = vadd.f32 %v6398_v9, %v4784_v2  ;;  %v6369_v38 = vpop.f32.mrb[14].mxu0 }
 0x22e   : > { %v6402_v37 = vadd.f32 %v6369_v38, %v8721_v55  ;;  %v4667_v26 = vpop.f32.mrb[15].mxu0  ;;  %v4827_v61 = vmul.f32 %v6400_v0, %v6400_v0 }
 0x22f   : > { %v4786_v35 = vadd.f32 %v6401_v59, %v4785_v19  ;;  %v4825_v34 = vmul.f32 %v6401_v59, %v6401_v59  ;;  %v4855_v6 = vadd.f32 %v4854_v10, %v4824_v36  ;;  %v6403_v49 = vadd.f32 %v4667_v26, %v8723_v29 }
 0x230   : > { %v5870_v23 = vpack.c.bf16 %v6402_v37, %v6400_v0  ;;  %v4828_v55 = vmul.f32 %v6402_v37, %v6402_v37 }
 0x231   : > { %v4856_v25 = vadd.f32 %v4855_v6, %v4825_v34  ;;  %v4787_v41 = vadd.f32 %v6403_v49, %v4786_v35  ;;  %v4826_v1 = vmul.f32 %v6403_v49, %v6403_v49  ;;  %v5865_v7 = vpack.c.bf16 %v6403_v49, %v6401_v59 }
 0x232   : > { %5918 = vst [vmem:[%s8729_s11 + $0x38] sm:$0xff] %v5870_v23  }
 0x233   : > { %v4788_v22 = vadd.f32 %v6400_v0, %v4787_v41  ;;  %v4857_v5 = vadd.f32 %v4856_v25, %v4826_v1  ;;  %5917 = vst [vmem:[%s8729_s11 + $0x30] sm:$0xff] %v5865_v7   ;;  %v6372_v44 = vpop.f32.mrb[16].mxu0 }
 0x234   : > { %v6236_v3 = vpop.f32.mrb[16].mxu1  ;;  %v4680_v51 = vpop.f32.mrb[17].mxu0 }
 0x235   : > { %v4858_v28 = vadd.f32 %v4857_v5, %v4827_v61  ;;  %v6404_v45 = vadd.f32 %v6372_v44, %v6236_v3  ;;  %v2647_v27 = vpop.f32.mrb[17].mxu1  ;;  %v4789_v53 = vadd.f32 %v6402_v37, %v4788_v22  ;;  %v6373_v29 = vpop.f32.mrb[18].mxu0 }
 0x236   : > { %v6405_v21 = vadd.f32 %v4680_v51, %v2647_v27  ;;  %v6237_v47 = vpop.f32.mrb[18].mxu1  ;;  %v4683_v46 = vpop.f32.mrb[19].mxu0 }
 0x237   : > { %v4859_v15 = vadd.f32 %v4858_v28, %v4828_v55  ;;  %v6406_v60 = vadd.f32 %v6373_v29, %v6237_v47  ;;  %v2650_v20 = vpop.f32.mrb[19].mxu1  ;;  %v4831_v40 = vmul.f32 %v6404_v45, %v6404_v45 }
 0x238   : > { %v4790_v42 = vadd.f32 %v6405_v21, %v4789_v53  ;;  %v4829_v33 = vmul.f32 %v6405_v21, %v6405_v21  ;;  %v6407_v12 = vadd.f32 %v4683_v46, %v2650_v20 }
 0x239   : > { %v5880_v31 = vpack.c.bf16 %v6406_v60, %v6404_v45  ;;  %v4832_v43 = vmul.f32 %v6406_v60, %v6406_v60 }
 0x23a   : > { %v4860_v57 = vadd.f32 %v4859_v15, %v4829_v33  ;;  %v4791_v8 = vadd.f32 %v6407_v12, %v4790_v42  ;;  %v4830_v48 = vmul.f32 %v6407_v12, %v6407_v12  ;;  %v5875_v62 = vpack.c.bf16 %v6407_v12, %v6405_v21 }
 0x23b   : > { %5920 = vst [vmem:[%s8729_s11 + $0x48] sm:$0xff] %v5880_v31   ;;  %v6376_v56 = vpop.f32.mrb[20].mxu0 }
 0x23c   : > { %v4792_v13 = vadd.f32 %v6404_v45, %v4791_v8  ;;  %v4861_v17 = vadd.f32 %v4860_v57, %v4830_v48  ;;  %5919 = vst [vmem:[%s8729_s11 + $0x40] sm:$0xff] %v5875_v62   ;;  %v6240_v30 = vpop.f32.mrb[20].mxu1  ;;  %v4696_v9 = vpop.f32.mrb[21].mxu0 }
 0x23d   : > { %v6408_v14 = vadd.f32 %v6376_v56, %v6240_v30  ;;  %v2663_v63 = vpop.f32.mrb[21].mxu1  ;;  %v6377_v4 = vpop.f32.mrb[22].mxu0 }
 0x23e   : > { %v4862_v16 = vadd.f32 %v4861_v17, %v4831_v40  ;;  %v6409_v58 = vadd.f32 %v4696_v9, %v2663_v63  ;;  %v4793_v50 = vadd.f32 %v6406_v60, %v4792_v13  ;;  %v6241_v54 = vpop.f32.mrb[22].mxu1  ;;  %v4699_v18 = vpop.f32.mrb[23].mxu0 }
 0x23f   : > { %v6410_v11 = vadd.f32 %v6377_v4, %v6241_v54  ;;  %v2666_v52 = vpop.f32.mrb[23].mxu1  ;;  %v4835_v37 = vmul.f32 %v6408_v14, %v6408_v14 }
 0x240   : > { %v4794_v2 = vadd.f32 %v6409_v58, %v4793_v50  ;;  %v4833_v39 = vmul.f32 %v6409_v58, %v6409_v58  ;;  %v4863_v32 = vadd.f32 %v4862_v16, %v4832_v43  ;;  %v6411_v0 = vadd.f32 %v4699_v18, %v2666_v52 }
 0x241   : > { %v5890_v24 = vpack.c.bf16 %v6410_v11, %v6408_v14  ;;  %v4836_v41 = vmul.f32 %v6410_v11, %v6410_v11 }
 0x242   : > { %v4864_v36 = vadd.f32 %v4863_v32, %v4833_v39  ;;  %v4795_v10 = vadd.f32 %v6411_v0, %v4794_v2  ;;  %v4834_v59 = vmul.f32 %v6411_v0, %v6411_v0  ;;  %v5885_v19 = vpack.c.bf16 %v6411_v0, %v6409_v58 }
 0x243   : > { %5922 = vst [vmem:[%s8729_s11 + $0x58] sm:$0xff] %v5890_v24   ;;  %v6380_v38 = vpop.f32.mrb[24].mxu0 }
 0x244   : > { %v4796_v26 = vadd.f32 %v6408_v14, %v4795_v10  ;;  %v4865_v35 = vadd.f32 %v4864_v36, %v4834_v59  ;;  %5921 = vst [vmem:[%s8729_s11 + $0x50] sm:$0xff] %v5885_v19   ;;  %v6244_v34 = vpop.f32.mrb[24].mxu1  ;;  %v4712_v6 = vpop.f32.mrb[25].mxu0 }
 0x245   : > { %v6412_v49 = vadd.f32 %v6380_v38, %v6244_v34  ;;  %v2679_v23 = vpop.f32.mrb[25].mxu1  ;;  %v6381_v25 = vpop.f32.mrb[26].mxu0 }
 0x246   : > { %v4866_v1 = vadd.f32 %v4865_v35, %v4835_v37  ;;  %v6413_v7 = vadd.f32 %v4712_v6, %v2679_v23  ;;  %v4797_v61 = vadd.f32 %v6410_v11, %v4796_v26  ;;  %v6245_v22 = vpop.f32.mrb[26].mxu1  ;;  %v4715_v5 = vpop.f32.mrb[27].mxu0 }
 0x247   : > { %v6414_v44 = vadd.f32 %v6381_v25, %v6245_v22  ;;  %v2682_v3 = vpop.f32.mrb[27].mxu1  ;;  %v4839_v15 = vmul.f32 %v6412_v49, %v6412_v49 }
 0x248   : > { %v4798_v51 = vadd.f32 %v6413_v7, %v4797_v61  ;;  %v4837_v55 = vmul.f32 %v6413_v7, %v6413_v7  ;;  %v4867_v28 = vadd.f32 %v4866_v1, %v4836_v41  ;;  %v6415_v45 = vadd.f32 %v4715_v5, %v2682_v3 }
 0x249   : > { %v5900_v27 = vpack.c.bf16 %v6414_v44, %v6412_v49  ;;  %v4840_v8 = vmul.f32 %v6414_v44, %v6414_v44 }
 0x24a   : > { %v4868_v53 = vadd.f32 %v4867_v28, %v4837_v55  ;;  %v4799_v29 = vadd.f32 %v6415_v45, %v4798_v51  ;;  %v4838_v21 = vmul.f32 %v6415_v45, %v6415_v45  ;;  %v5895_v47 = vpack.c.bf16 %v6415_v45, %v6413_v7 }
 0x24b   : > { %5924 = vst [vmem:[%s8729_s11 + $0x68] sm:$0xff] %v5900_v27   ;;  %v6384_v46 = vpop.f32.mrb[28].mxu0 }
 0x24c   : > { %v4800_v60 = vadd.f32 %v6412_v49, %v4799_v29  ;;  %v4869_v20 = vadd.f32 %v4868_v53, %v4838_v21  ;;  %5923 = vst [vmem:[%s8729_s11 + $0x60] sm:$0xff] %v5895_v47   ;;  %v6248_v42 = vpop.f32.mrb[28].mxu1  ;;  %v4728_v33 = vpop.f32.mrb[29].mxu0 }
 0x24d   : > { %v6416_v12 = vadd.f32 %v6384_v46, %v6248_v42  ;;  %v2695_v31 = vpop.f32.mrb[29].mxu1  ;;  %v6385_v57 = vpop.f32.mrb[30].mxu0 }
 0x24e   : > { %v4870_v48 = vadd.f32 %v4869_v20, %v4839_v15  ;;  %v6417_v62 = vadd.f32 %v4728_v33, %v2695_v31  ;;  %v4801_v56 = vadd.f32 %v6414_v44, %v4800_v60  ;;  %v6249_v40 = vpop.f32.mrb[30].mxu1  ;;  %v4731_v13 = vpop.f32.mrb[31].mxu0 }
 0x24f   : > { %v6418_v17 = vadd.f32 %v6385_v57, %v6249_v40  ;;  %v2698_v30 = vpop.f32.mrb[31].mxu1  ;;  %v4843_v18 = vmul.f32 %v6416_v12, %v6416_v12 }
 0x250   : > { %v4802_v9 = vadd.f32 %v6417_v62, %v4801_v56  ;;  %v4841_v14 = vmul.f32 %v6417_v62, %v6417_v62  ;;  %v4871_v63 = vadd.f32 %v4870_v48, %v4840_v8  ;;  %v6419_v4 = vadd.f32 %v4731_v13, %v2698_v30 }
 0x251   : > { %v5910_v43 = vpack.c.bf16 %v6418_v17, %v6416_v12 }
 0x252   : > { %v4872_v16 = vadd.f32 %v4871_v63, %v4841_v14  ;;  %v4803_v58 = vadd.f32 %v6419_v4, %v4802_v9  ;;  %v4842_v50 = vmul.f32 %v6419_v4, %v6419_v4  ;;  %v5905_v54 = vpack.c.bf16 %v6419_v4, %v6417_v62 }
 0x253   : > { %5926 = vst [vmem:[%s8729_s11 + $0x78] sm:$0xff] %v5910_v43  }
 0x254   : > { %v4804_v11 = vadd.f32 %v6416_v12, %v4803_v58  ;;  %v4873_v52 = vadd.f32 %v4872_v16, %v4842_v50  ;;  %5925 = vst [vmem:[%s8729_s11 + $0x70] sm:$0xff] %v5905_v54  }
 0x255   : > { %6835 = shalt.err (!%p6832_p5)
}
 0x256   : > { %s6836_s5 = scalar_lea.hbm %s8755_s26, 2048  ;;  %s6840_s8 = scalar_lea.hbm %s8840_s2, 4096 }
 0x257   : > { %p6837_p6 = scmp.ne.s32.totalorder %s8755_s26, %s6836_s5  ;;  %p6841_p10 = scmp.lt.u32.totalorder %s8755_s26, %s8840_s2 }
 0x258   : > { %p6842_p11 = scmp.lt.u32.totalorder %s6840_s8, %s6836_s5  ;;  %p6844_p13 = scmp.lt.u32.totalorder %s6836_s5, %s8755_s26 }
 0x259   : > { %p6838_p7 = pnand %p6837_p6, %p6998_p4 }
 0x25a   : > { %p6843_p12 = por %p6842_p11, %p6841_p10 }
 0x25b   : > { %p6839_p9 = pneg %p6838_p7 }
 0x25c   : > { %p6845_p0 = por %p6844_p13, %p6843_p12 }
 0x25e   : > { %p6846_p1 = pnand %p6845_p0, %p6839_p9 }
 0x260   : > { %6849 = shalt.err (!%p6846_p1)
}
 0x261   : > { %s6935_s18 = smov 64   ;;  %s6936_s21 = smov 4   ;;  %v4844_v2 = vmul.f32 %v6418_v17, %v6418_v17  ;;  %v4805_v39 = vadd.f32 %v6418_v17, %v4804_v11  ;;  %v4874_v32 = vadd.f32 %v4873_v52, %v4843_v18 }
 0x262   : > { %6655 = dma.vmem_to_hbm [thread:$0]  (%p6998_p4), %s8757_s19, 2048, %s8755_s26, %s5044_s27, %s6935_s18, %s6935_s18, %s6936_s21  }
 0x263   : > { %v4806_v0 = vrot.slane %v4805_v39, 4  ;;  %v4875_v24 = vadd.f32 %v4874_v32, %v4844_v2  ;;  %s5222_s23 = sshll.u32 %s8726_s9, 1  ;;  %s5796_s28 = sshll.u32 %s6924_s15, 5 }
 0x264   : > { %s190_s29 = scalar_lea.vmem [#allocation4], %s5222_s23  ;;  %s8790_s27 = scalar_lea.hbm %s8841_s3, %s5796_s28 }
 0x265   : > { %v4807_v36 = vadd.f32 %v4806_v0, %v4805_v39  ;;  %v4876_v10 = vrot.slane %v4875_v24, 4  ;;  %s5080_s30 = sshll.u32 %s190_s29, 4  ;;  %s5049_s4 = scalar_lea.sflag [#allocation5], %s8726_s9  ;;  %s8792_s30 = int_to_ptr.vmem [resolvable:$true] %s5080_s30 }
 0x266   : > { %s6850_s5 = scalar_lea.vmem %s8792_s30, 32  ;;  %s6937_s15 = smov [#allocation4]  }
 0x267   : > { %v4808_v59 = vrot.slane %v4807_v36, 2  ;;  %v4877_v19 = vadd.f32 %v4876_v10, %v4875_v24  ;;  %p6851_p2 = scmp.ne.s32.totalorder %s8792_s30, %s6850_s5  ;;  %s6854_s6 = sshll.u32 %s6937_s15, 4  ;;  %s6855_s6 = int_to_ptr.vmem [resolvable:$false] %s6854_s6 }
 0x268   : > { %s6856_s7 = scalar_lea.vmem %s6855_s6, 64  ;;  %p6857_p6 = scmp.lt.s32.totalorder %s8792_s30, %s6855_s6 }
 0x269   : > { %v4809_v38 = vadd.f32 %v4808_v59, %v4807_v36  ;;  %v4878_v37 = vrot.slane %v4877_v19, 2  ;;  %p6852_p3 = pnand %p6851_p2, %p6998_p4  ;;  %p6858_p7 = scmp.lt.s32.totalorder %s6856_s7, %s6850_s5 }
 0x26b   : > { %v4810_v26 = vrot.slane %v4809_v38, 1  ;;  %v4879_v35 = vadd.f32 %v4878_v37, %v4877_v19  ;;  %p6853_p5 = pneg %p6852_p3  ;;  %p6859_p9 = por %p6858_p7, %p6857_p6 }
 0x26d   : > { %v4811_v34 = vadd.f32 %v4810_v26, %v4809_v38  ;;  %v4880_v6 = vrot.slane %v4879_v35, 1  ;;  %p6860_p10 = pnand %p6859_p9, %p6853_p5 }
 0x26f   : > { %4812 = vst [vmem:[%s190_s29] sm:$0x1] %v4811_v34  ;;  %v4881_v49 = vadd.f32 %v4880_v6, %v4879_v35 }
 0x271   : > { %4882 = vst [vmem:[%s190_s29 + $0x1] sm:$0x1] %v4881_v49 }
 0x272   : > { %6863 = shalt.err (!%p6860_p10)
}
 0x273   : > { %s6864_s9 = scalar_lea.hbm %s8790_s27, 32  ;;  %s6868_s11 = scalar_lea.hbm %s8841_s3, 64 }
 0x274   : > { %p6865_p11 = scmp.ne.s32.totalorder %s8790_s27, %s6864_s9  ;;  %p6869_p0 = scmp.lt.u32.totalorder %s8790_s27, %s8841_s3 }
 0x275   : > { %p6870_p1 = scmp.lt.u32.totalorder %s6868_s11, %s6864_s9  ;;  %p6872_p3 = scmp.lt.u32.totalorder %s6864_s9, %s8790_s27 }
 0x276   : > { %p6866_p12 = pnand %p6865_p11, %p6998_p4 }
 0x277   : > { %p6871_p2 = por %p6870_p1, %p6869_p0 }
 0x278   : > { %p6867_p13 = pneg %p6866_p12 }
 0x279   : > { %p6873_p5 = por %p6872_p3, %p6871_p2 }
 0x27b   : > { %p6874_p6 = pnand %p6873_p5, %p6867_p13 }
 0x27d   : > { %6877 = shalt.err (!%p6874_p6)
}
 0x27e   : > { %6656 = dma.vmem_to_hbm [thread:$0]  (%p6998_p4), %s8792_s30, 32, %s8790_s27, %s5049_s4  }
 0x27f PF: > { %p6666_p7 = scmp.ge.s32.totalorder %s6932_s17, 2  ;;  %s5092_s23 = sand.u32 1, %s6912_s12  }
 0x280   : > { %s5093_s28 = scalar_lea.sflag [#allocation3], %s5092_s23 }
 0x281   : > { %p6660_p9 = pnand %p6666_p7, %p7005_p8 }
 0x283   : > { %6903 = dma.done.wait (!%p6660_p9), %s5093_s28, 2048  }
 0x284   : > { %6905 = vsyncadd (!%p6660_p9), %s5093_s28, 4294965248  ;;  %s5102_s29 = scalar_lea.sflag [#allocation5], %s5092_s23 }
 0x285   : > { %6907 = dma.done.wait (!%p6660_p9), %s5102_s29, 32  }
 0x286   : > { %6909 = vsyncadd (!%p6660_p9), %s5102_s29, 4294967264  ;;  %s20_s17 = sadd.s32 1, %s6932_s17   ;;  %s8911_s12 = smov %s6916_s13 }
 0x287   : > { %p17_p10 = scmp.ge.s32.totalorder %s20_s17, 4   ;;  %s8912_s13 = smov %s6920_s14 }
 0x288   : > { %s8913_s14 = smov %s7011_s25  ;;  %s8914_s15 = smov %s6928_s16 }
 0x289   : > { %s8915_s16 = smov %s8917_s20  ;;  %19 = sbr.rel (!%p17_p10) target bundleno = 6 (0x6), region = 91 }
 0x290   :  { %5107 = vsyncpa [#allocation3], 1 }
 0x291   :  { %5109 = vsyncpa [#allocation3 + $0x1], 1 }
 0x292   :  { %5110 = vsyncpa [#allocation5], 1 }
 0x293   :  { %5112 = vsyncpa [#allocation5 + $0x1], 1 }

</bundles_post_ra>
